<compile_context>
chip_gen: v5e
topology: v5e:2x2
jax: 0.10.0
libtpu: 0.0.40
codegen_flags: <defaults>
</compile_context>

<pallas_src>
import jax
import jax.numpy as jnp
from jax.experimental import pallas as pl
from jax.experimental.pallas import tpu as pltpu


def _combiner_kernel(img_ref, txt_ref,
                     wi_ref, bi_ref,        # image proj: D  -> 2D (bf16 / f32)
                     wt_ref, bt_ref,        # text  proj: D  -> 2D (bf16 / f32)
                     ws1_ref, bs1_ref,      # shared fc1 tile: 2D -> th
                     ws2_ref,               # shared fc2 weight tile as [1, th] f32 row
                     wc1_ref, bc1_ref,      # concat fc1 tile: 2D -> th
                     wc2_ref, bc2_ref,      # concat fc2 tile: th -> D, bias [1, D]
                     bs2_ref,               # shared fc2 bias, scalar in SMEM (f32)
                     out_ref,
                     comb_ref, side_acc_ref, central_acc_ref):
    j = pl.program_id(1)

    # First hidden tile of each batch tile: build `comb` once, zero accumulators.
    @pl.when(j == 0)
    def _():
        img = img_ref[...]                      # f32 [tb, D]
        txt = txt_ref[...]
        proj_img = jnp.maximum(
            jnp.dot(img.astype(jnp.bfloat16), wi_ref[...],
                    preferred_element_type=jnp.float32) + bi_ref[...], 0.0)
        proj_txt = jnp.maximum(
            jnp.dot(txt.astype(jnp.bfloat16), wt_ref[...],
                    preferred_element_type=jnp.float32) + bt_ref[...], 0.0)
        comb_ref[...] = proj_img * proj_txt     # f32 [tb, 2D]
        side_acc_ref[...] = jnp.zeros_like(side_acc_ref)
        central_acc_ref[...] = jnp.zeros_like(central_acc_ref)

    comb_bf = comb_ref[...].astype(jnp.bfloat16)

    # Shared branch fc1 tile + lane reduction toward the scalar logit.
    h_s = jnp.maximum(
        jnp.dot(comb_bf, ws1_ref[...], preferred_element_type=jnp.float32)
        + bs1_ref[...], 0.0)                    # f32 [tb, th]
    side_acc_ref[...] += jnp.sum(h_s * ws2_ref[...], axis=-1, keepdims=True)

    # Concat branch fc1 tile + fc2 partial product (accumulated over tiles).
    h_c = jnp.maximum(
        jnp.dot(comb_bf, wc1_ref[...], preferred_element_type=jnp.float32)
        + bc1_ref[...], 0.0)                    # f32 [tb, th]
    central_acc_ref[...] += jnp.dot(h_c.astype(jnp.bfloat16), wc2_ref[...],
                                    preferred_element_type=jnp.float32)

    # Last hidden tile: sigmoid gate + residual mix, lane-dense output store.
    @pl.when(j == pl.num_programs(1) - 1)
    def _():
        side_logit = side_acc_ref[...] + bs2_ref[0, 0]          # f32 [tb, 1]
        side = pl.reciprocal(1.0 + jnp.exp(-side_logit), approx=True)
        out_ref[...] = (central_acc_ref[...] + bc2_ref[...]
                        + (1.0 - side) * img_ref[...] + side * txt_ref[...])


def _vmem_capacity_bytes():
    try:
        return int(pltpu.get_tpu_info().vmem_capacity_bytes)
    except Exception:
        return 64 << 20          # conservative (v7x per-TensorCore)


def _pick_batch_tile(B, cap):
    """Largest divisor of B <= cap, preferring multiples of 8."""
    divs = [t for t in range(1, min(B, cap) + 1) if B % t == 0]
    mult8 = [t for t in divs if t % 8 == 0]
    return (mult8 or divs)[-1]


def _hidden_tile_candidates(D4):
    cands, k = [], 1
    while k <= D4:
        t = D4 // k
        if D4 % k == 0 and t % 128 == 0:
            cands.append(t)
        k *= 2
    return cands or [D4]


def _vmem_estimate(D, tb, th, nh):
    """Tightened per-core VMEM footprint estimate (bytes)."""
    D2 = 2 * D
    bf, f32 = 2, 4
    nbuf = 1 if nh == 1 else 2
    const_w = 2 * D * D2 * bf + 2 * D2 * f32 + D * f32 + 256     # wi/wt + biases
    stream_w = nbuf * (2 * D2 * th * bf + th * D * bf + 3 * th * f32)
    io = 2 * 2 * tb * D * f32 + 2 * tb * D * f32                 # img/txt (x2buf) + out
    scratch = tb * D2 * f32 + tb * D * f32 + tb * 128 * f32      # comb + acc + side
    temps = 8 * tb * max(D2, th, D) * f32                        # live f32 temporaries
    return const_w + stream_w + io + scratch + temps


def combiner_forward(img, txt, params, *, tb=None, th=None):
    """img, txt: [B, D] float32. params: dict of pre-transposed weights."""
    B, D = img.shape
    assert txt.shape == (B, D)
    assert D % 128 == 0, "feature dim must be a multiple of 128 (lane width)"
    D2, D4 = 2 * D, 4 * D

    vmem_cap = _vmem_capacity_bytes()
    small_vmem = vmem_cap <= (96 << 20)                 # v7x-class TensorCore
    budget = vmem_cap - max(8 << 20, vmem_cap // 8)     # headroom for the compiler

    if tb is None:
        cap = 128 if small_vmem else 256
        if small_vmem and B >= 16:
            cap = min(cap, max(8, B // 2))              # >=2 grid steps for 2 TCs
        tb = _pick_batch_tile(B, cap)
    assert B % tb == 0

    if th is None:
        cands = _hidden_tile_candidates(D4)
        th = cands[-1]
        for cand in cands:                              # largest tile that fits
            if _vmem_estimate(D, tb, cand, D4 // cand) <= budget:
                th = cand
                break
    assert D4 % th == 0
    nh = D4 // th

    est = _vmem_estimate(D, tb, th, nh)
    vmem_limit = int(min(vmem_cap - (2 << 20), max(est + (16 << 20), 32 << 20)))

    def const(shape):
        # Same block every grid step -> single-buffered VMEM residency.
        return pl.BlockSpec(shape, lambda i, j: (0,) * len(shape),
                            pipeline_mode=pl.Buffered(1))

    def stream(shape, index_map):
        if nh == 1:   # index is constant anyway -> no need to double-buffer
            return pl.BlockSpec(shape, index_map, pipeline_mode=pl.Buffered(1))
        return pl.BlockSpec(shape, index_map)

    batch_spec = pl.BlockSpec((tb, D), lambda i, j: (i, 0))

    in_specs = [
        batch_spec,                                    # img
        batch_spec,                                    # txt
        const((D, D2)), const((1, D2)),                # wi, bi
        const((D, D2)), const((1, D2)),                # wt, bt
        stream((D2, th), lambda i, j: (0, j)),         # ws1 tile
        stream((1, th), lambda i, j: (0, j)),          # bs1 tile
        stream((1, th), lambda i, j: (0, j)),          # ws2 tile (row vector)
        stream((D2, th), lambda i, j: (0, j)),         # wc1 tile
        stream((1, th), lambda i, j: (0, j)),          # bc1 tile
        stream((th, D), lambda i, j: (j, 0)),          # wc2 tile
        const((1, D)),                                 # bc2
        pl.BlockSpec(memory_space=pltpu.MemorySpace.SMEM),   # bs2 scalar
    ]

    flops = 2 * B * (2 * D * D2 + 2 * D2 * D4 + D4 * D)
    bytes_accessed = (3 * B * D * 4
                      + (2 * D * D2 + 2 * D2 * D4 + D4 * D) * 2
                      + (2 * D2 + 3 * D4 + D + 1) * 4)

    return pl.pallas_call(
        _combiner_kernel,
        out_shape=jax.ShapeDtypeStruct((B, D), jnp.float32),
        grid=(B // tb, nh),
        in_specs=in_specs,
        out_specs=pl.BlockSpec((tb, D), lambda i, j: (i, 0)),
        scratch_shapes=[pltpu.VMEM((tb, D2), jnp.float32),   # comb cache
                        pltpu.VMEM((tb, 1), jnp.float32),    # side logit acc
                        pltpu.VMEM((tb, D), jnp.float32)],   # central acc
        compiler_params=pltpu.CompilerParams(
            dimension_semantics=("parallel", "arbitrary"),
            vmem_limit_bytes=vmem_limit),
        cost_estimate=pl.CostEstimate(flops=flops, transcendentals=B,
                                      bytes_accessed=bytes_accessed),
    )(img, txt,
      params["wi"], params["bi"],
      params["wt"], params["bt"],
      params["ws1"], params["bs1"], params["ws2"],
      params["wc1"], params["bc1"],
      params["wc2"], params["bc2"],
      params["bs2"])


def _reference_forward(img, txt, p):
    """Pure-JAX reference mirroring the kernel's bf16-weight / f32-accum math."""
    f32, bf = jnp.float32, jnp.bfloat16
    relu = lambda x: jnp.maximum(x, 0.0)
    pi = relu(jnp.dot(img.astype(bf), p["wi"], preferred_element_type=f32) + p["bi"])
    pt = relu(jnp.dot(txt.astype(bf), p["wt"], preferred_element_type=f32) + p["bt"])
    comb = pi * pt
    h_s = relu(jnp.dot(comb.astype(bf), p["ws1"], preferred_element_type=f32) + p["bs1"])
    h_c = relu(jnp.dot(comb.astype(bf), p["wc1"], preferred_element_type=f32) + p["bc1"])
    side = jax.nn.sigmoid(jnp.sum(h_s * p["ws2"], axis=-1, keepdims=True) + p["bs2"])
    central = jnp.dot(h_c.astype(bf), p["wc2"], preferred_element_type=f32) + p["bc2"]
    return central + (1.0 - side) * img + side * txt


def _init_params(key, D):
    """Deterministic synthetic weights, pre-transposed to [in, out].
    Matmul weights in bf16; biases / lane-reduction vector in f32."""
    D2, D4 = 2 * D, 4 * D
    ks = jax.random.split(key, 6)
    scale = lambda fan_in: 1.0 / jnp.sqrt(fan_in)
    bf = jnp.bfloat16
    return {
        "wi":  (jax.random.normal(ks[0], (D, D2), jnp.float32) * scale(D)).astype(bf),
        "bi":  jnp.zeros((1, D2), jnp.float32),
        "wt":  (jax.random.normal(ks[1], (D, D2), jnp.float32) * scale(D)).astype(bf),
        "bt":  jnp.zeros((1, D2), jnp.float32),
        "ws1": (jax.random.normal(ks[2], (D2, D4), jnp.float32) * scale(D2)).astype(bf),
        "bs1": jnp.full((1, D4), 0.01, jnp.float32),
        # nn.Linear(4D, 1) weight kept as a [1, 4D] f32 row vector; the kernel
        # reduces over lanes instead of doing a lane-width-1 matmul.
        "ws2": jax.random.normal(ks[3], (1, D4), jnp.float32) * scale(D4),
        "bs2": jnp.zeros((1, 1), jnp.float32),
        "wc1": (jax.random.normal(ks[4], (D2, D4), jnp.float32) * scale(D2)).astype(bf),
        "bc1": jnp.full((1, D4), 0.01, jnp.float32),
        "wc2": (jax.random.normal(ks[5], (D4, D), jnp.float32) * scale(D4)).astype(bf),
        "bc2": jnp.zeros((1, D), jnp.float32),
    }


if __name__ == "__main__":
    # Small shapes (PyTorch default input_dim is 1024); B=256 gives >=2 batch
    # grid steps on v7x-class parts so both TensorCores can be used.
    B, D = 256, 128
    key = jax.random.PRNGKey(0)
    k_img, k_txt, k_par = jax.random.split(key, 3)

    img = jax.random.normal(k_img, (B, D), jnp.float32)
    txt = jax.random.normal(k_txt, (B, D), jnp.float32)
    params = _init_params(k_par, D)

    # TODO(synk): nn.Dropout(p=0.5) is identity at inference time and is omitted.
    out = combiner_forward(img, txt, params)
    out = jax.block_until_ready(out)

    ref = _reference_forward(img, txt, params)
    assert out.shape == (B, D)
    max_err = float(jnp.max(jnp.abs(out - ref)))
    assert jnp.allclose(out, ref, atol=2e-2, rtol=2e-2), \
        f"mismatch vs reference (max abs err {max_err})"

    print("KERNEL_OK")
</pallas_src>

<mosaic_0001>
module attributes {stable_mosaic.version = 11 : i64} {
  func.func @_combiner_kernel(%arg0: i32, %arg1: i32, %arg2: memref<128x128xf32, #tpu.memory_space<vmem>>, %arg3: memref<128x128xf32, #tpu.memory_space<vmem>>, %arg4: memref<128x256xbf16, #tpu.memory_space<vmem>>, %arg5: memref<1x256xf32, #tpu.memory_space<vmem>>, %arg6: memref<128x256xbf16, #tpu.memory_space<vmem>>, %arg7: memref<1x256xf32, #tpu.memory_space<vmem>>, %arg8: memref<256x512xbf16, #tpu.memory_space<vmem>>, %arg9: memref<1x512xf32, #tpu.memory_space<vmem>>, %arg10: memref<1x512xf32, #tpu.memory_space<vmem>>, %arg11: memref<256x512xbf16, #tpu.memory_space<vmem>>, %arg12: memref<1x512xf32, #tpu.memory_space<vmem>>, %arg13: memref<512x128xbf16, #tpu.memory_space<vmem>>, %arg14: memref<1x128xf32, #tpu.memory_space<vmem>>, %arg15: memref<1x1xf32, #tpu.memory_space<smem>>, %arg16: memref<128x128xf32, #tpu.memory_space<vmem>>, %arg17: memref<128x256xf32, #tpu.memory_space<vmem>>, %arg18: memref<128x1xf32, #tpu.memory_space<vmem>>, %arg19: memref<128x128xf32, #tpu.memory_space<vmem>>) attributes {dimension_semantics = [#tpu.dimension_semantics<parallel>, #tpu.dimension_semantics<arbitrary>], iteration_bounds = array<i64: 2, 1>, scalar_prefetch = 0 : i64, scratch_operands = 3 : i64, tpu.core_type = #tpu.core_type<tc>, window_params = [{transform_indices = @transform_0, window_bounds = array<i64: 128, 128>}, {transform_indices = @transform_1, window_bounds = array<i64: 128, 128>}, {pipeline_mode = #tpu.pipeline_mode<synchronous>, transform_indices = @transform_2, window_bounds = array<i64: 128, 256>}, {pipeline_mode = #tpu.pipeline_mode<synchronous>, transform_indices = @transform_3, window_bounds = array<i64: 1, 256>}, {pipeline_mode = #tpu.pipeline_mode<synchronous>, transform_indices = @transform_4, window_bounds = array<i64: 128, 256>}, {pipeline_mode = #tpu.pipeline_mode<synchronous>, transform_indices = @transform_5, window_bounds = array<i64: 1, 256>}, {pipeline_mode = #tpu.pipeline_mode<synchronous>, transform_indices = @transform_6, window_bounds = array<i64: 256, 512>}, {pipeline_mode = #tpu.pipeline_mode<synchronous>, transform_indices = @transform_7, window_bounds = array<i64: 1, 512>}, {pipeline_mode = #tpu.pipeline_mode<synchronous>, transform_indices = @transform_8, window_bounds = array<i64: 1, 512>}, {pipeline_mode = #tpu.pipeline_mode<synchronous>, transform_indices = @transform_9, window_bounds = array<i64: 256, 512>}, {pipeline_mode = #tpu.pipeline_mode<synchronous>, transform_indices = @transform_10, window_bounds = array<i64: 1, 512>}, {pipeline_mode = #tpu.pipeline_mode<synchronous>, transform_indices = @transform_11, window_bounds = array<i64: 512, 128>}, {pipeline_mode = #tpu.pipeline_mode<synchronous>, transform_indices = @transform_12, window_bounds = array<i64: 1, 128>}, {transform_indices = @transform_13, window_bounds = array<i64: 1, 1>}, {transform_indices = @transform_14, window_bounds = array<i64: 128, 128>}]} {
    %c0_i32 = arith.constant 0 : i32
    %0 = arith.cmpi eq, %arg1, %c0_i32 : i32
    %1 = arith.extui %0 : i1 to i32
    %c0_i32_0 = arith.constant 0 : i32
    %2 = arith.cmpi ne, %1, %c0_i32_0 : i32
    scf.if %2 {
      %c0_29 = arith.constant 0 : index
      %c0_30 = arith.constant 0 : index
      %36 = vector.load %arg2[%c0_29, %c0_30] : memref<128x128xf32, #tpu.memory_space<vmem>>, vector<128x128xf32>
      %c0_31 = arith.constant 0 : index
      %c0_32 = arith.constant 0 : index
      %37 = vector.load %arg3[%c0_31, %c0_32] : memref<128x128xf32, #tpu.memory_space<vmem>>, vector<128x128xf32>
      %38 = arith.truncf %36 : vector<128x128xf32> to vector<128x128xbf16>
      %c0_33 = arith.constant 0 : index
      %c0_34 = arith.constant 0 : index
      %39 = vector.load %arg4[%c0_33, %c0_34] : memref<128x256xbf16, #tpu.memory_space<vmem>>, vector<128x256xbf16>
      %cst_35 = arith.constant dense<0.000000e+00> : vector<128x256xf32>
      %40 = tpu.matmul %38, %39, %cst_35 {dimension_numbers = #tpu.dot_dimension_numbers<[1], [0], [0], [1], [0, 0, 1, 1], [], []>} : vector<128x128xbf16>, vector<128x256xbf16>, vector<128x256xf32> -> vector<128x256xf32>
      %c0_36 = arith.constant 0 : index
      %c0_37 = arith.constant 0 : index
      %41 = vector.load %arg5[%c0_36, %c0_37] : memref<1x256xf32, #tpu.memory_space<vmem>>, vector<1x256xf32>
      %42 = vector.broadcast %41 : vector<1x256xf32> to vector<128x256xf32>
      %43 = arith.addf %40, %42 : vector<128x256xf32>
      %cst_38 = arith.constant 0.000000e+00 : f32
      %44 = vector.broadcast %cst_38 : f32 to vector<128x256xf32>
      %45 = arith.maximumf %43, %44 : vector<128x256xf32>
      %46 = arith.truncf %37 : vector<128x128xf32> to vector<128x128xbf16>
      %c0_39 = arith.constant 0 : index
      %c0_40 = arith.constant 0 : index
      %47 = vector.load %arg6[%c0_39, %c0_40] : memref<128x256xbf16, #tpu.memory_space<vmem>>, vector<128x256xbf16>
      %cst_41 = arith.constant dense<0.000000e+00> : vector<128x256xf32>
      %48 = tpu.matmul %46, %47, %cst_41 {dimension_numbers = #tpu.dot_dimension_numbers<[1], [0], [0], [1], [0, 0, 1, 1], [], []>} : vector<128x128xbf16>, vector<128x256xbf16>, vector<128x256xf32> -> vector<128x256xf32>
      %c0_42 = arith.constant 0 : index
      %c0_43 = arith.constant 0 : index
      %49 = vector.load %arg7[%c0_42, %c0_43] : memref<1x256xf32, #tpu.memory_space<vmem>>, vector<1x256xf32>
      %50 = vector.broadcast %49 : vector<1x256xf32> to vector<128x256xf32>
      %51 = arith.addf %48, %50 : vector<128x256xf32>
      %cst_44 = arith.constant 0.000000e+00 : f32
      %52 = vector.broadcast %cst_44 : f32 to vector<128x256xf32>
      %53 = arith.maximumf %51, %52 : vector<128x256xf32>
      %54 = arith.mulf %45, %53 : vector<128x256xf32>
      %c0_45 = arith.constant 0 : index
      %c0_46 = arith.constant 0 : index
      %55 = vector.load %arg17[%c0_45, %c0_46] : memref<128x256xf32, #tpu.memory_space<vmem>>, vector<128x256xf32>
      tpu.vector_store %arg17[%c0_45, %c0_46], %54 {strides = array<i32>} : memref<128x256xf32, #tpu.memory_space<vmem>>, vector<128x256xf32>,
      %cst_47 = arith.constant 0.000000e+00 : f32
      %56 = vector.broadcast %cst_47 : f32 to vector<128x1xf32>
      %c0_48 = arith.constant 0 : index
      %c0_49 = arith.constant 0 : index
      %57 = vector.load %arg18[%c0_48, %c0_49] : memref<128x1xf32, #tpu.memory_space<vmem>>, vector<128x1xf32>
      tpu.vector_store %arg18[%c0_48, %c0_49], %56 {strides = array<i32>} : memref<128x1xf32, #tpu.memory_space<vmem>>, vector<128x1xf32>,
      %cst_50 = arith.constant 0.000000e+00 : f32
      %58 = vector.broadcast %cst_50 : f32 to vector<128x128xf32>
      %c0_51 = arith.constant 0 : index
      %c0_52 = arith.constant 0 : index
      %59 = vector.load %arg19[%c0_51, %c0_52] : memref<128x128xf32, #tpu.memory_space<vmem>>, vector<128x128xf32>
      tpu.vector_store %arg19[%c0_51, %c0_52], %58 {strides = array<i32>} : memref<128x128xf32, #tpu.memory_space<vmem>>, vector<128x128xf32>,
    } else {
    }
    %c0 = arith.constant 0 : index
    %c0_1 = arith.constant 0 : index
    %3 = vector.load %arg17[%c0, %c0_1] : memref<128x256xf32, #tpu.memory_space<vmem>>, vector<128x256xf32>
    %4 = arith.truncf %3 : vector<128x256xf32> to vector<128x256xbf16>
    %c0_2 = arith.constant 0 : index
    %c0_3 = arith.constant 0 : index
    %5 = vector.load %arg8[%c0_2, %c0_3] : memref<256x512xbf16, #tpu.memory_space<vmem>>, vector<256x512xbf16>
    %cst = arith.constant dense<0.000000e+00> : vector<128x512xf32>
    %6 = tpu.matmul %4, %5, %cst {dimension_numbers = #tpu.dot_dimension_numbers<[1], [0], [0], [1], [0, 0, 1, 1], [], []>} : vector<128x256xbf16>, vector<256x512xbf16>, vector<128x512xf32> -> vector<128x512xf32>
    %c0_4 = arith.constant 0 : index
    %c0_5 = arith.constant 0 : index
    %7 = vector.load %arg9[%c0_4, %c0_5] : memref<1x512xf32, #tpu.memory_space<vmem>>, vector<1x512xf32>
    %8 = vector.broadcast %7 : vector<1x512xf32> to vector<128x512xf32>
    %9 = arith.addf %6, %8 : vector<128x512xf32>
    %cst_6 = arith.constant 0.000000e+00 : f32
    %10 = vector.broadcast %cst_6 : f32 to vector<128x512xf32>
    %11 = arith.maximumf %9, %10 : vector<128x512xf32>
    %c0_7 = arith.constant 0 : index
    %c0_8 = arith.constant 0 : index
    %12 = vector.load %arg18[%c0_7, %c0_8] : memref<128x1xf32, #tpu.memory_space<vmem>>, vector<128x1xf32>
    %c0_9 = arith.constant 0 : index
    %c0_10 = arith.constant 0 : index
    %13 = vector.load %arg10[%c0_9, %c0_10] : memref<1x512xf32, #tpu.memory_space<vmem>>, vector<1x512xf32>
    %14 = vector.broadcast %13 : vector<1x512xf32> to vector<128x512xf32>
    %15 = arith.mulf %11, %14 : vector<128x512xf32>
    %cst_11 = arith.constant dense<0.000000e+00> : vector<128xf32>
    %16 = vector.multi_reduction <add>, %15, %cst_11 [1] : vector<128x512xf32> to vector<128xf32>
    %17 = vector.shape_cast %16 : vector<128xf32> to vector<128x1xf32>
    %18 = arith.addf %12, %17 : vector<128x1xf32>
    %c0_12 = arith.constant 0 : index
    %c0_13 = arith.constant 0 : index
    %19 = vector.load %arg18[%c0_12, %c0_13] : memref<128x1xf32, #tpu.memory_space<vmem>>, vector<128x1xf32>
    tpu.vector_store %arg18[%c0_12, %c0_13], %18 {strides = array<i32>} : memref<128x1xf32, #tpu.memory_space<vmem>>, vector<128x1xf32>,
    %c0_14 = arith.constant 0 : index
    %c0_15 = arith.constant 0 : index
    %20 = vector.load %arg11[%c0_14, %c0_15] : memref<256x512xbf16, #tpu.memory_space<vmem>>, vector<256x512xbf16>
    %cst_16 = arith.constant dense<0.000000e+00> : vector<128x512xf32>
    %21 = tpu.matmul %4, %20, %cst_16 {dimension_numbers = #tpu.dot_dimension_numbers<[1], [0], [0], [1], [0, 0, 1, 1], [], []>} : vector<128x256xbf16>, vector<256x512xbf16>, vector<128x512xf32> -> vector<128x512xf32>
    %c0_17 = arith.constant 0 : index
    %c0_18 = arith.constant 0 : index
    %22 = vector.load %arg12[%c0_17, %c0_18] : memref<1x512xf32, #tpu.memory_space<vmem>>, vector<1x512xf32>
    %23 = vector.broadcast %22 : vector<1x512xf32> to vector<128x512xf32>
    %24 = arith.addf %21, %23 : vector<128x512xf32>
    %cst_19 = arith.constant 0.000000e+00 : f32
    %25 = vector.broadcast %cst_19 : f32 to vector<128x512xf32>
    %26 = arith.maximumf %24, %25 : vector<128x512xf32>
    %c0_20 = arith.constant 0 : index
    %c0_21 = arith.constant 0 : index
    %27 = vector.load %arg19[%c0_20, %c0_21] : memref<128x128xf32, #tpu.memory_space<vmem>>, vector<128x128xf32>
    %28 = arith.truncf %26 : vector<128x512xf32> to vector<128x512xbf16>
    %c0_22 = arith.constant 0 : index
    %c0_23 = arith.constant 0 : index
    %29 = vector.load %arg13[%c0_22, %c0_23] : memref<512x128xbf16, #tpu.memory_space<vmem>>, vector<512x128xbf16>
    %cst_24 = arith.constant dense<0.000000e+00> : vector<128x128xf32>
    %30 = tpu.matmul %28, %29, %cst_24 {dimension_numbers = #tpu.dot_dimension_numbers<[1], [0], [0], [1], [0, 0, 1, 1], [], []>} : vector<128x512xbf16>, vector<512x128xbf16>, vector<128x128xf32> -> vector<128x128xf32>
    %31 = arith.addf %27, %30 : vector<128x128xf32>
    %c0_25 = arith.constant 0 : index
    %c0_26 = arith.constant 0 : index
    %32 = vector.load %arg19[%c0_25, %c0_26] : memref<128x128xf32, #tpu.memory_space<vmem>>, vector<128x128xf32>
    tpu.vector_store %arg19[%c0_25, %c0_26], %31 {strides = array<i32>} : memref<128x128xf32, #tpu.memory_space<vmem>>, vector<128x128xf32>,
    %c0_i32_27 = arith.constant 0 : i32
    %33 = arith.cmpi eq, %arg1, %c0_i32_27 : i32
    %34 = arith.extui %33 : i1 to i32
    %c0_i32_28 = arith.constant 0 : i32
    %35 = arith.cmpi ne, %34, %c0_i32_28 : i32
    scf.if %35 {
      %c0_29 = arith.constant 0 : index
      %c0_30 = arith.constant 0 : index
      %36 = vector.load %arg18[%c0_29, %c0_30] : memref<128x1xf32, #tpu.memory_space<vmem>>, vector<128x1xf32>
      %c0_31 = arith.constant 0 : index
      %c0_32 = arith.constant 0 : index
      %37 = memref.load %arg15[%c0_31, %c0_32] : memref<1x1xf32, #tpu.memory_space<smem>>
      %38 = vector.broadcast %37 : f32 to vector<128x1xf32>
      %39 = arith.addf %36, %38 : vector<128x1xf32>
      %cst_33 = arith.constant 0.000000e+00 : f32
      %40 = vector.broadcast %cst_33 : f32 to vector<128x1xf32>
      %41 = arith.subf %40, %39 : vector<128x1xf32>
      %42 = math.exp %41 : vector<128x1xf32>
      %cst_34 = arith.constant 1.000000e+00 : f32
      %43 = vector.broadcast %cst_34 : f32 to vector<128x1xf32>
      %44 = arith.addf %43, %42 : vector<128x1xf32>
      %45 = tpu.reciprocal %44 {approx = true} : vector<128x1xf32> -> vector<128x1xf32>
      %c0_35 = arith.constant 0 : index
      %c0_36 = arith.constant 0 : index
      %46 = vector.load %arg19[%c0_35, %c0_36] : memref<128x128xf32, #tpu.memory_space<vmem>>, vector<128x128xf32>
      %c0_37 = arith.constant 0 : index
      %c0_38 = arith.constant 0 : index
      %47 = vector.load %arg14[%c0_37, %c0_38] : memref<1x128xf32, #tpu.memory_space<vmem>>, vector<1x128xf32>
      %48 = vector.broadcast %47 : vector<1x128xf32> to vector<128x128xf32>
      %49 = arith.addf %46, %48 : vector<128x128xf32>
      %cst_39 = arith.constant 1.000000e+00 : f32
      %50 = vector.broadcast %cst_39 : f32 to vector<128x1xf32>
      %51 = arith.subf %50, %45 : vector<128x1xf32>
      %c0_40 = arith.constant 0 : index
      %c0_41 = arith.constant 0 : index
      %52 = vector.load %arg2[%c0_40, %c0_41] : memref<128x128xf32, #tpu.memory_space<vmem>>, vector<128x128xf32>
      %53 = vector.broadcast %51 : vector<128x1xf32> to vector<128x128xf32>
      %54 = arith.mulf %53, %52 : vector<128x128xf32>
      %55 = arith.addf %49, %54 : vector<128x128xf32>
      %c0_42 = arith.constant 0 : index
      %c0_43 = arith.constant 0 : index
      %56 = vector.load %arg3[%c0_42, %c0_43] : memref<128x128xf32, #tpu.memory_space<vmem>>, vector<128x128xf32>
      %57 = vector.broadcast %45 : vector<128x1xf32> to vector<128x128xf32>
      %58 = arith.mulf %57, %56 : vector<128x128xf32>
      %59 = arith.addf %55, %58 : vector<128x128xf32>
      %c0_44 = arith.constant 0 : index
      %c0_45 = arith.constant 0 : index
      %60 = vector.load %arg16[%c0_44, %c0_45] : memref<128x128xf32, #tpu.memory_space<vmem>>, vector<128x128xf32>
      tpu.vector_store %arg16[%c0_44, %c0_45], %59 {strides = array<i32>} : memref<128x128xf32, #tpu.memory_space<vmem>>, vector<128x128xf32>,
    } else {
    }
    return
  }
  func.func @transform_0(%arg0: i32, %arg1: i32) -> (i32, i32) {
    %c0_i32 = arith.constant 0 : i32
    %c0_i32_0 = arith.constant 0 : i32
    return %arg0, %c0_i32 : i32, i32
  }
  func.func @transform_1(%arg0: i32, %arg1: i32) -> (i32, i32) {
    %c0_i32 = arith.constant 0 : i32
    %c0_i32_0 = arith.constant 0 : i32
    return %arg0, %c0_i32 : i32, i32
  }
  func.func @transform_2(%arg0: i32, %arg1: i32) -> (i32, i32) {
    %c0_i32 = arith.constant 0 : i32
    %c0_i32_0 = arith.constant 0 : i32
    %c0_i32_1 = arith.constant 0 : i32
    return %c0_i32, %c0_i32_0 : i32, i32
  }
  func.func @transform_3(%arg0: i32, %arg1: i32) -> (i32, i32) {
    %c0_i32 = arith.constant 0 : i32
    %c0_i32_0 = arith.constant 0 : i32
    %c0_i32_1 = arith.constant 0 : i32
    return %c0_i32, %c0_i32_0 : i32, i32
  }
  func.func @transform_4(%arg0: i32, %arg1: i32) -> (i32, i32) {
    %c0_i32 = arith.constant 0 : i32
    %c0_i32_0 = arith.constant 0 : i32
    %c0_i32_1 = arith.constant 0 : i32
    return %c0_i32, %c0_i32_0 : i32, i32
  }
  func.func @transform_5(%arg0: i32, %arg1: i32) -> (i32, i32) {
    %c0_i32 = arith.constant 0 : i32
    %c0_i32_0 = arith.constant 0 : i32
    %c0_i32_1 = arith.constant 0 : i32
    return %c0_i32, %c0_i32_0 : i32, i32
  }
  func.func @transform_6(%arg0: i32, %arg1: i32) -> (i32, i32) {
    %c0_i32 = arith.constant 0 : i32
    %c0_i32_0 = arith.constant 0 : i32
    return %c0_i32, %arg1 : i32, i32
  }
  func.func @transform_7(%arg0: i32, %arg1: i32) -> (i32, i32) {
    %c0_i32 = arith.constant 0 : i32
    %c0_i32_0 = arith.constant 0 : i32
    return %c0_i32, %arg1 : i32, i32
  }
  func.func @transform_8(%arg0: i32, %arg1: i32) -> (i32, i32) {
    %c0_i32 = arith.constant 0 : i32
    %c0_i32_0 = arith.constant 0 : i32
    return %c0_i32, %arg1 : i32, i32
  }
  func.func @transform_9(%arg0: i32, %arg1: i32) -> (i32, i32) {
    %c0_i32 = arith.constant 0 : i32
    %c0_i32_0 = arith.constant 0 : i32
    return %c0_i32, %arg1 : i32, i32
  }
  func.func @transform_10(%arg0: i32, %arg1: i32) -> (i32, i32) {
    %c0_i32 = arith.constant 0 : i32
    %c0_i32_0 = arith.constant 0 : i32
    return %c0_i32, %arg1 : i32, i32
  }
  func.func @transform_11(%arg0: i32, %arg1: i32) -> (i32, i32) {
    %c0_i32 = arith.constant 0 : i32
    %c0_i32_0 = arith.constant 0 : i32
    return %arg1, %c0_i32 : i32, i32
  }
  func.func @transform_12(%arg0: i32, %arg1: i32) -> (i32, i32) {
    %c0_i32 = arith.constant 0 : i32
    %c0_i32_0 = arith.constant 0 : i32
    %c0_i32_1 = arith.constant 0 : i32
    return %c0_i32, %c0_i32_0 : i32, i32
  }
  func.func @transform_13(%arg0: i32, %arg1: i32) -> (i32, i32) {
    %c0_i32 = arith.constant 0 : i32
    %c0_i32_0 = arith.constant 0 : i32
    %c0_i32_1 = arith.constant 0 : i32
    return %c0_i32, %c0_i32_0 : i32, i32
  }
  func.func @transform_14(%arg0: i32, %arg1: i32) -> (i32, i32) {
    %c0_i32 = arith.constant 0 : i32
    %c0_i32_0 = arith.constant 0 : i32
    return %arg0, %c0_i32 : i32, i32
  }
}

</mosaic_0001>

<bundles_post_ra>
// kernel: tpu_custom_call.1
= control target key start
LH: loop header
LB: loop body
LE: loop exit
PB: predicated region body
PF: predicated region fallthrough
CT: control target
= control target key end

     0   :  { %s7216_s0 = inlined_call_operand.hbm [shape: f32[256,128], index: 0, kind: input, shape index: {}]   ;;  %s7217_s1 = inlined_call_operand.hbm [shape: f32[256,128], index: 1, kind: input, shape index: {}]   ;;  %s7218_s2 = inlined_call_operand.hbm [shape: bf16[128,256], index: 2, kind: input, shape index: {}]   ;;  %s7219_s3 = inlined_call_operand.hbm [shape: f32[1,256], index: 3, kind: input, shape index: {}]   ;;  %s7220_s4 = inlined_call_operand.hbm [shape: bf16[128,256], index: 4, kind: input, shape index: {}]   ;;  %s7221_s5 = inlined_call_operand.hbm [shape: f32[1,256], index: 5, kind: input, shape index: {}]   ;;  %s7222_s6 = inlined_call_operand.hbm [shape: bf16[256,512], index: 6, kind: input, shape index: {}]   ;;  %s7223_s7 = inlined_call_operand.vmem [shape: f32[1,512], index: 7, kind: input, shape index: {}]   ;;  %s7224_s8 = inlined_call_operand.vmem [shape: f32[1,512], index: 8, kind: input, shape index: {}]   ;;  %s7225_s9 = inlined_call_operand.hbm [shape: bf16[256,512], index: 9, kind: input, shape index: {}]   ;;  %s7226_s10 = inlined_call_operand.hbm [shape: f32[1,512], index: 10, kind: input, shape index: {}]   ;;  %s7227_s11 = inlined_call_operand.hbm [shape: bf16[512,128], index: 11, kind: input, shape index: {}]   ;;  %s7228_s12 = inlined_call_operand.vmem [shape: f32[1,128], index: 12, kind: input, shape index: {}]   ;;  %s7229_s13 = inlined_call_operand.<no memory space> [shape: f32[1,1], index: 13, kind: input, shape index: {}]   ;;  %s7230_s14 = inlined_call_operand.hbm [shape: f32[256,128], index: 14, kind: output, shape index: {}]  }
   0x1   :  { %7238 = sst [smem:[#allocation35_spill]] %s7218_s2 }
   0x2   :  { %7239 = sst [smem:[#allocation36_spill]] %s7219_s3 }
   0x3   :  { %7240 = sst [smem:[#allocation37_spill]] %s7220_s4 }
   0x4   :  { %7241 = sst [smem:[#allocation38_spill]] %s7221_s5 }
   0x5   :  { %7242 = sst [smem:[#allocation39_spill]] %s7222_s6 }
   0x6   :  { %7243 = sst [smem:[#allocation40_spill]] %s7223_s7 }
   0x7   :  { %7244 = sst [smem:[#allocation41_spill]] %s7224_s8 }
   0x8   :  { %7245 = sst [smem:[#allocation42_spill]] %s7225_s9 }
   0x9   :  { %7246 = sst [smem:[#allocation43_spill]] %s7226_s10 }
   0xa   :  { %7247 = sst [smem:[#allocation44_spill]] %s7227_s11 }
   0xb   :  { %7248 = sst [smem:[#allocation45_spill]] %s7228_s12 }
   0xc   :  { %7249 = sst [smem:[#allocation46_spill]] %s7230_s14 }
   0xd   :  { %19 = sst [smem:[#allocation5]] %s7229_s13 }
   0xe   :  { %20 = vsyncpa [#allocation7], 0 }
   0xf   :  { %22 = vsyncpa [#allocation7 + $0x1], 0 }
  0x10   :  { %23 = vsyncpa [#allocation10], 0 }
  0x11   :  { %25 = vsyncpa [#allocation10 + $0x1], 0 }
  0x12   :  { %26 = vsyncpa [#allocation13], 0 }
  0x13   :  { %27 = vsyncpa [#allocation16], 0 }
  0x14   :  { %28 = vsyncpa [#allocation19], 0 }
  0x15   :  { %29 = vsyncpa [#allocation22], 0 }
  0x16   :  { %30 = vsyncpa [#allocation8], 0 }
  0x17   :  { %32 = vsyncpa [#allocation8 + $0x1], 0  ;;  %s6241_s15 = smov 0   ;;  %s6243_s16 = smov 0  }
  0x18   :  { %s6245_s17 = smov 0   ;;  %s6247_s18 = smov 0  }
  0x19   :  { %s6249_s19 = smov 0   ;;  %s6251_s13 = smov 0  }
  0x1a LB: > { %7250 = sst [smem:[#allocation32_spill]] %s6135_s18  ;;  %s6272_s20 = sadd.s32 4294967295, %s6143_s13   ;;  %s6143_s13 = sphi %s6251_s13, %s38_s13   ;;  %s6139_s19 = sphi %s6249_s19, %s7275_s19   ;;  %s6135_s18 = sphi %s6247_s18, %s7274_s18   ;;  %s6131_s17 = sphi %s6245_s17, %s7278_s17   ;;  %s6127_s16 = sphi %s6243_s16, %s7277_s16   ;;  %s6123_s15 = sphi %s6241_s15, %s7276_s15  }
  0x1b   : > { %7251 = sst [smem:[#allocation33_spill]] %s6139_s19  ;;  %p4512_p0 = scmp.ge.s32.totalorder %s6143_s13, 1 }
  0x1c   : > { %p71_p1 = scmp.eq.s32.totalorder %s6272_s20, 0  ;;  %p415_p2 = scmp.lt.s32.totalorder %s6143_s13, 3 }
  0x1d   : > { %s7252_s2 = sld [smem:[#allocation35_spill]]  ;;  %s6145_s25 = smov [#allocation11]  }
  0x1e   : > { %p6280_p3 = pnand %p4512_p0, %p415_p2  ;;  %s428_s26 = sshll.u32 %s6145_s25, 4  ;;  %s429_s26 = int_to_ptr.vmem [resolvable:$true] %s428_s26 }
  0x1f   : > { %p4523_p6 = scmp.ge.s32.totalorder %s6143_s13, 2  ;;  %s7255_s3 = sld [smem:[#allocation36_spill]] }
  0x20   : > { %p5548_p4 = pneg %p6280_p3  ;;  %s7232_s21 = smov 128  }
  0x21   : > { %s7234_s22 = smov 8   ;;  %s6148_s25 = smov [#allocation12]  }
  0x22   : > { %p6288_p5 = pnand %p5548_p4, %p71_p1  ;;  %s7256_s5 = sld [smem:[#allocation38_spill]] }
  0x23   : > { %s426_s23 = sshll.u32 %s7252_s2, 4  ;;  %s443_s2 = sshll.u32 %s6148_s25, 4  ;;  %s427_s23 = int_to_ptr.hbm [resolvable:$true] %s426_s23  ;;  %s444_s2 = int_to_ptr.vmem [resolvable:$true] %s443_s2 }
  0x24   : > { %5551 = dma.hbm_to_vmem [thread:$0]  (!%p6288_p5), %s427_s23, 2048, %s429_s26, [#allocation10], %s7232_s21, %s7232_s21, %s7234_s22  }
  0x25   : > { %s441_s30 = sshll.u32 %s7255_s3, 4  ;;  %s6149_s28 = smov [#allocation15]   ;;  %s442_s30 = int_to_ptr.hbm [resolvable:$true] %s441_s30 }
  0x26   : > { %5554 = dma.hbm_to_vmem [thread:$0]  (!%p6288_p5), %s442_s30, 32, %s444_s2, [#allocation13]  }
  0x27   : > { %s469_s29 = sshll.u32 %s6149_s28, 4  ;;  %s7257_s9 = sld [smem:[#allocation42_spill]]  ;;  %s470_s29 = int_to_ptr.vmem [resolvable:$true] %s469_s29 }
  0x28   : > { %s467_s12 = sshll.u32 %s7256_s5, 4  ;;  %s6150_s23 = smov [#allocation18]   ;;  %s468_s12 = int_to_ptr.hbm [resolvable:$true] %s467_s12 }
  0x29   : > { %5560 = dma.hbm_to_vmem [thread:$0]  (!%p6288_p5), %s468_s12, 32, %s470_s29, [#allocation16]  }
  0x2a   : > { %s516_s26 = sshll.u32 %s6150_s23, 4  ;;  %s7258_s4 = sld [smem:[#allocation37_spill]]  ;;  %s517_s26 = int_to_ptr.vmem [resolvable:$true] %s516_s26 }
  0x2b   : > { %s6151_s2 = smov 256   ;;  %s6152_s30 = smov 16  }
  0x2c   : > { %s7259_s6 = sld [smem:[#allocation39_spill]]  ;;  %s6153_s21 = smov [#allocation14]  }
  0x2d   : > { %s514_s7 = sshll.u32 %s7257_s9, 4  ;;  %s454_s12 = sshll.u32 %s6153_s21, 4  ;;  %s515_s7 = int_to_ptr.hbm [resolvable:$true] %s514_s7  ;;  %s455_s12 = int_to_ptr.vmem [resolvable:$true] %s454_s12 }
  0x2e   : > { %5566 = dma.hbm_to_vmem [thread:$0]  (!%p6288_p5), %s515_s7, 8192, %s517_s26, [#allocation19], %s6151_s2, %s6151_s2, %s6152_s30  }
  0x2f   : > { %s7260_s29 = smov 128   ;;  %s6154_s23 = smov [#allocation17]  }
  0x30   : > { %s452_s25 = sshll.u32 %s7258_s4, 4  ;;  %s483_s14 = sshll.u32 %s6154_s23, 4  ;;  %s453_s25 = int_to_ptr.hbm [resolvable:$true] %s452_s25  ;;  %s484_s14 = int_to_ptr.vmem [resolvable:$true] %s483_s14 }
  0x31   : > { %5557 = dma.hbm_to_vmem [thread:$0]  (!%p6288_p5), %s453_s25, 2048, %s455_s12, [#allocation13], %s7260_s29, %s7260_s29, %s7234_s22  }
  0x32   : > { %s481_s8 = sshll.u32 %s7259_s6, 4  ;;  %s7261_s10 = sld [smem:[#allocation43_spill]]  ;;  %s482_s8 = int_to_ptr.hbm [resolvable:$true] %s481_s8 }
  0x33   : > { %5563 = dma.hbm_to_vmem [thread:$0]  (!%p6288_p5), %s482_s8, 8192, %s484_s14, [#allocation16], %s6151_s2, %s6151_s2, %s6152_s30  }
  0x34   : > { %s7262_s11 = sld [smem:[#allocation44_spill]]  ;;  %s6155_s25 = smov [#allocation20]  }
  0x35   : > { %s533_s3 = sshll.u32 %s6155_s25, 4  ;;  %s6156_s4 = smov [#allocation21]   ;;  %s534_s3 = int_to_ptr.vmem [resolvable:$true] %s533_s3 }
  0x36   : > { %s547_s2 = sshll.u32 %s6156_s4, 4  ;;  %s6157_s30 = smov 64   ;;  %s548_s2 = int_to_ptr.vmem [resolvable:$true] %s547_s2 }
  0x37   : > { %s6158_s8 = smov 4   ;;  %s4511_s12 = sadd.s32 4294967294, %s6143_s13  }
  0x38   : > { %s531_s7 = sshll.u32 %s7261_s10, 4  ;;  %s50_s23 = sadd.s32 1, %s6139_s19  ;;  %s532_s7 = int_to_ptr.hbm [resolvable:$true] %s531_s7 }
  0x39   : > { %5569 = dma.hbm_to_vmem [thread:$0]  (!%p6288_p5), %s532_s7, 64, %s534_s3, [#allocation19]  }
  0x3a   : > { %s545_s28 = sshll.u32 %s7262_s11, 4  ;;  %p52_p7 = scmp.ge.s32.totalorder %s50_s23, 2  ;;  %s546_s28 = int_to_ptr.hbm [resolvable:$true] %s545_s28 }
  0x3b   : > { %5572 = dma.hbm_to_vmem [thread:$0]  (!%p6288_p5), %s546_s28, 4096, %s548_s2, [#allocation22], %s6157_s30, %s6157_s30, %s6158_s8  }
  0x3c   : > { %s57_s14 = sadd.s32 1, %s6131_s17  ;;  %p64_p8 = scmp.ne.s32.totalorder %s6131_s17, %s6127_s16 }
  0x3d   : > { %p65_p9 = scmp.eq.s32.totalorder %s6143_s13, 0  ;;  %s7280_s23 = smov (%p52_p7, %s50_s23), 0 }
  0x3e   : > { %7263 = sst [smem:[#allocation34_spill]] %s7280_s23  ;;  %p70_p11 = scmp.ne.s32.totalorder %s6127_s16, %s6123_s15 }
  0x3f   : > { %p6344_p10 = por %p65_p9, %p64_p8  ;;  %s54_s27 = ssub.s32 %s6139_s19, %s7280_s23 }
  0x40   : > { %p402_p12 = scmp.eq.s32.totalorder %s6272_s20, 1  ;;  %p55_p13 = scmp.eq.s32.totalorder %s54_s27, 0 }
  0x41   : > { %p6355_p0 = por %p71_p1, %p70_p11  ;;  %p408_p4 = scmp.eq.s32.totalorder %s4511_s12, 1 }
  0x42   : > { %p6359_p2 = por %p402_p12, %p64_p8  ;;  %p5592_p7 = scmp.lt.s32.totalorder %s6143_s13, 2 }
  0x43   : > { %s6364_s26 = scalar_select %p55_p13, %s6131_s17, %s57_s14  }
  0x44   : > { %p6366_p5 = por %p408_p4, %p70_p11  ;;  %s567_s25 = sand.u32 1, %s6131_s17  }
  0x45   : > { %s5315_s3 = sshll.u32 %s6139_s19, 7  ;;  %s4524_s4 = sshll.u32 %s567_s25, 7 }
  0x46   : > { %s576_s8 = scalar_lea.hbm %s7216_s0, %s5315_s3  ;;  %s571_s22 = scalar_lea.vmem [#allocation6], %s4524_s4 }
  0x47   : > { %s577_s27 = sshll.u32 %s576_s8, 4  ;;  %s579_s5 = sshll.u32 %s571_s22, 4  ;;  %s578_s27 = int_to_ptr.hbm [resolvable:$true] %s577_s27  ;;  %s580_s5 = int_to_ptr.vmem [resolvable:$true] %s579_s5 }
  0x48   : > { %p5574_p8 = pnand %p5592_p7, %p6344_p10  ;;  %s598_s6 = scalar_lea.hbm %s7217_s1, %s5315_s3 }
  0x49   : > { %s593_s9 = scalar_lea.vmem [#allocation9], %s4524_s4  ;;  %s599_s11 = sshll.u32 %s598_s6, 4  ;;  %s600_s11 = int_to_ptr.hbm [resolvable:$true] %s599_s11 }
  0x4a   : > { %s601_s10 = sshll.u32 %s593_s9, 4  ;;  %s568_s23 = scalar_lea.sflag [#allocation7], %s567_s25  ;;  %s602_s10 = int_to_ptr.vmem [resolvable:$true] %s601_s10 }
  0x4b   : > { %s7268_s19 = smov 8   ;;  %s589_s2 = sand.u32 1, %s6143_s13  }
  0x4c   : > { %5576 = dma.hbm_to_vmem [thread:$0]  (!%p5574_p8), %s578_s27, 2048, %s580_s5, %s568_s23, %s7260_s29, %s7260_s29, %s7268_s19  }
  0x4d   : > { %s590_s22 = scalar_lea.sflag [#allocation10], %s589_s2  ;;  %613 = sbr.rel (%p6280_p3) target bundleno = 1076 (0x434), region = 76 }
  0x4e   : > { %5579 = dma.hbm_to_vmem [thread:$0]  (!%p5574_p8), %s600_s11, 2048, %s602_s10, %s590_s22, %s7260_s29, %s7260_s29, %s7268_s19  }
  0x4f   : > { %s6391_s9 = sand.u32 (!%p6280_p3), 1, %s6127_s16  }
  0x50   : > { %s6394_s6 = sshll.u32 (!%p6280_p3), %s6391_s9, 7  ;;  %s616_s5 = scalar_lea.sflag (!%p6280_p3), [#allocation7], %s6391_s9 }
  0x51   : > { %s6398_s23 = scalar_lea.vmem (!%p6280_p3), [#allocation6], %s6394_s6 }
  0x52   : > { %6090 = dma.done.wait (%p6355_p0), %s616_s5, 2048  }
  0x53   : > { %6092 = vsyncadd (%p6355_p0), %s616_s5, 4294965248  ;;  %s625_s10 = sand.u32 1, %s6272_s20   ;;  %s6406_s19 = scalar_lea.vmem [#allocation9], %s6394_s6 }
  0x54   : > { %s626_s11 = scalar_lea.sflag [#allocation10], %s625_s10 }
  0x55   : > { %6094 = dma.done.wait (%p6355_p0), %s626_s11, 2048  }
  0x56   : > { %6096 = vsyncadd (%p6355_p0), %s626_s11, 4294965248 }
  0x57   : > { %6098 = dma.done.wait (%p71_p1), [#allocation10], 2048  }
  0x58   : > { %6100 = vsyncadd (%p71_p1), [#allocation10], 4294965248 }
  0x59   : > { %6102 = dma.done.wait (%p71_p1), [#allocation13], 2080  }
  0x5a   : > { %6104 = vsyncadd (%p71_p1), [#allocation13], 4294965216 }
  0x5b   : > { %6106 = dma.done.wait (%p71_p1), [#allocation16], 8224  }
  0x5c   : > { %6108 = vsyncadd (%p71_p1), [#allocation16], 4294959072 }
  0x5d   : > { %6110 = dma.done.wait (%p71_p1), [#allocation19], 8256  }
  0x5e   : > { %6112 = vsyncadd (%p71_p1), [#allocation19], 4294959040 }
  0x5f   : > { %6114 = dma.done.wait (%p71_p1), [#allocation22], 4096  }
  0x60   : > { %6116 = vsyncadd (%p71_p1), [#allocation22], 4294963200  ;;  %v4600_v0 = vld [vmem:[#allocation11 + $0x70] sm:$0xf]  ;;  %v5332_v1 = vld [vmem:[#allocation11 + $0x74] sm:$0xf0] }
  0x61   : > { %v5331_v2 = vld [vmem:[#allocation11 + $0x74] sm:$0xf]  ;;  %v4601_v3 = vor.u32 %v5332_v1, %v4600_v0  ;;  %v4602_v4 = vld [vmem:[#allocation11 + $0x78] sm:$0xf0]  ;;  %v4592_v11 = vld [vmem:[#allocation11 + $0x60] sm:$0xf] }
  0x62   : > { %v4664_v5 = vld [vmem:[#allocation14 + $0x70] sm:$0xf]  ;;  %v5348_v6 = vld [vmem:[#allocation14 + $0x74] sm:$0xf0]  ;;  %v4605_v7 = vor.u32 %v5331_v2, %v4602_v4  ;;  %v5347_v9 = vld [vmem:[#allocation14 + $0x74] sm:$0xf] }
  0x63   : > { %v4665_v8 = vor.u32 %v5348_v6, %v4664_v5  ;;  %v4666_v10 = vld [vmem:[#allocation14 + $0x78] sm:$0xf0]  ;;  %891 = vmatpush.bf16.msra.mxu0 %v4601_v3  ;;  %v5330_v13 = vld [vmem:[#allocation11 + $0x64] sm:$0xf0]  ;;  %v5329_v14 = vld [vmem:[#allocation11 + $0x64] sm:$0xf] }
  0x64   : > { %v4669_v12 = vor.u32 %v5347_v9, %v4666_v10  ;;  %v4594_v15 = vld [vmem:[#allocation11 + $0x68] sm:$0xf0]  ;;  %940 = vmatpush.bf16.msra.mxu1 %v4605_v7  ;;  %v4593_v16 = vor.u32 %v5330_v13, %v4592_v11  ;;  %v4656_v18 = vld [vmem:[#allocation14 + $0x60] sm:$0xf]  ;;  %v5345_v20 = vld [vmem:[#allocation14 + $0x64] sm:$0xf] }
  0x65   : > { %1131 = vmatpush.bf16.msra.mxu2 %v4665_v8  ;;  %v4597_v17 = vor.u32 %v5329_v14, %v4594_v15  ;;  %v5346_v19 = vld [vmem:[#allocation14 + $0x64] sm:$0xf0]  ;;  %v4658_v22 = vld [vmem:[#allocation14 + $0x68] sm:$0xf0]  ;;  %v5328_v24 = vld [vmem:[#allocation11 + $0x54] sm:$0xf0] }
  0x66   : > { %1180 = vmatpush.bf16.msra.mxu3 %v4669_v12  ;;  %v4657_v21 = vor.u32 %v5346_v19, %v4656_v18  ;;  %v4584_v23 = vld [vmem:[#allocation11 + $0x50] sm:$0xf]  ;;  %v4661_v25 = vor.u32 %v5345_v20, %v4658_v22  ;;  %v5327_v26 = vld [vmem:[#allocation11 + $0x54] sm:$0xf]  ;;  %v4586_v27 = vld [vmem:[#allocation11 + $0x58] sm:$0xf0] }
  0x67   : > { %v4648_v28 = vld [vmem:[#allocation14 + $0x50] sm:$0xf]  ;;  %892 = vmatpush.bf16.msra.mxu0 %v4593_v16  ;;  %v4585_v29 = vor.u32 %v5328_v24, %v4584_v23  ;;  %v5344_v30 = vld [vmem:[#allocation14 + $0x54] sm:$0xf0]  ;;  %v5343_v31 = vld [vmem:[#allocation14 + $0x54] sm:$0xf]  ;;  %v4589_v33 = vor.u32 %v5327_v26, %v4586_v27 }
  0x68   : > { %v4650_v32 = vld [vmem:[#allocation14 + $0x58] sm:$0xf0]  ;;  %941 = vmatpush.bf16.msra.mxu1 %v4597_v17  ;;  %v4649_v34 = vor.u32 %v5344_v30, %v4648_v28  ;;  %v5326_v36 = vld [vmem:[#allocation11 + $0x44] sm:$0xf0]  ;;  %v5325_v37 = vld [vmem:[#allocation11 + $0x44] sm:$0xf] }
  0x69   : > { %1132 = vmatpush.bf16.msra.mxu2 %v4657_v21  ;;  %v4576_v35 = vld [vmem:[#allocation11 + $0x40] sm:$0xf]  ;;  %v4653_v38 = vor.u32 %v5343_v31, %v4650_v32  ;;  %v4578_v39 = vld [vmem:[#allocation11 + $0x48] sm:$0xf0]  ;;  %v5341_v42 = vld [vmem:[#allocation14 + $0x44] sm:$0xf] }
  0x6a   : > { %1181 = vmatpush.bf16.msra.mxu3 %v4661_v25  ;;  %v4640_v40 = vld [vmem:[#allocation14 + $0x40] sm:$0xf]  ;;  %v5342_v41 = vld [vmem:[#allocation14 + $0x44] sm:$0xf0]  ;;  %v4642_v43 = vld [vmem:[#allocation14 + $0x48] sm:$0xf0]  ;;  %v4577_v44 = vor.u32 %v5326_v36, %v4576_v35  ;;  %v4581_v45 = vor.u32 %v5325_v37, %v4578_v39 }
  0x6b   : > { %893 = vmatpush.bf16.msra.mxu0 %v4585_v29  ;;  %v4641_v46 = vor.u32 %v5342_v41, %v4640_v40  ;;  %v4568_v47 = vld [vmem:[#allocation11 + $0x30] sm:$0xf]  ;;  %v5324_v48 = vld [vmem:[#allocation11 + $0x34] sm:$0xf0]  ;;  %v5323_v49 = vld [vmem:[#allocation11 + $0x34] sm:$0xf]  ;;  %v4645_v50 = vor.u32 %v5341_v42, %v4642_v43 }
  0x6c   : > { %942 = vmatpush.bf16.msra.mxu1 %v4589_v33  ;;  %v4570_v51 = vld [vmem:[#allocation11 + $0x38] sm:$0xf0]  ;;  %v4632_v52 = vld [vmem:[#allocation14 + $0x30] sm:$0xf]  ;;  %v5339_v54 = vld [vmem:[#allocation14 + $0x34] sm:$0xf]  ;;  %v4569_v56 = vor.u32 %v5324_v48, %v4568_v47 }
  0x6d   : > { %1133 = vmatpush.bf16.msra.mxu2 %v4649_v34  ;;  %v5340_v53 = vld [vmem:[#allocation14 + $0x34] sm:$0xf0]  ;;  %v4634_v55 = vld [vmem:[#allocation14 + $0x38] sm:$0xf0]  ;;  %v4573_v57 = vor.u32 %v5323_v49, %v4570_v51  ;;  %v5322_v60 = vld [vmem:[#allocation11 + $0x24] sm:$0xf0] }
  0x6e   : > { %1182 = vmatpush.bf16.msra.mxu3 %v4653_v38  ;;  %v4633_v58 = vor.u32 %v5340_v53, %v4632_v52  ;;  %v4560_v59 = vld [vmem:[#allocation11 + $0x20] sm:$0xf]  ;;  %v5321_v61 = vld [vmem:[#allocation11 + $0x24] sm:$0xf]  ;;  %v4637_v62 = vor.u32 %v5339_v54, %v4634_v55  ;;  %v4562_v63 = vld [vmem:[#allocation11 + $0x28] sm:$0xf0] }
  0x6f   : > { %894 = vmatpush.bf16.msra.mxu0 %v4577_v44  ;;  %v4624_v0 = vld [vmem:[#allocation14 + $0x20] sm:$0xf]  ;;  %v5338_v1 = vld [vmem:[#allocation14 + $0x24] sm:$0xf0]  ;;  %v5337_v2 = vld [vmem:[#allocation14 + $0x24] sm:$0xf]  ;;  %v4561_v4 = vor.u32 %v5322_v60, %v4560_v59  ;;  %v4565_v5 = vor.u32 %v5321_v61, %v4562_v63 }
  0x70   : > { %943 = vmatpush.bf16.msra.mxu1 %v4581_v45  ;;  %v4626_v3 = vld [vmem:[#allocation14 + $0x28] sm:$0xf0]  ;;  %v4625_v6 = vor.u32 %v5338_v1, %v4624_v0  ;;  %v5320_v8 = vld [vmem:[#allocation11 + $0x14] sm:$0xf0]  ;;  %v5319_v9 = vld [vmem:[#allocation11 + $0x14] sm:$0xf] }
  0x71   : > { %1134 = vmatpush.bf16.msra.mxu2 %v4641_v46  ;;  %v4552_v7 = vld [vmem:[#allocation11 + $0x10] sm:$0xf]  ;;  %v4629_v10 = vor.u32 %v5337_v2, %v4626_v3  ;;  %v4554_v11 = vld [vmem:[#allocation11 + $0x18] sm:$0xf0]  ;;  %v5335_v14 = vld [vmem:[#allocation14 + $0x14] sm:$0xf] }
  0x72   : > { %1183 = vmatpush.bf16.msra.mxu3 %v4645_v50  ;;  %v4616_v12 = vld [vmem:[#allocation14 + $0x10] sm:$0xf]  ;;  %v5336_v13 = vld [vmem:[#allocation14 + $0x14] sm:$0xf0]  ;;  %v4618_v15 = vld [vmem:[#allocation14 + $0x18] sm:$0xf0]  ;;  %v4553_v16 = vor.u32 %v5320_v8, %v4552_v7  ;;  %v4557_v20 = vor.u32 %v5319_v9, %v4554_v11 }
  0x73   : > { %895 = vmatpush.bf16.msra.mxu0 %v4569_v56  ;;  %v4544_v17 = vld [vmem:[#allocation11] sm:$0xf]  ;;  %v5318_v18 = vld [vmem:[#allocation11 + $0x4] sm:$0xf0]  ;;  %v5317_v19 = vld [vmem:[#allocation11 + $0x4] sm:$0xf]  ;;  %v4617_v21 = vor.u32 %v5336_v13, %v4616_v12  ;;  %v4621_v25 = vor.u32 %v5335_v14, %v4618_v15 }
  0x74   : > { %944 = vmatpush.bf16.msra.mxu1 %v4573_v57  ;;  %v4546_v22 = vld [vmem:[#allocation11 + $0x8] sm:$0xf0]  ;;  %v4608_v23 = vld [vmem:[#allocation14] sm:$0xf]  ;;  %v5333_v26 = vld [vmem:[#allocation14 + $0x4] sm:$0xf]  ;;  %v4545_v32 = vor.u32 %v5318_v18, %v4544_v17 }
  0x75   : > { %1135 = vmatpush.bf16.msra.mxu2 %v4633_v58  ;;  %v5334_v24 = vld [vmem:[#allocation14 + $0x4] sm:$0xf0]  ;;  %v4610_v27 = vld [vmem:[#allocation14 + $0x8] sm:$0xf0]  ;;  %v749_v28 = vld [vmem:[%s6398_s23] sm:$0xff]  ;;  %v4549_v35 = vor.u32 %v5317_v19, %v4546_v22  ;;  %s7269_s29 = sld [smem:[#allocation40_spill]] }
  0x76   : > { %1184 = vmatpush.bf16.msra.mxu3 %v4637_v62  ;;  %v750_v29 = vld [vmem:[%s6398_s23 + $0x8] sm:$0xff]  ;;  %v4786_v31 = vld [vmem:[#allocation17 + $0xf0] sm:$0xf0]  ;;  %v4609_v36 = vor.u32 %v5334_v24, %v4608_v23  ;;  %v765_v37 = vld [vmem:[%s6406_s19] sm:$0xff]  ;;  %v4613_v39 = vor.u32 %v5333_v26, %v4610_v27  ;;  %s7270_s25 = sld [smem:[#allocation41_spill]]  ;;  %vm1325_vm0 = vcmask 7168  }
  0x77   : > { %896 = vmatpush.bf16.msra.mxu0 %v4561_v4  ;;  %v5377_v30 = vld [vmem:[#allocation17 + $0xe4] sm:$0xf]  ;;  %v4914_v34 = vld [vmem:[#allocation17 + $0x1f0] sm:$0xf0]  ;;  %v4784_v41 = vld [vmem:[#allocation17 + $0xe0] sm:$0xf]  ;;  %v781_v43 = vpack.c.bf16 %v750_v29, %v749_v28 }
  0x78   : > { %945 = vmatpush.bf16.msra.mxu1 %v4565_v5  ;;  %v5409_v33 = vld [vmem:[#allocation17 + $0x1e4] sm:$0xf]  ;;  %v4789_v40 = vor.u32 %v5377_v30, %v4786_v31  ;;  %v5379_v42 = vld [vmem:[#allocation17 + $0xec] sm:$0xf0]  ;;  %v4912_v45 = vld [vmem:[#allocation17 + $0x1e0] sm:$0xf] }
  0x79   : > { %1136 = vmatpush.bf16.msra.mxu2 %v4625_v6  ;;  %v766_v38 = vld [vmem:[%s6406_s19 + $0x8] sm:$0xff]  ;;  %v4917_v44 = vor.u32 %v5409_v33, %v4914_v34  ;;  %v5411_v46 = vld [vmem:[#allocation17 + $0x1ec] sm:$0xf0]  ;;  %v4785_v48 = vor.u32 %v5379_v42, %v4784_v41  ;;  %v4770_v51 = vld [vmem:[#allocation17 + $0xd0] sm:$0xf0]  ;;  %s3860_s3 = sld [smem:[#allocation5]] }
  0x7a   : > { %1185 = vmatpush.bf16.msra.mxu3 %v4629_v10  ;;  %v1021_v47 = vpack.c.bf16 %v766_v38, %v765_v37  ;;  %v4913_v49 = vor.u32 %v5411_v46, %v4912_v45  ;;  %v5373_v50 = vld [vmem:[#allocation17 + $0xc4] sm:$0xf]  ;;  %v4898_v54 = vld [vmem:[#allocation17 + $0x1d0] sm:$0xf0]  ;;  %v4768_v55 = vld [vmem:[#allocation17 + $0xc0] sm:$0xf] }
  0x7b   : > { %897 = vmatpush.bf16.msra.mxu0 %v4553_v16  ;;  %v5405_v52 = vld [vmem:[#allocation17 + $0x1c4] sm:$0xf]  ;;  %v4773_v53 = vor.u32 %v5373_v50, %v4770_v51  ;;  %v5375_v56 = vld [vmem:[#allocation17 + $0xcc] sm:$0xf0]  ;;  %v4896_v59 = vld [vmem:[#allocation17 + $0x1c0] sm:$0xf] }
  0x7c   : > { %946 = vmatpush.bf16.msra.mxu1 %v4557_v20  ;;  %v4901_v57 = vor.u32 %v5405_v52, %v4898_v54  ;;  %v4769_v58 = vor.u32 %v5375_v56, %v4768_v55  ;;  %v5407_v60 = vld [vmem:[#allocation17 + $0x1cc] sm:$0xf0]  ;;  %v752_v63 = vld [vmem:[%s6398_s23 + $0x18] sm:$0xff]  ;;  %v5369_v4 = vld [vmem:[#allocation17 + $0xa4] sm:$0xf]  ;;  %s7271_s8 = sld [smem:[#allocation45_spill]] }
  0x7d   : > { %1137 = vmatpush.bf16.msra.mxu2 %v4617_v21  ;;  %v4897_v61 = vor.u32 %v5407_v60, %v4896_v59  ;;  %v751_v62 = vld [vmem:[%s6398_s23 + $0x10] sm:$0xff]  ;;  %v768_v1 = vld [vmem:[%s6406_s19 + $0x18] sm:$0xff]  ;;  %v5401_v6 = vld [vmem:[#allocation17 + $0x1a4] sm:$0xf]  ;;  %s7115_s27 = scalar_lea.vmem [#allocation23], %s6394_s6  ;;  %s7272_s12 = sld [smem:[#allocation32_spill]] }
  0x7e   : > { %1186 = vmatpush.bf16.msra.mxu3 %v4621_v25  ;;  %v767_v0 = vld [vmem:[%s6406_s19 + $0x10] sm:$0xff]  ;;  %v782_v2 = vpack.c.bf16 %v752_v63, %v751_v62  ;;  %v4754_v5 = vld [vmem:[#allocation17 + $0xb0] sm:$0xf0]  ;;  %v4752_v9 = vld [vmem:[#allocation17 + $0xa0] sm:$0xf]  ;;  %s7273_s6 = sld [smem:[#allocation46_spill]] }
  0x7f   : > { %898 = vmatpush.bf16.msra.mxu0 %v4545_v32  ;;  %v1022_v3 = vpack.c.bf16 %v768_v1, %v767_v0  ;;  %v4757_v7 = vor.u32 %v5369_v4, %v4754_v5  ;;  %v4882_v8 = vld [vmem:[#allocation17 + $0x1b0] sm:$0xf0]  ;;  %v5371_v10 = vld [vmem:[#allocation17 + $0xac] sm:$0xf0]  ;;  %v4880_v13 = vld [vmem:[#allocation17 + $0x1a0] sm:$0xf] }
  0x80   : > { %947 = vmatpush.bf16.msra.mxu1 %v4549_v35  ;;  %v4885_v11 = vor.u32 %v5401_v6, %v4882_v8  ;;  %v4753_v12 = vor.u32 %v5371_v10, %v4752_v9  ;;  %v5403_v14 = vld [vmem:[#allocation17 + $0x1ac] sm:$0xf0]  ;;  %v753_v16 = vld [vmem:[%s6398_s23 + $0x20] sm:$0xff]  ;;  %v754_v17 = vld [vmem:[%s6398_s23 + $0x28] sm:$0xff]  ;;  %s4295_s10 = sshll.u32 %s7115_s27, 4  ;;  %s4296_s10 = int_to_ptr.vmem [resolvable:$true] %s4295_s10 }
  0x81   : > { %1138 = vmatpush.bf16.msra.mxu2 %v4609_v36  ;;  %v4881_v15 = vor.u32 %v5403_v14, %v4880_v13  ;;  %v769_v18 = vld [vmem:[%s6406_s19 + $0x20] sm:$0xff]  ;;  %v770_v19 = vld [vmem:[%s6406_s19 + $0x28] sm:$0xff]  ;;  %v783_v20 = vpack.c.bf16 %v754_v17, %v753_v16  ;;  %v4738_v23 = vld [vmem:[#allocation17 + $0x90] sm:$0xf0] }
  0x82   : > { %1187 = vmatpush.bf16.msra.mxu3 %v4613_v39  ;;  %899 = vmatmul.bf16.vlgmr.msra.gmra.mxu0 %v781_v43  ;;  %v1023_v21 = vpack.c.bf16 %v770_v19, %v769_v18  ;;  %v5365_v22 = vld [vmem:[#allocation17 + $0x84] sm:$0xf]  ;;  %v4866_v26 = vld [vmem:[#allocation17 + $0x190] sm:$0xf0]  ;;  %v4736_v27 = vld [vmem:[#allocation17 + $0x80] sm:$0xf] }
  0x83   : > { %948 = vmatmul.bf16.vlgmr.msra.gmra.mxu1 %v781_v43  ;;  %1800 = vmatpush.bf16.msrb.mxu0 %v4785_v48  ;;  %v5397_v24 = vld [vmem:[#allocation17 + $0x184] sm:$0xf]  ;;  %v4741_v25 = vor.u32 %v5365_v22, %v4738_v23  ;;  %v5367_v28 = vld [vmem:[#allocation17 + $0x8c] sm:$0xf0]  ;;  %v4864_v31 = vld [vmem:[#allocation17 + $0x180] sm:$0xf] }
  0x84   : > { %1139 = vmatmul.bf16.vlgmr.msra.gmra.mxu2 %v1021_v47  ;;  %1849 = vmatpush.bf16.msrb.mxu1 %v4913_v49  ;;  %v4869_v29 = vor.u32 %v5397_v24, %v4866_v26  ;;  %v4737_v30 = vor.u32 %v5367_v28, %v4736_v27  ;;  %v5399_v32 = vld [vmem:[#allocation17 + $0x18c] sm:$0xf0]  ;;  %v756_v35 = vld [vmem:[%s6398_s23 + $0x38] sm:$0xff]  ;;  %v5393_v42 = vld [vmem:[#allocation17 + $0x164] sm:$0xf]  ;;  %s5509_s14 = sshll.u32 %s7272_s12, 7 }
  0x85   : > { %1898 = vmatpush.bf16.msrb.mxu2 %v4789_v40  ;;  %1188 = vmatmul.bf16.vlgmr.msra.gmra.mxu3 %v1021_v47  ;;  %v4865_v33 = vor.u32 %v5399_v32, %v4864_v31  ;;  %v755_v34 = vld [vmem:[%s6398_s23 + $0x30] sm:$0xff]  ;;  %v772_v37 = vld [vmem:[%s6406_s19 + $0x38] sm:$0xff]  ;;  %v5361_v40 = vld [vmem:[#allocation17 + $0x64] sm:$0xf]  ;;  %s4294_s5 = scalar_lea.hbm %s7273_s6, %s5509_s14  ;;  %s6057_s18 = scalar_lea.hbm %s7273_s6, 256 }
  0x86   : > { %1947 = vmatpush.bf16.msrb.mxu3 %v4917_v44  ;;  %v771_v36 = vld [vmem:[%s6406_s19 + $0x30] sm:$0xff]  ;;  %v784_v38 = vpack.c.bf16 %v756_v35, %v755_v34  ;;  %v4722_v41 = vld [vmem:[#allocation17 + $0x70] sm:$0xf0]  ;;  %v4720_v45 = vld [vmem:[#allocation17 + $0x60] sm:$0xf]  ;;  %s4297_s11 = sshll.u32 %s4294_s5, 4  ;;  %s4298_s11 = int_to_ptr.hbm [resolvable:$true] %s4297_s11 }
  0x87   : > { %1801 = vmatpush.bf16.msrb.mxu0 %v4769_v58  ;;  %v1024_v39 = vpack.c.bf16 %v772_v37, %v771_v36  ;;  %v4725_v43 = vor.u32 %v5361_v40, %v4722_v41  ;;  %v4850_v44 = vld [vmem:[#allocation17 + $0x170] sm:$0xf0]  ;;  %v5363_v46 = vld [vmem:[#allocation17 + $0x6c] sm:$0xf0]  ;;  %v4848_v49 = vld [vmem:[#allocation17 + $0x160] sm:$0xf] }
  0x88   : > { %1850 = vmatpush.bf16.msrb.mxu1 %v4897_v61  ;;  %v4853_v47 = vor.u32 %v5393_v42, %v4850_v44  ;;  %v4721_v48 = vor.u32 %v5363_v46, %v4720_v45  ;;  %v5395_v50 = vld [vmem:[#allocation17 + $0x16c] sm:$0xf0]  ;;  %v757_v52 = vld [vmem:[%s6398_s23 + $0x40] sm:$0xff]  ;;  %v774_v55 = vld [vmem:[%s6406_s19 + $0x48] sm:$0xff]  ;;  %s6051_s20 = sshra.s32 %s4298_s11, 4  ;;  %s6052_s20 = int_to_ptr.hbm [resolvable:$true] %s6051_s20 }
  0x89   : > { %1899 = vmatpush.bf16.msrb.mxu2 %v4773_v53  ;;  %v4849_v51 = vor.u32 %v5395_v50, %v4848_v49  ;;  %v758_v53 = vld [vmem:[%s6398_s23 + $0x48] sm:$0xff]  ;;  %v773_v54 = vld [vmem:[%s6406_s19 + $0x40] sm:$0xff]  ;;  %v4706_v59 = vld [vmem:[#allocation17 + $0x50] sm:$0xf0]  ;;  %s6053_s24 = scalar_lea.hbm %s6052_s20, 128  ;;  %p6058_p10 = scmp.lt.s32.totalorder %s6052_s20, %s7273_s6 }
  0x8a   : > { %1948 = vmatpush.bf16.msrb.mxu3 %v4901_v57  ;;  %v785_v56 = vpack.c.bf16 %v758_v53, %v757_v52  ;;  %v1025_v57 = vpack.c.bf16 %v774_v55, %v773_v54  ;;  %v5357_v58 = vld [vmem:[#allocation17 + $0x44] sm:$0xf]  ;;  %v4834_v62 = vld [vmem:[#allocation17 + $0x150] sm:$0xf0]  ;;  %v4704_v63 = vld [vmem:[#allocation17 + $0x40] sm:$0xf]  ;;  %p6054_p1 = scmp.ne.s32.totalorder %s6052_s20, %s6053_s24  ;;  %p6059_p11 = scmp.lt.s32.totalorder %s6057_s18, %s6053_s24 }
  0x8b   : > { %1802 = vmatpush.bf16.msrb.mxu0 %v4753_v12  ;;  %v5389_v60 = vld [vmem:[#allocation17 + $0x144] sm:$0xf]  ;;  %v4709_v61 = vor.u32 %v5357_v58, %v4706_v59  ;;  %v5359_v0 = vld [vmem:[#allocation17 + $0x4c] sm:$0xf0]  ;;  %v776_v9 = vld [vmem:[%s6406_s19 + $0x58] sm:$0xff] }
  0x8c   : > { %1851 = vmatpush.bf16.msrb.mxu1 %v4881_v15  ;;  %v4837_v1 = vor.u32 %v5389_v60, %v4834_v62  ;;  %v5391_v4 = vld [vmem:[#allocation17 + $0x14c] sm:$0xf0]  ;;  %v5353_v12 = vld [vmem:[#allocation17 + $0x24] sm:$0xf]  ;;  %v4690_v13 = vld [vmem:[#allocation17 + $0x30] sm:$0xf0]  ;;  %p6055_p3 = pnand %p6054_p1, %p6359_p2  ;;  %p6060_p12 = por %p6059_p11, %p6058_p10 }
  0x8d   : > { %1900 = vmatpush.bf16.msrb.mxu2 %v4757_v7  ;;  %v759_v6 = vld [vmem:[%s6398_s23 + $0x50] sm:$0xff]  ;;  %v760_v7 = vld [vmem:[%s6398_s23 + $0x58] sm:$0xff]  ;;  %v5385_v14 = vld [vmem:[#allocation17 + $0x124] sm:$0xf]  ;;  %v4693_v15 = vor.u32 %v5353_v12, %v4690_v13 }
  0x8e   : > { %1949 = vmatpush.bf16.msrb.mxu3 %v4885_v11  ;;  %v775_v8 = vld [vmem:[%s6406_s19 + $0x50] sm:$0xff]  ;;  %v786_v10 = vpack.c.bf16 %v760_v7, %v759_v6  ;;  %v4818_v16 = vld [vmem:[#allocation17 + $0x130] sm:$0xf0]  ;;  %v4688_v17 = vld [vmem:[#allocation17 + $0x20] sm:$0xf]  ;;  %p6056_p9 = pneg %p6055_p3 }
  0x8f   : > { %1803 = vmatpush.bf16.msrb.mxu0 %v4737_v30  ;;  %v1026_v11 = vpack.c.bf16 %v776_v9, %v775_v8  ;;  %v5355_v18 = vld [vmem:[#allocation17 + $0x2c] sm:$0xf0]  ;;  %v4821_v19 = vor.u32 %v5385_v14, %v4818_v16  ;;  %v761_v24 = vld [vmem:[%s6398_s23 + $0x60] sm:$0xff]  ;;  %v778_v27 = vld [vmem:[%s6406_s19 + $0x68] sm:$0xff] }
  0x90   : > { %1852 = vmatpush.bf16.msrb.mxu1 %v4865_v33  ;;  %v5387_v22 = vld [vmem:[#allocation17 + $0x12c] sm:$0xf0]  ;;  %v777_v26 = vld [vmem:[%s6406_s19 + $0x60] sm:$0xff]  ;;  %v764_v31 = vld [vmem:[%s6398_s23 + $0x78] sm:$0xff]  ;;  %p6061_p13 = pnand %p6060_p12, %p6056_p9 }
  0x91   : > { %1901 = vmatpush.bf16.msrb.mxu2 %v4741_v25  ;;  %v762_v25 = vld [vmem:[%s6398_s23 + $0x68] sm:$0xff]  ;;  %v763_v30 = vld [vmem:[%s6398_s23 + $0x70] sm:$0xff]  ;;  %v780_v33 = vld [vmem:[%s6406_s19 + $0x78] sm:$0xff] }
  0x92   : > { %904 = vmatmul.bf16.gmra.mxu0 %v782_v2  ;;  %1950 = vmatpush.bf16.msrb.mxu3 %v4869_v29  ;;  %v787_v28 = vpack.c.bf16 %v762_v25, %v761_v24  ;;  %v1027_v29 = vpack.c.bf16 %v778_v27, %v777_v26  ;;  %v779_v32 = vld [vmem:[%s6406_s19 + $0x70] sm:$0xff]  ;;  %v5349_v34 = vld [vmem:[#allocation17 + $0x4] sm:$0xf]  ;;  %v4674_v35 = vld [vmem:[#allocation17 + $0x10] sm:$0xf0]  ;;  %v788_v41 = vpack.c.bf16 %v764_v31, %v763_v30 }
  0x93   : > { %953 = vmatmul.bf16.gmra.mxu1 %v782_v2  ;;  %1804 = vmatpush.bf16.msrb.mxu0 %v4721_v48  ;;  %v4705_v2 = vor.u32 %v5359_v0, %v4704_v63  ;;  %v5381_v36 = vld [vmem:[#allocation17 + $0x104] sm:$0xf]  ;;  %v4677_v37 = vor.u32 %v5349_v34, %v4674_v35  ;;  %v5351_v40 = vld [vmem:[#allocation17 + $0xc] sm:$0xf0]  ;;  %v4800_v44 = vld [vmem:[#allocation17 + $0x100] sm:$0xf]  ;;  %v1028_v46 = vpack.c.bf16 %v780_v33, %v779_v32 }
  0x94   : > { %1144 = vmatmul.bf16.gmra.mxu2 %v1022_v3  ;;  %1853 = vmatpush.bf16.msrb.mxu1 %v4849_v51  ;;  %v5383_v45 = vld [vmem:[#allocation17 + $0x10c] sm:$0xf0]  ;;  %v5378_v48 = vld [vmem:[#allocation17 + $0xec] sm:$0xf]  ;;  %v4794_v49 = vld [vmem:[#allocation17 + $0xf8] sm:$0xf0] }
  0x95   : > { %1193 = vmatmul.bf16.gmra.mxu3 %v1022_v3  ;;  %1902 = vmatpush.bf16.msrb.mxu2 %v4725_v43  ;;  %v4832_v3 = vld [vmem:[#allocation17 + $0x140] sm:$0xf]  ;;  %v5410_v50 = vld [vmem:[#allocation17 + $0x1ec] sm:$0xf]  ;;  %v4797_v51 = vor.u32 %v5378_v48, %v4794_v49  ;;  %v4922_v52 = vld [vmem:[#allocation17 + $0x1f8] sm:$0xf0] }
  0x96   : > { %1951 = vmatpush.bf16.msrb.mxu3 %v4853_v47  ;;  %v4833_v5 = vor.u32 %v5391_v4, %v4832_v3  ;;  %v4801_v47 = vor.u32 %v5383_v45, %v4800_v44  ;;  %v4792_v53 = vld [vmem:[#allocation17 + $0xe8] sm:$0xf]  ;;  %v5380_v54 = vld [vmem:[#allocation17 + $0xf4] sm:$0xf0]  ;;  %v4925_v55 = vor.u32 %v5410_v50, %v4922_v52  ;;  %v805_v62 = vld [vmem:[#allocation12] sm:$0x3] }
  0x97   : > { %1805 = vmatpush.bf16.msrb.mxu0 %v4705_v2  ;;  %v5412_v58 = vld [vmem:[#allocation17 + $0x1f4] sm:$0xf0]  ;;  %v1045_v63 = vld [vmem:[#allocation15] sm:$0x3]  ;;  %v5374_v12 = vld [vmem:[#allocation17 + $0xcc] sm:$0xf] }
  0x98   : > { %1854 = vmatpush.bf16.msrb.mxu1 %v4833_v5  ;;  %v6466_v2 = vperm.slane %v1045_v63, 0  ;;  %v6468_v5 = vperm.slane %v805_v62, 1  ;;  %v6470_v6 = vperm.slane %v1045_v63, 1  ;;  %v4778_v13 = vld [vmem:[#allocation17 + $0xd8] sm:$0xf0] }
  0x99   : > { %1903 = vmatpush.bf16.msrb.mxu2 %v4709_v61  ;;  %v5406_v14 = vld [vmem:[#allocation17 + $0x1cc] sm:$0xf]  ;;  %v4781_v16 = vor.u32 %v5374_v12, %v4778_v13  ;;  %v4904_v24 = vld [vmem:[#allocation17 + $0x1c8] sm:$0xf]  ;;  %v5408_v25 = vld [vmem:[#allocation17 + $0x1d4] sm:$0xf0] }
  0x9a   : > { %1952 = vmatpush.bf16.msrb.mxu3 %v4837_v1  ;;  %v6464_v1 = vperm.slane %v805_v62, 0  ;;  %v4905_v31 = vor.u32 %v5408_v25, %v4904_v24 }
  0x9d   : > { %1904 = vmatpush.bf16.msrb.mxu2 %v4693_v15 }
  0x9e   : > { %1953 = vmatpush.bf16.msrb.mxu3 %v4821_v19  ;;  %v5376_v19 = vld [vmem:[#allocation17 + $0xd4] sm:$0xf0] }
  0xa1   : > { %1905 = vmatpush.bf16.msrb.mxu2 %v4677_v37 }
  0xa2   : > { %909 = vmatmul.bf16.gmra.mxu0 %v783_v20 }
  0xa3   : > { %958 = vmatmul.bf16.gmra.mxu1 %v783_v20  ;;  %v4689_v20 = vor.u32 %v5355_v18, %v4688_v17  ;;  %v4906_v17 = vld [vmem:[#allocation17 + $0x1d8] sm:$0xf0]  ;;  %v4776_v18 = vld [vmem:[#allocation17 + $0xc8] sm:$0xf] }
  0xa4   : > { %1149 = vmatmul.bf16.gmra.mxu2 %v1023_v21 }
  0xa5   : > { %1198 = vmatmul.bf16.gmra.mxu3 %v1023_v21  ;;  %v4816_v21 = vld [vmem:[#allocation17 + $0x120] sm:$0xf]  ;;  %1806 = vmatpush.bf16.msrb.mxu0 %v4689_v20 }
  0xa6   : > { %v4817_v23 = vor.u32 %v5387_v22, %v4816_v21  ;;  %2094 = vmatpush.bf16.msra.mxu2 %v4797_v51  ;;  %v4909_v22 = vor.u32 %v5406_v14, %v4906_v17 }
  0xa8   : > { %1855 = vmatpush.bf16.msrb.mxu1 %v4817_v23  ;;  %v4777_v23 = vor.u32 %v5376_v19, %v4776_v18 }
  0xaa   : > { %2095 = vmatpush.bf16.msra.mxu2 %v4781_v16 }
  0xac   : > { %1856 = vmatpush.bf16.msrb.mxu1 %v4801_v47 }
  0xb2   : > { %914 = vmatmul.bf16.gmra.mxu0 %v784_v38 }
  0xb3   : > { %963 = vmatmul.bf16.gmra.mxu1 %v784_v38  ;;  %v4802_v38 = vld [vmem:[#allocation17 + $0x110] sm:$0xf0] }
  0xb4   : > { %1154 = vmatmul.bf16.gmra.mxu2 %v1024_v39  ;;  %v4805_v42 = vor.u32 %v5381_v36, %v4802_v38 }
  0xb5   : > { %1203 = vmatmul.bf16.gmra.mxu3 %v1024_v39  ;;  %v4672_v39 = vld [vmem:[#allocation17] sm:$0xf] }
  0xb6   : > { %v4673_v43 = vor.u32 %v5351_v40, %v4672_v39  ;;  %1954 = vmatpush.bf16.msrb.mxu3 %v4805_v42 }
  0xb8   : > { %1807 = vmatpush.bf16.msrb.mxu0 %v4673_v43 }
  0xba   : > { %2143 = vmatpush.bf16.msra.mxu3 %v4925_v55  ;;  %v4762_v55 = vld [vmem:[#allocation17 + $0xb8] sm:$0xf0] }
  0xbe   : > { %2144 = vmatpush.bf16.msra.mxu3 %v4909_v22 }
  0xc2   : > { %919 = vmatmul.bf16.gmra.mxu0 %v785_v56 }
  0xc3   : > { %968 = vmatmul.bf16.gmra.mxu1 %v785_v56  ;;  %v4793_v56 = vor.u32 %v5380_v54, %v4792_v53  ;;  %v5370_v54 = vld [vmem:[#allocation17 + $0xac] sm:$0xf] }
  0xc4   : > { %1159 = vmatmul.bf16.gmra.mxu2 %v1025_v57 }
  0xc5   : > { %1208 = vmatmul.bf16.gmra.mxu3 %v1025_v57  ;;  %v4920_v57 = vld [vmem:[#allocation17 + $0x1e8] sm:$0xf]  ;;  %1996 = vmatpush.bf16.msra.mxu0 %v4793_v56  ;;  %v5402_v56 = vld [vmem:[#allocation17 + $0x1ac] sm:$0xf] }
  0xc6   : > { %v4921_v60 = vor.u32 %v5412_v58, %v4920_v57  ;;  %v4765_v58 = vor.u32 %v5370_v54, %v4762_v55 }
  0xc8   : > { %2045 = vmatpush.bf16.msra.mxu1 %v4921_v60  ;;  %v4760_v60 = vld [vmem:[#allocation17 + $0xa8] sm:$0xf]  ;;  %2096 = vmatpush.bf16.msra.mxu2 %v4765_v58 }
  0xc9   : > { %1997 = vmatpush.bf16.msra.mxu0 %v4777_v23 }
  0xcc   : > { %2046 = vmatpush.bf16.msra.mxu1 %v4905_v31 }
  0xd2   : > { %924 = vmatmul.bf16.gmra.mxu0 %v786_v10 }
  0xd3   : > { %973 = vmatmul.bf16.gmra.mxu1 %v786_v10 }
  0xd4   : > { %1164 = vmatmul.bf16.gmra.mxu2 %v1026_v11 }
  0xd5   : > { %1213 = vmatmul.bf16.gmra.mxu3 %v1026_v11 }
  0xe2   : > { %929 = vmatmul.bf16.gmra.mxu0 %v787_v28 }
  0xe3   : > { %978 = vmatmul.bf16.gmra.mxu1 %v787_v28 }
  0xe4   : > { %1169 = vmatmul.bf16.gmra.mxu2 %v1027_v29 }
  0xe5   : > { %1218 = vmatmul.bf16.gmra.mxu3 %v1027_v29 }
  0xf2   : > { %934 = vmatmul.bf16.gmra.mxu0 %v788_v41 }
  0xf3   : > { %983 = vmatmul.bf16.gmra.mxu1 %v788_v41 }
  0xf4   : > { %1174 = vmatmul.bf16.gmra.mxu2 %v1028_v46 }
  0xf5   : > { %1223 = vmatmul.bf16.gmra.mxu3 %v1028_v46 }
  0xff   : > { %v900_v59 = vpop.f32.mrf.mxu0 }
 0x100   : > { %v949_v61 = vpop.f32.mrf.mxu1  ;;  %v901_v8 = vadd.f32 %v900_v59, %v6464_v1  ;;  %v4890_v59 = vld [vmem:[#allocation17 + $0x1b8] sm:$0xf0] }
 0x101   : > { %v950_v10 = vadd.f32 %v949_v61, %v6468_v5  ;;  %v5372_v61 = vld [vmem:[#allocation17 + $0xb4] sm:$0xf0] }
 0x102   : > { %v989_v26 = vmax.f32 %v901_v8, 0.0 }
 0x103   : > { %v990_v32 = vmax.f32 %v950_v10, 0.0 }
 0x107   : > { %v1140_v0 = vpop.f32.mrf.mxu2  ;;  %v902_v4 = vpop.f32.mrf.mxu0 }
 0x108   : > { %v1189_v3 = vpop.f32.mrf.mxu3  ;;  %v951_v7 = vpop.f32.mrf.mxu1  ;;  %v1141_v9 = vadd.f32 %v1140_v0, %v6466_v2  ;;  %v903_v15 = vadd.f32 %v902_v4, %v6464_v1  ;;  %v4893_v0 = vor.u32 %v5402_v56, %v4890_v59  ;;  %v4888_v4 = vld [vmem:[#allocation17 + $0x1a8] sm:$0xf] }
 0x109   : > { %v1190_v11 = vadd.f32 %v1189_v3, %v6470_v6  ;;  %v952_v20 = vadd.f32 %v951_v7, %v6468_v5  ;;  %v4761_v3 = vor.u32 %v5372_v61, %v4760_v60  ;;  %v5404_v7 = vld [vmem:[#allocation17 + $0x1b4] sm:$0xf0] }
 0x10a   : > { %v1229_v27 = vmax.f32 %v1141_v9, 0.0  ;;  %v991_v36 = vmax.f32 %v903_v15, 0.0  ;;  %v4889_v13 = vor.u32 %v5404_v7, %v4888_v4  ;;  %2145 = vmatpush.bf16.msra.mxu3 %v4893_v0 }
 0x10b   : > { %v1230_v33 = vmax.f32 %v1190_v11, 0.0  ;;  %v992_v38 = vmax.f32 %v952_v20, 0.0  ;;  %1998 = vmatpush.bf16.msra.mxu0 %v4761_v3 }
 0x10c   : > { %v1261_v40 = vmul.f32 %v1229_v27, %v989_v26  ;;  %2047 = vmatpush.bf16.msra.mxu1 %v4889_v13 }
 0x10d   : > { %v1262_v42 = vmul.f32 %v1230_v33, %v990_v32 }
 0x10f   : > { %v1142_v21 = vpop.f32.mrf.mxu2  ;;  %v905_v30 = vpop.f32.mrf.mxu0 }
 0x110   : > { %v1143_v28 = vadd.f32 %v1142_v21, %v6466_v2  ;;  %v1191_v29 = vpop.f32.mrf.mxu3  ;;  %v954_v35 = vpop.f32.mrf.mxu1  ;;  %v906_v50 = vadd.f32 %v905_v30, %v6464_v1 }
 0x111   : > { %v1192_v34 = vadd.f32 %v1191_v29, %v6470_v6  ;;  %v955_v52 = vadd.f32 %v954_v35, %v6468_v5 }
 0x112   : > { %v1231_v37 = vmax.f32 %v1143_v28, 0.0  ;;  %v993_v8 = vmax.f32 %v906_v50, 0.0  ;;  %v4872_v50 = vld [vmem:[#allocation17 + $0x188] sm:$0xf] }
 0x113   : > { %v1232_v39 = vmax.f32 %v1192_v34, 0.0  ;;  %v994_v14 = vmax.f32 %v955_v52, 0.0 }
 0x114   : > { %v1263_v41 = vmul.f32 %v1231_v37, %v991_v36  ;;  %v5366_v36 = vld [vmem:[#allocation17 + $0x8c] sm:$0xf]  ;;  %v4746_v37 = vld [vmem:[#allocation17 + $0x98] sm:$0xf0] }
 0x115   : > { %v1264_v43 = vmul.f32 %v1232_v39, %v992_v38  ;;  %v5398_v38 = vld [vmem:[#allocation17 + $0x18c] sm:$0xf] }
 0x116   : > { %v6480_v44 = vpack.c.bf16 %v1263_v41, %v1261_v40  ;;  %v4749_v40 = vor.u32 %v5366_v36, %v4746_v37  ;;  %v4874_v41 = vld [vmem:[#allocation17 + $0x198] sm:$0xf0] }
 0x117   : > { %v6482_v45 = vpack.c.bf16 %v1264_v43, %v1262_v42  ;;  %v1145_v46 = vpop.f32.mrf.mxu2  ;;  %v907_v48 = vpop.f32.mrf.mxu0  ;;  %v4744_v42 = vld [vmem:[#allocation17 + $0x88] sm:$0xf]  ;;  %v5368_v43 = vld [vmem:[#allocation17 + $0x94] sm:$0xf0] }
 0x118   : > { %v1194_v47 = vpop.f32.mrf.mxu3  ;;  %1808 = vmatmul.bf16.vlgmr.msrb.gmra.mxu0 %v6480_v44  ;;  %1906 = vmatmul.bf16.vlgmr.msrb.gmra.mxu2 %v6480_v44  ;;  %v956_v49 = vpop.f32.mrf.mxu1  ;;  %v1146_v51 = vadd.f32 %v1145_v46, %v6466_v2  ;;  %v908_v57 = vadd.f32 %v907_v48, %v6464_v1  ;;  %v4877_v48 = vor.u32 %v5398_v38, %v4874_v41 }
 0x119   : > { %1857 = vmatmul.bf16.vlgmr.msrb.gmra.mxu1 %v6482_v45  ;;  %1955 = vmatmul.bf16.vlgmr.msrb.gmra.mxu3 %v6482_v45  ;;  %v1195_v53 = vadd.f32 %v1194_v47, %v6470_v6  ;;  %v957_v62 = vadd.f32 %v956_v49, %v6468_v5  ;;  %v4745_v49 = vor.u32 %v5368_v43, %v4744_v42 }
 0x11a   : > { %v1233_v9 = vmax.f32 %v1146_v51, 0.0  ;;  %v995_v18 = vmax.f32 %v908_v57, 0.0  ;;  %v5400_v51 = vld [vmem:[#allocation17 + $0x194] sm:$0xf0]  ;;  %2097 = vmatpush.bf16.msra.mxu2 %v4749_v40  ;;  %2146 = vmatpush.bf16.msra.mxu3 %v4877_v48 }
 0x11b   : > { %v1234_v15 = vmax.f32 %v1195_v53, 0.0  ;;  %v996_v20 = vmax.f32 %v957_v62, 0.0  ;;  %v4873_v57 = vor.u32 %v5400_v51, %v4872_v50  ;;  %1999 = vmatpush.bf16.msra.mxu0 %v4745_v49 }
 0x11c   : > { %v1265_v22 = vmul.f32 %v1233_v9, %v993_v8 }
 0x11d   : > { %v1266_v24 = vmul.f32 %v1234_v15, %v994_v14  ;;  %2048 = vmatpush.bf16.msra.mxu1 %v4873_v57 }
 0x11f   : > { %v1147_v63 = vpop.f32.mrf.mxu2  ;;  %v910_v12 = vpop.f32.mrf.mxu0 }
 0x120   : > { %v1148_v10 = vadd.f32 %v1147_v63, %v6466_v2  ;;  %v1196_v11 = vpop.f32.mrf.mxu3  ;;  %v959_v17 = vpop.f32.mrf.mxu1  ;;  %v911_v32 = vadd.f32 %v910_v12, %v6464_v1 }
 0x121   : > { %v1197_v16 = vadd.f32 %v1196_v11, %v6470_v6  ;;  %v960_v34 = vadd.f32 %v959_v17, %v6468_v5 }
 0x122   : > { %v1235_v19 = vmax.f32 %v1148_v10, 0.0  ;;  %v997_v52 = vmax.f32 %v911_v32, 0.0 }
 0x123   : > { %v1236_v21 = vmax.f32 %v1197_v16, 0.0  ;;  %v998_v58 = vmax.f32 %v960_v34, 0.0  ;;  %v4856_v34 = vld [vmem:[#allocation17 + $0x168] sm:$0xf] }
 0x124   : > { %v1267_v23 = vmul.f32 %v1235_v19, %v995_v18 }
 0x125   : > { %v1268_v25 = vmul.f32 %v1236_v21, %v996_v20  ;;  %v5362_v20 = vld [vmem:[#allocation17 + $0x6c] sm:$0xf]  ;;  %v4730_v21 = vld [vmem:[#allocation17 + $0x78] sm:$0xf0] }
 0x126   : > { %v6496_v26 = vpack.c.bf16 %v1267_v23, %v1265_v22  ;;  %v5394_v22 = vld [vmem:[#allocation17 + $0x16c] sm:$0xf] }
 0x127   : > { %v6498_v27 = vpack.c.bf16 %v1268_v25, %v1266_v24  ;;  %v1150_v28 = vpop.f32.mrf.mxu2  ;;  %v912_v30 = vpop.f32.mrf.mxu0  ;;  %v4733_v24 = vor.u32 %v5362_v20, %v4730_v21  ;;  %v4858_v25 = vld [vmem:[#allocation17 + $0x178] sm:$0xf0]  ;;  %v4840_v20 = vld [vmem:[#allocation17 + $0x148] sm:$0xf]  ;;  %v5392_v21 = vld [vmem:[#allocation17 + $0x154] sm:$0xf0] }
 0x128   : > { %v1199_v29 = vpop.f32.mrf.mxu3  ;;  %1813 = vmatmul.bf16.gmra.mxu0 %v6496_v26  ;;  %1911 = vmatmul.bf16.gmra.mxu2 %v6496_v26  ;;  %v961_v31 = vpop.f32.mrf.mxu1  ;;  %v1151_v33 = vadd.f32 %v1150_v28, %v6466_v2  ;;  %v913_v39 = vadd.f32 %v912_v30, %v6464_v1  ;;  %v4728_v28 = vld [vmem:[#allocation17 + $0x68] sm:$0xf]  ;;  %v4861_v32 = vor.u32 %v5394_v22, %v4858_v25 }
 0x129   : > { %1862 = vmatmul.bf16.gmra.mxu1 %v6498_v27  ;;  %1960 = vmatmul.bf16.gmra.mxu3 %v6498_v27  ;;  %v1200_v35 = vadd.f32 %v1199_v29, %v6470_v6  ;;  %v962_v46 = vadd.f32 %v961_v31, %v6468_v5  ;;  %v5364_v29 = vld [vmem:[#allocation17 + $0x74] sm:$0xf0] }
 0x12a   : > { %v1237_v53 = vmax.f32 %v1151_v33, 0.0  ;;  %v999_v62 = vmax.f32 %v913_v39, 0.0  ;;  %v4729_v33 = vor.u32 %v5364_v29, %v4728_v28  ;;  %2098 = vmatpush.bf16.msra.mxu2 %v4733_v24  ;;  %2147 = vmatpush.bf16.msra.mxu3 %v4861_v32  ;;  %v4841_v29 = vor.u32 %v5392_v21, %v4840_v20 }
 0x12b   : > { %v1238_v59 = vmax.f32 %v1200_v35, 0.0  ;;  %v1000_v0 = vmax.f32 %v962_v46, 0.0  ;;  %v5396_v35 = vld [vmem:[#allocation17 + $0x174] sm:$0xf0] }
 0x12c   : > { %v1269_v4 = vmul.f32 %v1237_v53, %v997_v52  ;;  %v4857_v41 = vor.u32 %v5396_v35, %v4856_v34  ;;  %2000 = vmatpush.bf16.msra.mxu0 %v4729_v33 }
 0x12d   : > { %v1270_v8 = vmul.f32 %v1238_v59, %v998_v58 }
 0x12e   : > { %2049 = vmatpush.bf16.msra.mxu1 %v4857_v41 }
 0x12f   : > { %v1152_v47 = vpop.f32.mrf.mxu2  ;;  %v915_v56 = vpop.f32.mrf.mxu0 }
 0x130   : > { %v1153_v54 = vadd.f32 %v1152_v47, %v6466_v2  ;;  %v1201_v55 = vpop.f32.mrf.mxu3  ;;  %v964_v61 = vpop.f32.mrf.mxu1  ;;  %v916_v16 = vadd.f32 %v915_v56, %v6464_v1 }
 0x131   : > { %v1202_v60 = vadd.f32 %v1201_v55, %v6470_v6  ;;  %v965_v18 = vadd.f32 %v964_v61, %v6468_v5 }
 0x132   : > { %v1239_v63 = vmax.f32 %v1153_v54, 0.0  ;;  %v1001_v36 = vmax.f32 %v916_v16, 0.0  ;;  %2050 = vmatpush.bf16.msra.mxu1 %v4841_v29 }
 0x133   : > { %v1240_v3 = vmax.f32 %v1202_v60, 0.0  ;;  %v1002_v42 = vmax.f32 %v965_v18, 0.0 }
 0x134   : > { %v1271_v7 = vmul.f32 %v1239_v63, %v999_v62 }
 0x135   : > { %v1272_v9 = vmul.f32 %v1240_v3, %v1000_v0 }
 0x136   : > { %v6512_v10 = vpack.c.bf16 %v1271_v7, %v1269_v4  ;;  %v5358_v4 = vld [vmem:[#allocation17 + $0x4c] sm:$0xf]  ;;  %v4714_v7 = vld [vmem:[#allocation17 + $0x58] sm:$0xf0] }
 0x137   : > { %v6514_v11 = vpack.c.bf16 %v1272_v9, %v1270_v8  ;;  %v1155_v12 = vpop.f32.mrf.mxu2  ;;  %v917_v14 = vpop.f32.mrf.mxu0  ;;  %v5390_v8 = vld [vmem:[#allocation17 + $0x14c] sm:$0xf] }
 0x138   : > { %v1204_v13 = vpop.f32.mrf.mxu3  ;;  %1818 = vmatmul.bf16.gmra.mxu0 %v6512_v10  ;;  %1916 = vmatmul.bf16.gmra.mxu2 %v6512_v10  ;;  %v966_v15 = vpop.f32.mrf.mxu1  ;;  %v1156_v17 = vadd.f32 %v1155_v12, %v6466_v2  ;;  %v918_v23 = vadd.f32 %v917_v14, %v6464_v1  ;;  %v4717_v12 = vor.u32 %v5358_v4, %v4714_v7  ;;  %v4712_v14 = vld [vmem:[#allocation17 + $0x48] sm:$0xf] }
 0x139   : > { %1867 = vmatmul.bf16.gmra.mxu1 %v6514_v11  ;;  %1965 = vmatmul.bf16.gmra.mxu3 %v6514_v11  ;;  %v1205_v19 = vadd.f32 %v1204_v13, %v6470_v6  ;;  %v967_v30 = vadd.f32 %v966_v15, %v6468_v5  ;;  %v4842_v13 = vld [vmem:[#allocation17 + $0x158] sm:$0xf0]  ;;  %v5360_v15 = vld [vmem:[#allocation17 + $0x54] sm:$0xf0] }
 0x13a   : > { %v1241_v37 = vmax.f32 %v1156_v17, 0.0  ;;  %v1003_v48 = vmax.f32 %v918_v23, 0.0  ;;  %v4845_v18 = vor.u32 %v5390_v8, %v4842_v13  ;;  %2099 = vmatpush.bf16.msra.mxu2 %v4717_v12  ;;  %v4824_v8 = vld [vmem:[#allocation17 + $0x128] sm:$0xf] }
 0x13b   : > { %v1242_v43 = vmax.f32 %v1205_v19, 0.0  ;;  %v1004_v50 = vmax.f32 %v967_v30, 0.0  ;;  %v4713_v19 = vor.u32 %v5360_v15, %v4712_v14 }
 0x13c   : > { %v1273_v52 = vmul.f32 %v1241_v37, %v1001_v36  ;;  %2148 = vmatpush.bf16.msra.mxu3 %v4845_v18 }
 0x13d   : > { %v1274_v54 = vmul.f32 %v1242_v43, %v1002_v42  ;;  %2001 = vmatpush.bf16.msra.mxu0 %v4713_v19 }
 0x13f   : > { %v1157_v31 = vpop.f32.mrf.mxu2  ;;  %v920_v40 = vpop.f32.mrf.mxu0 }
 0x140   : > { %v1158_v38 = vadd.f32 %v1157_v31, %v6466_v2  ;;  %v1206_v39 = vpop.f32.mrf.mxu3  ;;  %v969_v47 = vpop.f32.mrf.mxu1  ;;  %v921_v62 = vadd.f32 %v920_v40, %v6464_v1 }
 0x141   : > { %v1207_v46 = vadd.f32 %v1206_v39, %v6470_v6  ;;  %v970_v0 = vadd.f32 %v969_v47, %v6468_v5 }
 0x142   : > { %v1243_v49 = vmax.f32 %v1158_v38, 0.0  ;;  %v1005_v22 = vmax.f32 %v921_v62, 0.0  ;;  %v4696_v62 = vld [vmem:[#allocation17 + $0x28] sm:$0xf] }
 0x143   : > { %v1244_v51 = vmax.f32 %v1207_v46, 0.0  ;;  %v1006_v30 = vmax.f32 %v970_v0, 0.0 }
 0x144   : > { %v1275_v53 = vmul.f32 %v1243_v49, %v1003_v48 }
 0x145   : > { %v1276_v55 = vmul.f32 %v1244_v51, %v1004_v50 }
 0x146   : > { %v6528_v56 = vpack.c.bf16 %v1275_v53, %v1273_v52 }
 0x147   : > { %v6530_v57 = vpack.c.bf16 %v1276_v55, %v1274_v54  ;;  %v1160_v58 = vpop.f32.mrf.mxu2  ;;  %v922_v60 = vpop.f32.mrf.mxu0  ;;  %v5354_v54 = vld [vmem:[#allocation17 + $0x2c] sm:$0xf]  ;;  %v4698_v55 = vld [vmem:[#allocation17 + $0x38] sm:$0xf0] }
 0x148   : > { %v1209_v59 = vpop.f32.mrf.mxu3  ;;  %1823 = vmatmul.bf16.gmra.mxu0 %v6528_v56  ;;  %1921 = vmatmul.bf16.gmra.mxu2 %v6528_v56  ;;  %v971_v61 = vpop.f32.mrf.mxu1  ;;  %v1161_v63 = vadd.f32 %v1160_v58, %v6466_v2  ;;  %v923_v9 = vadd.f32 %v922_v60, %v6464_v1  ;;  %v5386_v58 = vld [vmem:[#allocation17 + $0x12c] sm:$0xf]  ;;  %v4701_v60 = vor.u32 %v5354_v54, %v4698_v55  ;;  %v5384_v54 = vld [vmem:[#allocation17 + $0x114] sm:$0xf0] }
 0x149   : > { %1872 = vmatmul.bf16.gmra.mxu1 %v6530_v57  ;;  %1970 = vmatmul.bf16.gmra.mxu3 %v6530_v57  ;;  %v1210_v3 = vadd.f32 %v1209_v59, %v6470_v6  ;;  %v972_v16 = vadd.f32 %v971_v61, %v6468_v5  ;;  %v4826_v61 = vld [vmem:[#allocation17 + $0x138] sm:$0xf0] }
 0x14a   : > { %v1245_v23 = vmax.f32 %v1161_v63, 0.0  ;;  %v1007_v34 = vmax.f32 %v923_v9, 0.0  ;;  %v5356_v63 = vld [vmem:[#allocation17 + $0x34] sm:$0xf0]  ;;  %v4829_v4 = vor.u32 %v5386_v58, %v4826_v61  ;;  %2100 = vmatpush.bf16.msra.mxu2 %v4701_v60 }
 0x14b   : > { %v1246_v31 = vmax.f32 %v1210_v3, 0.0  ;;  %v1008_v36 = vmax.f32 %v972_v16, 0.0  ;;  %v4697_v7 = vor.u32 %v5356_v63, %v4696_v62  ;;  %v5388_v9 = vld [vmem:[#allocation17 + $0x134] sm:$0xf0] }
 0x14c   : > { %v1277_v38 = vmul.f32 %v1245_v23, %v1005_v22  ;;  %2149 = vmatpush.bf16.msra.mxu3 %v4829_v4 }
 0x14d   : > { %v1278_v40 = vmul.f32 %v1246_v31, %v1006_v30  ;;  %2002 = vmatpush.bf16.msra.mxu0 %v4697_v7 }
 0x14f   : > { %v1162_v17 = vpop.f32.mrf.mxu2  ;;  %v925_v28 = vpop.f32.mrf.mxu0 }
 0x150   : > { %v1163_v24 = vadd.f32 %v1162_v17, %v6466_v2  ;;  %v1211_v25 = vpop.f32.mrf.mxu3  ;;  %v974_v33 = vpop.f32.mrf.mxu1  ;;  %v926_v50 = vadd.f32 %v925_v28, %v6464_v1  ;;  %v4825_v17 = vor.u32 %v5388_v9, %v4824_v8 }
 0x151   : > { %v1212_v32 = vadd.f32 %v1211_v25, %v6470_v6  ;;  %v975_v52 = vadd.f32 %v974_v33, %v6468_v5 }
 0x152   : > { %v1247_v35 = vmax.f32 %v1163_v24, 0.0  ;;  %v1009_v12 = vmax.f32 %v926_v50, 0.0  ;;  %2051 = vmatpush.bf16.msra.mxu1 %v4825_v17  ;;  %v4808_v50 = vld [vmem:[#allocation17 + $0x108] sm:$0xf] }
 0x153   : > { %v1248_v37 = vmax.f32 %v1212_v32, 0.0  ;;  %v1010_v18 = vmax.f32 %v975_v52, 0.0 }
 0x154   : > { %v1279_v39 = vmul.f32 %v1247_v35, %v1007_v34 }
 0x155   : > { %v1280_v41 = vmul.f32 %v1248_v37, %v1008_v36 }
 0x156   : > { %v6544_v42 = vpack.c.bf16 %v1279_v39, %v1277_v38  ;;  %v5350_v38 = vld [vmem:[#allocation17 + $0xc] sm:$0xf]  ;;  %v4682_v39 = vld [vmem:[#allocation17 + $0x18] sm:$0xf0] }
 0x157   : > { %v6546_v43 = vpack.c.bf16 %v1280_v41, %v1278_v40  ;;  %v1165_v46 = vpop.f32.mrf.mxu2  ;;  %v927_v48 = vpop.f32.mrf.mxu0  ;;  %v5382_v40 = vld [vmem:[#allocation17 + $0x10c] sm:$0xf]  ;;  %v4685_v41 = vor.u32 %v5350_v38, %v4682_v39  ;;  %v5473_v39 = vld [vmem:[#allocation18 + $0x1e4] sm:$0xf] }
 0x158   : > { %v1214_v47 = vpop.f32.mrf.mxu3  ;;  %1828 = vmatmul.bf16.gmra.mxu0 %v6544_v42  ;;  %1926 = vmatmul.bf16.gmra.mxu2 %v6544_v42  ;;  %v976_v49 = vpop.f32.mrf.mxu1  ;;  %v1166_v51 = vadd.f32 %v1165_v46, %v6466_v2  ;;  %v928_v59 = vadd.f32 %v927_v48, %v6464_v1  ;;  %v4810_v46 = vld [vmem:[#allocation17 + $0x118] sm:$0xf0] }
 0x159   : > { %1877 = vmatmul.bf16.gmra.mxu1 %v6546_v43  ;;  %1975 = vmatmul.bf16.gmra.mxu3 %v6546_v43  ;;  %v1215_v53 = vadd.f32 %v1214_v47, %v6470_v6  ;;  %v977_v0 = vadd.f32 %v976_v49, %v6468_v5  ;;  %v4680_v47 = vld [vmem:[#allocation17 + $0x8] sm:$0xf]  ;;  %v4813_v48 = vor.u32 %v5382_v40, %v4810_v46  ;;  %v5352_v49 = vld [vmem:[#allocation17 + $0x14] sm:$0xf0]  ;;  %v5170_v40 = vld [vmem:[#allocation18 + $0x1f0] sm:$0xf0] }
 0x15a   : > { %v1249_v13 = vmax.f32 %v1166_v51, 0.0  ;;  %v1011_v22 = vmax.f32 %v928_v59, 0.0  ;;  %2101 = vmatpush.bf16.msra.mxu2 %v4685_v41  ;;  %v4809_v59 = vor.u32 %v5384_v54, %v4808_v50  ;;  %v5173_v46 = vor.u32 %v5473_v39, %v5170_v40 }
 0x15b   : > { %v1250_v19 = vmax.f32 %v1215_v53, 0.0  ;;  %v1012_v24 = vmax.f32 %v977_v0, 0.0  ;;  %v4681_v53 = vor.u32 %v5352_v49, %v4680_v47  ;;  %2150 = vmatpush.bf16.msra.mxu3 %v4813_v48 }
 0x15c   : > { %v1281_v28 = vmul.f32 %v1249_v13, %v1009_v12  ;;  %2052 = vmatpush.bf16.msra.mxu1 %v4809_v59 }
 0x15d   : > { %v1282_v30 = vmul.f32 %v1250_v19, %v1010_v18  ;;  %2003 = vmatpush.bf16.msra.mxu0 %v4681_v53 }
 0x15f   : > { %v1167_v3 = vpop.f32.mrf.mxu2  ;;  %v930_v16 = vpop.f32.mrf.mxu0  ;;  %3000 = vmatpush.bf16.msrb.mxu3 %v5173_v46  ;;  %v5010_v46 = vld [vmem:[#allocation18 + $0xb0] sm:$0xf0] }
 0x160   : > { %v1168_v14 = vadd.f32 %v1167_v3, %v6466_v2  ;;  %v1216_v15 = vpop.f32.mrf.mxu3  ;;  %v979_v21 = vpop.f32.mrf.mxu1  ;;  %v931_v51 = vadd.f32 %v930_v16, %v6464_v1 }
 0x161   : > { %v1217_v20 = vadd.f32 %v1216_v15, %v6470_v6  ;;  %v980_v55 = vadd.f32 %v979_v21, %v6468_v5 }
 0x162   : > { %v1251_v23 = vmax.f32 %v1168_v14, 0.0  ;;  %v1013_v63 = vmax.f32 %v931_v51, 0.0 }
 0x163   : > { %v1252_v25 = vmax.f32 %v1217_v20, 0.0  ;;  %v1014_v7 = vmax.f32 %v980_v55, 0.0 }
 0x164   : > { %v1283_v29 = vmul.f32 %v1251_v23, %v1011_v22 }
 0x165   : > { %v1284_v31 = vmul.f32 %v1252_v25, %v1012_v24 }
 0x166   : > { %v6560_v32 = vpack.c.bf16 %v1283_v29, %v1281_v28 }
 0x167   : > { %v6562_v33 = vpack.c.bf16 %v1284_v31, %v1282_v30  ;;  %v1170_v34 = vpop.f32.mrf.mxu2  ;;  %v932_v36 = vpop.f32.mrf.mxu0 }
 0x168   : > { %v1219_v35 = vpop.f32.mrf.mxu3  ;;  %1833 = vmatmul.bf16.gmra.mxu0 %v6560_v32  ;;  %1931 = vmatmul.bf16.gmra.mxu2 %v6560_v32  ;;  %v981_v37 = vpop.f32.mrf.mxu1  ;;  %v1171_v52 = vadd.f32 %v1170_v34, %v6466_v2  ;;  %v933_v60 = vadd.f32 %v932_v36, %v6464_v1  ;;  %v5441_v34 = vld [vmem:[#allocation18 + $0xe4] sm:$0xf] }
 0x169   : > { %1882 = vmatmul.bf16.gmra.mxu1 %v6562_v33  ;;  %1980 = vmatmul.bf16.gmra.mxu3 %v6562_v33  ;;  %v1220_v58 = vadd.f32 %v1219_v35, %v6470_v6  ;;  %v982_v61 = vadd.f32 %v981_v37, %v6468_v5  ;;  %v5042_v35 = vld [vmem:[#allocation18 + $0xf0] sm:$0xf0] }
 0x16a   : > { %v1253_v0 = vmax.f32 %v1171_v52, 0.0  ;;  %v1015_v13 = vmax.f32 %v933_v60, 0.0  ;;  %v5045_v38 = vor.u32 %v5441_v34, %v5042_v35  ;;  %v5040_v60 = vld [vmem:[#allocation18 + $0xe0] sm:$0xf] }
 0x16b   : > { %v1254_v8 = vmax.f32 %v1220_v58, 0.0  ;;  %v1016_v16 = vmax.f32 %v982_v61, 0.0  ;;  %v5443_v61 = vld [vmem:[#allocation18 + $0xec] sm:$0xf0] }
 0x16c   : > { %v1285_v18 = vmul.f32 %v1253_v0, %v1013_v63  ;;  %2951 = vmatpush.bf16.msrb.mxu2 %v5045_v38  ;;  %v5041_v63 = vor.u32 %v5443_v61, %v5040_v60 }
 0x16d   : > { %v1286_v20 = vmul.f32 %v1254_v8, %v1014_v7 }
 0x16e   : > { %2853 = vmatpush.bf16.msrb.mxu0 %v5041_v63  ;;  %v5008_v63 = vld [vmem:[#allocation18 + $0xa0] sm:$0xf] }
 0x16f   : > { %v1172_v62 = vpop.f32.mrf.mxu2  ;;  %v935_v12 = vpop.f32.mrf.mxu0 }
 0x170   : > { %v1173_v3 = vadd.f32 %v1172_v62, %v6466_v2  ;;  %v1221_v4 = vpop.f32.mrf.mxu3  ;;  %v984_v15 = vpop.f32.mrf.mxu1  ;;  %v936_v29 = vadd.f32 %v935_v12, %v6464_v1 }
 0x171   : > { %v1222_v9 = vadd.f32 %v1221_v4, %v6470_v6  ;;  %v985_v36 = vadd.f32 %v984_v15, %v6468_v5  ;;  %v5475_v4 = vld [vmem:[#allocation18 + $0x1ec] sm:$0xf0] }
 0x172   : > { %v1255_v14 = vmax.f32 %v1173_v3, 0.0  ;;  %v1017_v49 = vmax.f32 %v936_v29, 0.0  ;;  %v5168_v3 = vld [vmem:[#allocation18 + $0x1e0] sm:$0xf] }
 0x173   : > { %v1256_v17 = vmax.f32 %v1222_v9, 0.0  ;;  %v1018_v53 = vmax.f32 %v985_v36, 0.0 }
 0x174   : > { %v1287_v19 = vmul.f32 %v1255_v14, %v1015_v13  ;;  %v5026_v13 = vld [vmem:[#allocation18 + $0xd0] sm:$0xf0]  ;;  %v5469_v14 = vld [vmem:[#allocation18 + $0x1c4] sm:$0xf] }
 0x175   : > { %v1288_v21 = vmul.f32 %v1256_v17, %v1016_v16  ;;  %v5154_v16 = vld [vmem:[#allocation18 + $0x1d0] sm:$0xf0] }
 0x176   : > { %v6576_v22 = vpack.c.bf16 %v1287_v19, %v1285_v18  ;;  %v5157_v17 = vor.u32 %v5469_v14, %v5154_v16  ;;  %v6603_v18 = vld [vmem:[%s7269_s29] sm:$0xf] }
 0x177   : > { %v6578_v23 = vpack.c.bf16 %v1288_v21, %v1286_v20  ;;  %v1175_v24 = vpop.f32.mrf.mxu2  ;;  %v937_v28 = vpop.f32.mrf.mxu0  ;;  %v6606_v19 = vperm.slane %v6603_v18, 0  ;;  %v5024_v20 = vld [vmem:[#allocation18 + $0xc0] sm:$0xf]  ;;  %v5439_v21 = vld [vmem:[#allocation18 + $0xcc] sm:$0xf0]  ;;  %v6612_v36 = vperm.slane %v6603_v18, 1 }
 0x178   : > { %v1224_v25 = vpop.f32.mrf.mxu3  ;;  %1838 = vmatmul.bf16.gmra.mxu0 %v6576_v22  ;;  %1936 = vmatmul.bf16.gmra.mxu2 %v6576_v22  ;;  %v1176_v30 = vadd.f32 %v1175_v24, %v6466_v2  ;;  %v986_v31 = vpop.f32.mrf.mxu1  ;;  %v938_v41 = vadd.f32 %v937_v28, %v6464_v1  ;;  %v5025_v24 = vor.u32 %v5439_v21, %v5024_v20  ;;  %v5471_v28 = vld [vmem:[#allocation18 + $0x1cc] sm:$0xf0] }
 0x179   : > { %1887 = vmatmul.bf16.gmra.mxu1 %v6578_v23  ;;  %1985 = vmatmul.bf16.gmra.mxu3 %v6578_v23  ;;  %v1225_v37 = vadd.f32 %v1224_v25, %v6470_v6  ;;  %v987_v47 = vadd.f32 %v986_v31, %v6468_v5  ;;  %v5152_v25 = vld [vmem:[#allocation18 + $0x1c0] sm:$0xf] }
 0x17a   : > { %v1257_v50 = vmax.f32 %v1176_v30, 0.0  ;;  %v1019_v58 = vmax.f32 %v938_v41, 0.0  ;;  %3001 = vmatpush.bf16.msrb.mxu3 %v5157_v17  ;;  %2854 = vmatpush.bf16.msrb.mxu0 %v5025_v24  ;;  %v5153_v30 = vor.u32 %v5471_v28, %v5152_v25  ;;  %v5433_v41 = vld [vmem:[#allocation18 + $0xa4] sm:$0xf] }
 0x17b   : > { %v1258_v54 = vmax.f32 %v1225_v37, 0.0  ;;  %v1020_v1 = vmax.f32 %v987_v47, 0.0  ;;  %v6619_v37 = vld [vmem:[%s7270_s25] sm:$0xf]  ;;  %v5465_v47 = vld [vmem:[#allocation18 + $0x1a4] sm:$0xf] }
 0x17c   : > { %v1289_v5 = vmul.f32 %v1257_v50, %v1017_v49  ;;  %v6626_v49 = vperm.slane %v6619_v37, 1 }
 0x17d   : > { %v1290_v7 = vmul.f32 %v1258_v54, %v1018_v53 }
 0x17f   : > { %v1177_v48 = vpop.f32.mrf.mxu2 }
 0x180   : > { %v1178_v51 = vadd.f32 %v1177_v48, %v6466_v2  ;;  %v1226_v52 = vpop.f32.mrf.mxu3  ;;  %v5169_v2 = vor.u32 %v5475_v4, %v5168_v3  ;;  %v6623_v48 = vperm.slane %v6619_v37, 0 }
 0x181   : > { %v1227_v55 = vadd.f32 %v1226_v52, %v6470_v6  ;;  %v5437_v6 = vld [vmem:[#allocation18 + $0xc4] sm:$0xf]  ;;  %v5138_v52 = vld [vmem:[#allocation18 + $0x1b0] sm:$0xf0] }
 0x182   : > { %v1259_v59 = vmax.f32 %v1178_v51, 0.0  ;;  %2902 = vmatpush.bf16.msrb.mxu1 %v5169_v2  ;;  %v5029_v15 = vor.u32 %v5437_v6, %v5026_v13  ;;  %v5013_v51 = vor.u32 %v5433_v41, %v5010_v46  ;;  %v5467_v2 = vld [vmem:[#allocation18 + $0x1ac] sm:$0xf0]  ;;  %v5122_v46 = vld [vmem:[#allocation18 + $0x190] sm:$0xf0] }
 0x183   : > { %v1260_v62 = vmax.f32 %v1227_v55, 0.0 }
 0x184   : > { %v1291_v0 = vmul.f32 %v1259_v59, %v1019_v58  ;;  %2952 = vmatpush.bf16.msrb.mxu2 %v5029_v15  ;;  %v5141_v59 = vor.u32 %v5465_v47, %v5138_v52 }
 0x185   : > { %v1292_v8 = vmul.f32 %v1260_v62, %v1020_v1 }
 0x186   : > { %v6592_v9 = vpack.c.bf16 %v1291_v0, %v1289_v5  ;;  %2903 = vmatpush.bf16.msrb.mxu1 %v5153_v30  ;;  %3002 = vmatpush.bf16.msrb.mxu3 %v5141_v59  ;;  %v5435_v5 = vld [vmem:[#allocation18 + $0xac] sm:$0xf0] }
 0x187   : > { %v6594_v12 = vpack.c.bf16 %v1292_v8, %v1290_v7  ;;  %v5009_v3 = vor.u32 %v5435_v5, %v5008_v63  ;;  %v5136_v8 = vld [vmem:[#allocation18 + $0x1a0] sm:$0xf]  ;;  %v5431_v63 = vld [vmem:[#allocation18 + $0x8c] sm:$0xf0] }
 0x188   : > { %1843 = vmatmul.bf16.gmra.mxu0 %v6592_v9  ;;  %1941 = vmatmul.bf16.gmra.mxu2 %v6592_v9  ;;  %v5137_v14 = vor.u32 %v5467_v2, %v5136_v8  ;;  %v5120_v5 = vld [vmem:[#allocation18 + $0x180] sm:$0xf] }
 0x189   : > { %1892 = vmatmul.bf16.gmra.mxu1 %v6594_v12  ;;  %1990 = vmatmul.bf16.gmra.mxu3 %v6594_v12 }
 0x18a   : > { %2953 = vmatpush.bf16.msrb.mxu2 %v5013_v51  ;;  %2855 = vmatpush.bf16.msrb.mxu0 %v5009_v3 }
 0x18b   : > { %2904 = vmatpush.bf16.msrb.mxu1 %v5137_v14 }
 0x195   : > { %v1809_v29 = vpop.f32.mrf.mxu0 }
 0x196   : > { %v1810_v31 = vadd.f32 %v1809_v29, %v6606_v19  ;;  %v1858_v34 = vpop.f32.mrf.mxu1 }
 0x198   : > { %v1859_v35 = vadd.f32 %v1858_v34, %v1810_v31  ;;  %2004 = vmatmul.bf16.vlgmr.msra.gmra.mxu0 %v6480_v44  ;;  %2102 = vmatmul.bf16.vlgmr.msra.gmra.mxu2 %v6480_v44  ;;  %v5429_v34 = vld [vmem:[#allocation18 + $0x84] sm:$0xf] }
 0x199   : > { %2053 = vmatmul.bf16.vlgmr.msra.gmra.mxu1 %v6482_v45  ;;  %2151 = vmatmul.bf16.vlgmr.msra.gmra.mxu3 %v6482_v45 }
 0x19a   : > { %v2192_v53 = vmax.f32 %v1859_v35, 0.0  ;;  %v4994_v35 = vld [vmem:[#allocation18 + $0x90] sm:$0xf0] }
 0x19b   : > { %v1907_v38 = vpop.f32.mrf.mxu2  ;;  %v4997_v41 = vor.u32 %v5429_v34, %v4994_v35 }
 0x19c   : > { %v1908_v39 = vadd.f32 %v1907_v38, %v6612_v36  ;;  %v1956_v40 = vpop.f32.mrf.mxu3  ;;  %v2282_v1 = vmul.f32 %v6623_v48, %v2192_v53  ;;  %v5461_v38 = vld [vmem:[#allocation18 + $0x184] sm:$0xf] }
 0x19d   : > { %v1811_v50 = vpop.f32.mrf.mxu0  ;;  %v5125_v53 = vor.u32 %v5461_v38, %v5122_v46  ;;  %2954 = vmatpush.bf16.msrb.mxu2 %v4997_v41 }
 0x19e   : > { %v1957_v54 = vadd.f32 %v1956_v40, %v1908_v39  ;;  %v1812_v55 = vadd.f32 %v1811_v50, %v6606_v19  ;;  %v1860_v58 = vpop.f32.mrf.mxu1 }
 0x19f   : > { %3003 = vmatpush.bf16.msrb.mxu3 %v5125_v53 }
 0x1a0   : > { %v2193_v60 = vmax.f32 %v1957_v54, 0.0  ;;  %v1861_v61 = vadd.f32 %v1860_v58, %v1812_v55 }
 0x1a2   : > { %v2283_v62 = vmul.f32 %v6626_v49, %v2193_v60  ;;  %v2196_v15 = vmax.f32 %v1861_v61, 0.0 }
 0x1a3   : > { %v1909_v0 = vpop.f32.mrf.mxu2 }
 0x1a4   : > { %v1910_v4 = vadd.f32 %v1909_v0, %v6612_v36  ;;  %v1958_v7 = vpop.f32.mrf.mxu3  ;;  %v6632_v6 = vadd.f32 %v2283_v62, %v2282_v1  ;;  %v2286_v25 = vmul.f32 %v6623_v48, %v2196_v15  ;;  %v4992_v62 = vld [vmem:[#allocation18 + $0x80] sm:$0xf] }
 0x1a5   : > { %v1814_v13 = vpop.f32.mrf.mxu0 }
 0x1a6   : > { %v1959_v16 = vadd.f32 %v1958_v7, %v1910_v4  ;;  %v1815_v17 = vadd.f32 %v1814_v13, %v6606_v19  ;;  %v1863_v20 = vpop.f32.mrf.mxu1  ;;  %v4993_v4 = vor.u32 %v5431_v63, %v4992_v62  ;;  %v5463_v7 = vld [vmem:[#allocation18 + $0x18c] sm:$0xf0]  ;;  %v5104_v62 = vld [vmem:[#allocation18 + $0x160] sm:$0xf] }
 0x1a7   : > { %v5121_v15 = vor.u32 %v5463_v7, %v5120_v5 }
 0x1a8   : > { %v2197_v21 = vmax.f32 %v1959_v16, 0.0  ;;  %v1864_v24 = vadd.f32 %v1863_v20, %v1815_v17  ;;  %2009 = vmatmul.bf16.gmra.mxu0 %v6496_v26  ;;  %2107 = vmatmul.bf16.gmra.mxu2 %v6496_v26 }
 0x1a9   : > { %2058 = vmatmul.bf16.gmra.mxu1 %v6498_v27  ;;  %2156 = vmatmul.bf16.gmra.mxu3 %v6498_v27 }
 0x1aa   : > { %v2287_v28 = vmul.f32 %v6626_v49, %v2197_v21  ;;  %v2200_v47 = vmax.f32 %v1864_v24, 0.0  ;;  %2856 = vmatpush.bf16.msrb.mxu0 %v4993_v4  ;;  %2905 = vmatpush.bf16.msrb.mxu1 %v5121_v15  ;;  %v5459_v4 = vld [vmem:[#allocation18 + $0x16c] sm:$0xf0] }
 0x1ab   : > { %v1912_v29 = vpop.f32.mrf.mxu2 }
 0x1ac   : > { %v1913_v30 = vadd.f32 %v1912_v29, %v6612_v36  ;;  %v1961_v31 = vpop.f32.mrf.mxu3  ;;  %v6642_v39 = vadd.f32 %v2287_v28, %v2286_v25  ;;  %v2290_v58 = vmul.f32 %v6623_v48, %v2200_v47  ;;  %v5425_v29 = vld [vmem:[#allocation18 + $0x64] sm:$0xf] }
 0x1ad   : > { %v1816_v40 = vpop.f32.mrf.mxu0 }
 0x1ae   : > { %v1962_v50 = vadd.f32 %v1961_v31, %v1913_v30  ;;  %v1817_v51 = vadd.f32 %v1816_v40, %v6606_v19  ;;  %v1865_v52 = vpop.f32.mrf.mxu1  ;;  %v4978_v30 = vld [vmem:[#allocation18 + $0x70] sm:$0xf0]  ;;  %v5457_v31 = vld [vmem:[#allocation18 + $0x164] sm:$0xf] }
 0x1af   : > { %v4981_v38 = vor.u32 %v5425_v29, %v4978_v30  ;;  %v5106_v40 = vld [vmem:[#allocation18 + $0x170] sm:$0xf0]  ;;  %v5453_v30 = vld [vmem:[#allocation18 + $0x144] sm:$0xf] }
 0x1b0   : > { %v2201_v54 = vmax.f32 %v1962_v50, 0.0  ;;  %v1866_v55 = vadd.f32 %v1865_v52, %v1817_v51  ;;  %v5109_v51 = vor.u32 %v5457_v31, %v5106_v40  ;;  %v4962_v29 = vld [vmem:[#allocation18 + $0x50] sm:$0xf0] }
 0x1b1   : > { %2955 = vmatpush.bf16.msrb.mxu2 %v4981_v38  ;;  %v5090_v40 = vld [vmem:[#allocation18 + $0x150] sm:$0xf0] }
 0x1b2   : > { %v2291_v59 = vmul.f32 %v6626_v49, %v2201_v54  ;;  %v2204_v8 = vmax.f32 %v1866_v55, 0.0  ;;  %3004 = vmatpush.bf16.msrb.mxu3 %v5109_v51  ;;  %v5093_v51 = vor.u32 %v5453_v30, %v5090_v40  ;;  %v4946_v30 = vld [vmem:[#allocation18 + $0x30] sm:$0xf0] }
 0x1b3   : > { %v1914_v60 = vpop.f32.mrf.mxu2 }
 0x1b4   : > { %v1915_v61 = vadd.f32 %v1914_v60, %v6612_v36  ;;  %v1963_v1 = vpop.f32.mrf.mxu3  ;;  %v6648_v0 = vadd.f32 %v2291_v59, %v2290_v58  ;;  %v2294_v20 = vmul.f32 %v6623_v48, %v2204_v8 }
 0x1b5   : > { %v1819_v3 = vpop.f32.mrf.mxu0 }
 0x1b6   : > { %v1964_v2 = vadd.f32 %v1963_v1, %v1915_v61  ;;  %v1820_v13 = vadd.f32 %v1819_v3, %v6606_v19  ;;  %v1868_v14 = vpop.f32.mrf.mxu1  ;;  %v4976_v61 = vld [vmem:[#allocation18 + $0x60] sm:$0xf]  ;;  %v5427_v1 = vld [vmem:[#allocation18 + $0x6c] sm:$0xf0]  ;;  %3005 = vmatpush.bf16.msrb.mxu3 %v5093_v51 }
 0x1b7   : > { %v4977_v3 = vor.u32 %v5427_v1, %v4976_v61  ;;  %v4960_v1 = vld [vmem:[#allocation18 + $0x40] sm:$0xf] }
 0x1b8   : > { %v2205_v16 = vmax.f32 %v1964_v2, 0.0  ;;  %v1869_v17 = vadd.f32 %v1868_v14, %v1820_v13  ;;  %2014 = vmatmul.bf16.gmra.mxu0 %v6512_v10  ;;  %2112 = vmatmul.bf16.gmra.mxu2 %v6512_v10  ;;  %v5105_v14 = vor.u32 %v5459_v4, %v5104_v62  ;;  %v5423_v62 = vld [vmem:[#allocation18 + $0x4c] sm:$0xf0] }
 0x1b9   : > { %2063 = vmatmul.bf16.gmra.mxu1 %v6514_v11  ;;  %2161 = vmatmul.bf16.gmra.mxu3 %v6514_v11  ;;  %v4961_v4 = vor.u32 %v5423_v62, %v4960_v1 }
 0x1ba   : > { %v2295_v21 = vmul.f32 %v6626_v49, %v2205_v16  ;;  %v2208_v41 = vmax.f32 %v1869_v17, 0.0  ;;  %2857 = vmatpush.bf16.msrb.mxu0 %v4977_v3  ;;  %2906 = vmatpush.bf16.msrb.mxu1 %v5105_v14 }
 0x1bb   : > { %v1917_v24 = vpop.f32.mrf.mxu2 }
 0x1bc   : > { %v1918_v25 = vadd.f32 %v1917_v24, %v6612_v36  ;;  %v1966_v28 = vpop.f32.mrf.mxu3  ;;  %v6658_v34 = vadd.f32 %v2295_v21, %v2294_v20  ;;  %v2298_v54 = vmul.f32 %v6623_v48, %v2208_v41 }
 0x1bd   : > { %v1821_v35 = vpop.f32.mrf.mxu0 }
 0x1be   : > { %v1967_v46 = vadd.f32 %v1966_v28, %v1918_v25  ;;  %v1822_v47 = vadd.f32 %v1821_v35, %v6606_v19  ;;  %v1870_v50 = vpop.f32.mrf.mxu1  ;;  %v5421_v28 = vld [vmem:[#allocation18 + $0x44] sm:$0xf]  ;;  %2858 = vmatpush.bf16.msrb.mxu0 %v4961_v4  ;;  %v5419_v4 = vld [vmem:[#allocation18 + $0x2c] sm:$0xf0] }
 0x1bf   : > { %v4965_v38 = vor.u32 %v5421_v28, %v4962_v29  ;;  %v5417_v29 = vld [vmem:[#allocation18 + $0x24] sm:$0xf] }
 0x1c0   : > { %v2209_v52 = vmax.f32 %v1967_v46, 0.0  ;;  %v1871_v53 = vadd.f32 %v1870_v50, %v1822_v47 }
 0x1c1   : > { %2956 = vmatpush.bf16.msrb.mxu2 %v4965_v38 }
 0x1c2   : > { %v2299_v55 = vmul.f32 %v6626_v49, %v2209_v52  ;;  %v2212_v7 = vmax.f32 %v1871_v53, 0.0 }
 0x1c3   : > { %v1919_v58 = vpop.f32.mrf.mxu2 }
 0x1c4   : > { %v1920_v59 = vadd.f32 %v1919_v58, %v6612_v36  ;;  %v1968_v60 = vpop.f32.mrf.mxu3  ;;  %v6664_v63 = vadd.f32 %v2299_v55, %v2298_v54  ;;  %v2302_v17 = vmul.f32 %v6623_v48, %v2212_v7  ;;  %v5455_v7 = vld [vmem:[#allocation18 + $0x14c] sm:$0xf0] }
 0x1c5   : > { %v1824_v5 = vpop.f32.mrf.mxu0 }
 0x1c6   : > { %v1969_v8 = vadd.f32 %v1968_v60, %v1920_v59  ;;  %v1825_v2 = vadd.f32 %v1824_v5, %v6606_v19  ;;  %v1873_v13 = vpop.f32.mrf.mxu1  ;;  %v5088_v5 = vld [vmem:[#allocation18 + $0x140] sm:$0xf] }
 0x1c8   : > { %v2213_v15 = vmax.f32 %v1969_v8, 0.0  ;;  %v1874_v16 = vadd.f32 %v1873_v13, %v1825_v2  ;;  %2019 = vmatmul.bf16.gmra.mxu0 %v6528_v56  ;;  %2117 = vmatmul.bf16.gmra.mxu2 %v6528_v56 }
 0x1c9   : > { %2068 = vmatmul.bf16.gmra.mxu1 %v6530_v57  ;;  %2166 = vmatmul.bf16.gmra.mxu3 %v6530_v57 }
 0x1ca   : > { %v2303_v20 = vmul.f32 %v6626_v49, %v2213_v15  ;;  %v2216_v41 = vmax.f32 %v1874_v16, 0.0  ;;  %v5089_v15 = vor.u32 %v5455_v7, %v5088_v5  ;;  %v5072_v7 = vld [vmem:[#allocation18 + $0x120] sm:$0xf] }
 0x1cb   : > { %v1922_v21 = vpop.f32.mrf.mxu2 }
 0x1cc   : > { %v1923_v24 = vadd.f32 %v1922_v21, %v6612_v36  ;;  %v1971_v25 = vpop.f32.mrf.mxu3  ;;  %v6674_v31 = vadd.f32 %v2303_v20, %v2302_v17  ;;  %v2306_v54 = vmul.f32 %v6623_v48, %v2216_v41  ;;  %2907 = vmatpush.bf16.msrb.mxu1 %v5089_v15  ;;  %v4949_v41 = vor.u32 %v5417_v29, %v4946_v30 }
 0x1cd   : > { %v1826_v35 = vpop.f32.mrf.mxu0 }
 0x1ce   : > { %v1972_v46 = vadd.f32 %v1971_v25, %v1923_v24  ;;  %v1827_v47 = vadd.f32 %v1826_v35, %v6606_v19  ;;  %v1875_v50 = vpop.f32.mrf.mxu1  ;;  %v5449_v35 = vld [vmem:[#allocation18 + $0x124] sm:$0xf]  ;;  %2957 = vmatpush.bf16.msrb.mxu2 %v4949_v41  ;;  %v4930_v41 = vld [vmem:[#allocation18 + $0x10] sm:$0xf0] }
 0x1d0   : > { %v2217_v52 = vmax.f32 %v1972_v46, 0.0  ;;  %v1876_v53 = vadd.f32 %v1875_v50, %v1827_v47  ;;  %v5074_v46 = vld [vmem:[#allocation18 + $0x130] sm:$0xf0] }
 0x1d2   : > { %v2307_v55 = vmul.f32 %v6626_v49, %v2217_v52  ;;  %v2220_v8 = vmax.f32 %v1876_v53, 0.0  ;;  %v5077_v53 = vor.u32 %v5449_v35, %v5074_v46  ;;  %v5445_v46 = vld [vmem:[#allocation18 + $0x104] sm:$0xf] }
 0x1d3   : > { %v1924_v58 = vpop.f32.mrf.mxu2 }
 0x1d4   : > { %v6679_v59 = vadd.f32 %v2307_v55, %v2306_v54  ;;  %v1925_v60 = vadd.f32 %v1924_v58, %v6612_v36  ;;  %v1973_v61 = vpop.f32.mrf.mxu3  ;;  %v2310_v20 = vmul.f32 %v6623_v48, %v2220_v8  ;;  %3006 = vmatpush.bf16.msrb.mxu3 %v5077_v53 }
 0x1d5   : > { %v1829_v3 = vpop.f32.mrf.mxu0 }
 0x1d6   : > { %v1974_v2 = vadd.f32 %v1973_v61, %v1925_v60  ;;  %v1830_v13 = vadd.f32 %v1829_v3, %v6606_v19  ;;  %v1878_v14 = vpop.f32.mrf.mxu1  ;;  %v4944_v3 = vld [vmem:[#allocation18 + $0x20] sm:$0xf] }
 0x1d8   : > { %v2221_v16 = vmax.f32 %v1974_v2, 0.0  ;;  %v1879_v17 = vadd.f32 %v1878_v14, %v1830_v13  ;;  %2024 = vmatmul.bf16.gmra.mxu0 %v6544_v42  ;;  %2122 = vmatmul.bf16.gmra.mxu2 %v6544_v42  ;;  %v4945_v2 = vor.u32 %v5419_v4, %v4944_v3  ;;  %v5451_v13 = vld [vmem:[#allocation18 + $0x12c] sm:$0xf0] }
 0x1d9   : > { %2073 = vmatmul.bf16.gmra.mxu1 %v6546_v43  ;;  %2171 = vmatmul.bf16.gmra.mxu3 %v6546_v43 }
 0x1da   : > { %v2311_v21 = vmul.f32 %v6626_v49, %v2221_v16  ;;  %v2224_v47 = vmax.f32 %v1879_v17, 0.0  ;;  %2859 = vmatpush.bf16.msrb.mxu0 %v4945_v2  ;;  %v5056_v2 = vld [vmem:[#allocation18 + $0x100] sm:$0xf] }
 0x1db   : > { %v1927_v24 = vpop.f32.mrf.mxu2 }
 0x1dc   : > { %v1928_v25 = vadd.f32 %v1927_v24, %v6612_v36  ;;  %v1976_v28 = vpop.f32.mrf.mxu3  ;;  %v6690_v38 = vadd.f32 %v2311_v21, %v2310_v20  ;;  %v2314_v58 = vmul.f32 %v6623_v48, %v2224_v47  ;;  %v5073_v20 = vor.u32 %v5451_v13, %v5072_v7  ;;  %v4928_v7 = vld [vmem:[#allocation18] sm:$0xf] }
 0x1dd   : > { %v1831_v40 = vpop.f32.mrf.mxu0 }
 0x1de   : > { %v1977_v50 = vadd.f32 %v1976_v28, %v1928_v25  ;;  %v1832_v51 = vadd.f32 %v1831_v40, %v6606_v19  ;;  %v1880_v52 = vpop.f32.mrf.mxu1  ;;  %2908 = vmatpush.bf16.msrb.mxu1 %v5073_v20  ;;  %v5413_v40 = vld [vmem:[#allocation18 + $0x4] sm:$0xf] }
 0x1e0   : > { %v2225_v54 = vmax.f32 %v1977_v50, 0.0  ;;  %v1881_v55 = vadd.f32 %v1880_v52, %v1832_v51  ;;  %v4933_v51 = vor.u32 %v5413_v40, %v4930_v41  ;;  %v5058_v52 = vld [vmem:[#allocation18 + $0x110] sm:$0xf0] }
 0x1e2   : > { %v2315_v60 = vmul.f32 %v6626_v49, %v2225_v54  ;;  %v2228_v14 = vmax.f32 %v1881_v55, 0.0  ;;  %2958 = vmatpush.bf16.msrb.mxu2 %v4933_v51 }
 0x1e3   : > { %v1929_v61 = vpop.f32.mrf.mxu2 }
 0x1e4   : > { %v6695_v1 = vadd.f32 %v2315_v60, %v2314_v58  ;;  %v1930_v62 = vadd.f32 %v1929_v61, %v6612_v36  ;;  %v1978_v5 = vpop.f32.mrf.mxu3  ;;  %v2318_v25 = vmul.f32 %v6623_v48, %v2228_v14  ;;  %v5061_v60 = vor.u32 %v5445_v46, %v5058_v52  ;;  %v5442_v52 = vld [vmem:[#allocation18 + $0xec] sm:$0xf] }
 0x1e5   : > { %v1834_v8 = vpop.f32.mrf.mxu0 }
 0x1e6   : > { %v1979_v15 = vadd.f32 %v1978_v5, %v1930_v62  ;;  %v1835_v16 = vadd.f32 %v1834_v8, %v6606_v19  ;;  %v1883_v17 = vpop.f32.mrf.mxu1  ;;  %3007 = vmatpush.bf16.msrb.mxu3 %v5061_v60  ;;  %v5415_v8 = vld [vmem:[#allocation18 + $0xc] sm:$0xf0] }
 0x1e8   : > { %v2229_v21 = vmax.f32 %v1979_v15, 0.0  ;;  %v1884_v24 = vadd.f32 %v1883_v17, %v1835_v16  ;;  %2029 = vmatmul.bf16.gmra.mxu0 %v6560_v32  ;;  %2127 = vmatmul.bf16.gmra.mxu2 %v6560_v32  ;;  %v4929_v16 = vor.u32 %v5415_v8, %v4928_v7  ;;  %v5447_v17 = vld [vmem:[#allocation18 + $0x10c] sm:$0xf0] }
 0x1e9   : > { %2078 = vmatmul.bf16.gmra.mxu1 %v6562_v33  ;;  %2176 = vmatmul.bf16.gmra.mxu3 %v6562_v33 }
 0x1ea   : > { %v2319_v28 = vmul.f32 %v6626_v49, %v2229_v21  ;;  %v2232_v53 = vmax.f32 %v1884_v24, 0.0  ;;  %v5057_v21 = vor.u32 %v5447_v17, %v5056_v2  ;;  %2860 = vmatpush.bf16.msrb.mxu0 %v4929_v16 }
 0x1eb   : > { %v1932_v29 = vpop.f32.mrf.mxu2 }
 0x1ec   : > { %v1933_v30 = vadd.f32 %v1932_v29, %v6612_v36  ;;  %v1981_v35 = vpop.f32.mrf.mxu3  ;;  %v6706_v47 = vadd.f32 %v2319_v28, %v2318_v25  ;;  %v2322_v5 = vmul.f32 %v6623_v48, %v2232_v53  ;;  %2909 = vmatpush.bf16.msrb.mxu1 %v5057_v21  ;;  %v5050_v53 = vld [vmem:[#allocation18 + $0xf8] sm:$0xf0] }
 0x1ed   : > { %v1836_v50 = vpop.f32.mrf.mxu0  ;;  %v5053_v60 = vor.u32 %v5442_v52, %v5050_v53 }
 0x1ee   : > { %v1982_v54 = vadd.f32 %v1981_v35, %v1933_v30  ;;  %v1837_v55 = vadd.f32 %v1836_v50, %v6606_v19  ;;  %v1885_v58 = vpop.f32.mrf.mxu1 }
 0x1ef   : > { %3147 = vmatpush.bf16.msra.mxu2 %v5053_v60 }
 0x1f0   : > { %v2233_v61 = vmax.f32 %v1982_v54, 0.0  ;;  %v1886_v62 = vadd.f32 %v1885_v58, %v1837_v55  ;;  %v5474_v54 = vld [vmem:[#allocation18 + $0x1ec] sm:$0xf] }
 0x1f2   : > { %v2323_v3 = vmul.f32 %v6626_v49, %v2233_v61  ;;  %v2236_v24 = vmax.f32 %v1886_v62, 0.0  ;;  %v5178_v61 = vld [vmem:[#allocation18 + $0x1f8] sm:$0xf0] }
 0x1f3   : > { %v1934_v4 = vpop.f32.mrf.mxu2  ;;  %v5181_v7 = vor.u32 %v5474_v54, %v5178_v61 }
 0x1f4   : > { %v6711_v13 = vadd.f32 %v2323_v3, %v2322_v5  ;;  %v1935_v14 = vadd.f32 %v1934_v4, %v6612_v36  ;;  %v1983_v15 = vpop.f32.mrf.mxu3  ;;  %v2326_v40 = vmul.f32 %v6623_v48, %v2236_v24 }
 0x1f5   : > { %v1839_v20 = vpop.f32.mrf.mxu0  ;;  %3196 = vmatpush.bf16.msra.mxu3 %v5181_v7 }
 0x1f6   : > { %v1984_v25 = vadd.f32 %v1983_v15, %v1935_v14  ;;  %v1840_v28 = vadd.f32 %v1839_v20, %v6606_v19  ;;  %v1888_v29 = vpop.f32.mrf.mxu1  ;;  %v5048_v14 = vld [vmem:[#allocation18 + $0xe8] sm:$0xf]  ;;  %v5444_v15 = vld [vmem:[#allocation18 + $0xf4] sm:$0xf0] }
 0x1f7   : > { %v5049_v16 = vor.u32 %v5444_v15, %v5048_v14  ;;  %v5162_v14 = vld [vmem:[#allocation18 + $0x1d8] sm:$0xf0] }
 0x1f8   : > { %v2237_v30 = vmax.f32 %v1984_v25, 0.0  ;;  %v1889_v35 = vadd.f32 %v1888_v29, %v1840_v28  ;;  %2034 = vmatmul.bf16.gmra.mxu0 %v6576_v22  ;;  %2132 = vmatmul.bf16.gmra.mxu2 %v6576_v22  ;;  %v5176_v29 = vld [vmem:[#allocation18 + $0x1e8] sm:$0xf] }
 0x1f9   : > { %2083 = vmatmul.bf16.gmra.mxu1 %v6578_v23  ;;  %2181 = vmatmul.bf16.gmra.mxu3 %v6578_v23 }
 0x1fa   : > { %v2327_v41 = vmul.f32 %v6626_v49, %v2237_v30  ;;  %v2240_v62 = vmax.f32 %v1889_v35, 0.0  ;;  %3049 = vmatpush.bf16.msra.mxu0 %v5049_v16  ;;  %v5476_v30 = vld [vmem:[#allocation18 + $0x1f4] sm:$0xf0] }
 0x1fb   : > { %v1937_v46 = vpop.f32.mrf.mxu2 }
 0x1fc   : > { %v1938_v50 = vadd.f32 %v1937_v46, %v6612_v36  ;;  %v1986_v51 = vpop.f32.mrf.mxu3  ;;  %v6722_v55 = vadd.f32 %v2327_v41, %v2326_v40  ;;  %v2330_v17 = vmul.f32 %v6623_v48, %v2240_v62  ;;  %v5177_v40 = vor.u32 %v5476_v30, %v5176_v29  ;;  %v5032_v29 = vld [vmem:[#allocation18 + $0xc8] sm:$0xf]  ;;  %v5440_v30 = vld [vmem:[#allocation18 + $0xd4] sm:$0xf0] }
 0x1fd   : > { %v1841_v58 = vpop.f32.mrf.mxu0 }
 0x1fe   : > { %v1987_v5 = vadd.f32 %v1986_v51, %v1938_v50  ;;  %v1842_v3 = vadd.f32 %v1841_v58, %v6606_v19  ;;  %v1890_v4 = vpop.f32.mrf.mxu1  ;;  %3098 = vmatpush.bf16.msra.mxu1 %v5177_v40 }
 0x200   : > { %v2241_v8 = vmax.f32 %v1987_v5, 0.0  ;;  %v1891_v2 = vadd.f32 %v1890_v4, %v1842_v3  ;;  %v5438_v5 = vld [vmem:[#allocation18 + $0xcc] sm:$0xf]  ;;  %v5034_v3 = vld [vmem:[#allocation18 + $0xd8] sm:$0xf0] }
 0x201   : > { %v5470_v4 = vld [vmem:[#allocation18 + $0x1cc] sm:$0xf] }
 0x202   : > { %v2331_v20 = vmul.f32 %v6626_v49, %v2241_v8  ;;  %v2244_v41 = vmax.f32 %v1891_v2, 0.0  ;;  %v5037_v2 = vor.u32 %v5438_v5, %v5034_v3 }
 0x203   : > { %v1939_v21 = vpop.f32.mrf.mxu2 }
 0x204   : > { %v6727_v24 = vadd.f32 %v2331_v20, %v2330_v17  ;;  %v1940_v25 = vadd.f32 %v1939_v21, %v6612_v36  ;;  %v1988_v28 = vpop.f32.mrf.mxu3  ;;  %v2334_v54 = vmul.f32 %v6623_v48, %v2244_v41  ;;  %v5165_v21 = vor.u32 %v5470_v4, %v5162_v14  ;;  %3148 = vmatpush.bf16.msra.mxu2 %v5037_v2 }
 0x205   : > { %v1844_v35 = vpop.f32.mrf.mxu0  ;;  %v6753_v2 = vperm.slane %v6603_v18, 3 }
 0x206   : > { %v1989_v46 = vadd.f32 %v1988_v28, %v1940_v25  ;;  %v1845_v50 = vadd.f32 %v1844_v35, %v6606_v19  ;;  %v1893_v51 = vpop.f32.mrf.mxu1  ;;  %3197 = vmatpush.bf16.msra.mxu3 %v5165_v21  ;;  %v5033_v35 = vor.u32 %v5440_v30, %v5032_v29 }
 0x208   : > { %v2245_v52 = vmax.f32 %v1989_v46, 0.0  ;;  %v1894_v53 = vadd.f32 %v1893_v51, %v1845_v50  ;;  %2039 = vmatmul.bf16.gmra.mxu0 %v6592_v9  ;;  %2137 = vmatmul.bf16.gmra.mxu2 %v6592_v9  ;;  %v6744_v46 = vperm.slane %v6603_v18, 2  ;;  %v5466_v18 = vld [vmem:[#allocation18 + $0x1ac] sm:$0xf] }
 0x209   : > { %2088 = vmatmul.bf16.gmra.mxu1 %v6594_v12  ;;  %2186 = vmatmul.bf16.gmra.mxu3 %v6594_v12 }
 0x20a   : > { %v2335_v58 = vmul.f32 %v6626_v49, %v2245_v52  ;;  %v2248_v15 = vmax.f32 %v1894_v53, 0.0  ;;  %3050 = vmatpush.bf16.msra.mxu0 %v5033_v35  ;;  %v5160_v53 = vld [vmem:[#allocation18 + $0x1c8] sm:$0xf]  ;;  %v6766_v35 = vperm.slane %v6619_v37, 3 }
 0x20b   : > { %v1942_v60 = vpop.f32.mrf.mxu2 }
 0x20c   : > { %v1943_v61 = vadd.f32 %v1942_v60, %v6612_v36  ;;  %v1991_v62 = vpop.f32.mrf.mxu3  ;;  %v6738_v7 = vadd.f32 %v2335_v58, %v2334_v54  ;;  %v2338_v40 = vmul.f32 %v6623_v48, %v2248_v15  ;;  %v5472_v54 = vld [vmem:[#allocation18 + $0x1d4] sm:$0xf0] }
 0x20d   : > { %v1846_v8 = vpop.f32.mrf.mxu0  ;;  %v5161_v60 = vor.u32 %v5472_v54, %v5160_v53 }
 0x20e   : > { %v1992_v16 = vadd.f32 %v1991_v62, %v1943_v61  ;;  %v1847_v17 = vadd.f32 %v1846_v8, %v6606_v19  ;;  %v1895_v20 = vpop.f32.mrf.mxu1 }
 0x20f   : > { %3099 = vmatpush.bf16.msra.mxu1 %v5161_v60  ;;  %v5436_v60 = vld [vmem:[#allocation18 + $0xb4] sm:$0xf0] }
 0x210   : > { %v2249_v25 = vmax.f32 %v1992_v16, 0.0  ;;  %v1896_v28 = vadd.f32 %v1895_v20, %v1847_v17  ;;  %v6760_v16 = vperm.slane %v6619_v37, 2 }
 0x212   : > { %v2339_v41 = vmul.f32 %v6626_v49, %v2249_v25  ;;  %v2252_v61 = vmax.f32 %v1896_v28, 0.0  ;;  %v5434_v25 = vld [vmem:[#allocation18 + $0xac] sm:$0xf]  ;;  %v5018_v28 = vld [vmem:[#allocation18 + $0xb8] sm:$0xf0] }
 0x213   : > { %v1944_v50 = vpop.f32.mrf.mxu2 }
 0x214   : > { %v6746_v51 = vadd.f32 %v2339_v41, %v2338_v40  ;;  %v1945_v19 = vadd.f32 %v1944_v50, %v6612_v36  ;;  %v1993_v52 = vpop.f32.mrf.mxu3  ;;  %v2342_v36 = vmul.f32 %v6623_v48, %v2252_v61  ;;  %v5021_v48 = vor.u32 %v5434_v25, %v5018_v28  ;;  %v5146_v40 = vld [vmem:[#allocation18 + $0x1b8] sm:$0xf0] }
 0x215   : > { %v2005_v58 = vpop.f32.mrf.mxu0 }
 0x216   : > { %v1994_v62 = vadd.f32 %v1993_v52, %v1945_v19  ;;  %v2006_v5 = vadd.f32 %v2005_v58, %v6744_v46  ;;  %v2054_v3 = vpop.f32.mrf.mxu1  ;;  %v5149_v52 = vor.u32 %v5466_v18, %v5146_v40  ;;  %3149 = vmatpush.bf16.msra.mxu2 %v5021_v48  ;;  %v5016_v58 = vld [vmem:[#allocation18 + $0xa8] sm:$0xf] }
 0x217   : > { %v5017_v61 = vor.u32 %v5436_v60, %v5016_v58  ;;  %v5462_v58 = vld [vmem:[#allocation18 + $0x18c] sm:$0xf] }
 0x218   : > { %v2253_v4 = vmax.f32 %v1994_v62, 0.0  ;;  %v2055_v8 = vadd.f32 %v2054_v3, %v2006_v5  ;;  %2861 = vmatmul.bf16.vlgmr.msrb.gmra.mxu0 %v6480_v44  ;;  %2959 = vmatmul.bf16.vlgmr.msrb.gmra.mxu2 %v6480_v44 }
 0x219   : > { %2910 = vmatmul.bf16.vlgmr.msrb.gmra.mxu1 %v6482_v45  ;;  %3008 = vmatmul.bf16.vlgmr.msrb.gmra.mxu3 %v6482_v45 }
 0x21a   : > { %v2343_v14 = vmul.f32 %v6626_v49, %v2253_v4  ;;  %v2194_v15 = vmax.f32 %v2055_v8, 0.0  ;;  %3198 = vmatpush.bf16.msra.mxu3 %v5149_v52  ;;  %3051 = vmatpush.bf16.msra.mxu0 %v5017_v61 }
 0x21b   : > { %v2103_v17 = vpop.f32.mrf.mxu2 }
 0x21c   : > { %v2104_v20 = vadd.f32 %v2103_v17, %v6753_v2  ;;  %v2152_v21 = vpop.f32.mrf.mxu3  ;;  %v6763_v29 = vadd.f32 %v2343_v14, %v2342_v36  ;;  %v2284_v49 = vmul.f32 %v6760_v16, %v2194_v15  ;;  %v5144_v14 = vld [vmem:[#allocation18 + $0x1a8] sm:$0xf]  ;;  %v5468_v15 = vld [vmem:[#allocation18 + $0x1b4] sm:$0xf0] }
 0x21d   : > { %v2007_v30 = vpop.f32.mrf.mxu0 }
 0x21e   : > { %v2153_v41 = vadd.f32 %v2152_v21, %v2104_v20  ;;  %v2008_v50 = vadd.f32 %v2007_v30, %v6744_v46  ;;  %v2056_v19 = vpop.f32.mrf.mxu1  ;;  %v2347_v5 = vadd.f32 %v6632_v6, %v2284_v49  ;;  %v5145_v20 = vor.u32 %v5468_v15, %v5144_v14 }
 0x220   : > { %v2195_v53 = vmax.f32 %v2153_v41, 0.0  ;;  %v2057_v54 = vadd.f32 %v2056_v19, %v2008_v50  ;;  %3100 = vmatpush.bf16.msra.mxu1 %v5145_v20  ;;  %v5000_v20 = vld [vmem:[#allocation18 + $0x88] sm:$0xf] }
 0x222   : > { %v2198_v62 = vmax.f32 %v2057_v54, 0.0  ;;  %v2285_v37 = vmul.f32 %v6766_v35, %v2195_v53  ;;  %v5430_v53 = vld [vmem:[#allocation18 + $0x8c] sm:$0xf]  ;;  %v5002_v54 = vld [vmem:[#allocation18 + $0x98] sm:$0xf0] }
 0x223   : > { %v2105_v3 = vpop.f32.mrf.mxu2  ;;  %v5005_v61 = vor.u32 %v5430_v53, %v5002_v54 }
 0x224   : > { %v2106_v4 = vadd.f32 %v2105_v3, %v6753_v2  ;;  %v2154_v8 = vpop.f32.mrf.mxu3  ;;  %v2348_v36 = vadd.f32 %v2347_v5, %v2285_v37  ;;  %v2288_v21 = vmul.f32 %v6760_v16, %v2198_v62  ;;  %v5130_v62 = vld [vmem:[#allocation18 + $0x198] sm:$0xf0] }
 0x225   : > { %v2010_v17 = vpop.f32.mrf.mxu0  ;;  %3150 = vmatpush.bf16.msra.mxu2 %v5005_v61 }
 0x226   : > { %v2155_v25 = vadd.f32 %v2154_v8, %v2106_v4  ;;  %v2011_v28 = vadd.f32 %v2010_v17, %v6744_v46  ;;  %v2059_v18 = vpop.f32.mrf.mxu1  ;;  %2349 = vadd.xlane.f32.xlu0 %v2348_v36  ;;  %v2352_v49 = vadd.f32 %v6642_v39, %v2288_v21  ;;  %v5133_v8 = vor.u32 %v5462_v58, %v5130_v62  ;;  %v5432_v21 = vld [vmem:[#allocation18 + $0x94] sm:$0xf0] }
 0x228   : > { %v2199_v30 = vmax.f32 %v2155_v25, 0.0  ;;  %v2060_v6 = vadd.f32 %v2059_v18, %v2011_v28  ;;  %2866 = vmatmul.bf16.gmra.mxu0 %v6496_v26  ;;  %2964 = vmatmul.bf16.gmra.mxu2 %v6496_v26  ;;  %v5001_v28 = vor.u32 %v5432_v21, %v5000_v20 }
 0x229   : > { %2915 = vmatmul.bf16.gmra.mxu1 %v6498_v27  ;;  %3013 = vmatmul.bf16.gmra.mxu3 %v6498_v27 }
 0x22a   : > { %v2202_v48 = vmax.f32 %v2060_v6, 0.0  ;;  %v2289_v40 = vmul.f32 %v6766_v35, %v2199_v30  ;;  %3199 = vmatpush.bf16.msra.mxu3 %v5133_v8  ;;  %3052 = vmatpush.bf16.msra.mxu0 %v5001_v28  ;;  %v4986_v8 = vld [vmem:[#allocation18 + $0x78] sm:$0xf0] }
 0x22b   : > { %v2108_v41 = vpop.f32.mrf.mxu2 }
 0x22c   : > { %v2109_v50 = vadd.f32 %v2108_v41, %v6753_v2  ;;  %v2157_v19 = vpop.f32.mrf.mxu3  ;;  %v2353_v52 = vadd.f32 %v2352_v49, %v2289_v40  ;;  %v2292_v37 = vmul.f32 %v6760_v16, %v2202_v48  ;;  %v5128_v48 = vld [vmem:[#allocation18 + $0x188] sm:$0xf]  ;;  %v5464_v40 = vld [vmem:[#allocation18 + $0x194] sm:$0xf0] }
 0x22d   : > { %v2012_v60 = vpop.f32.mrf.mxu0  ;;  %v5129_v41 = vor.u32 %v5464_v40, %v5128_v48  ;;  %v4984_v40 = vld [vmem:[#allocation18 + $0x68] sm:$0xf] }
 0x22e   : > { %v2158_v5 = vadd.f32 %v2157_v19, %v2109_v50  ;;  %v2013_v3 = vadd.f32 %v2012_v60, %v6744_v46  ;;  %v2061_v4 = vpop.f32.mrf.mxu1  ;;  %2354 = vadd.xlane.f32.xlu0 %v2353_v52  ;;  %v2357_v17 = vadd.f32 %v6648_v0, %v2292_v37 }
 0x22f   : > { %3101 = vmatpush.bf16.msra.mxu1 %v5129_v41 }
 0x230   : > { %v2203_v39 = vmax.f32 %v2158_v5, 0.0  ;;  %v2062_v36 = vadd.f32 %v2061_v4, %v2013_v3  ;;  %v5426_v4 = vld [vmem:[#allocation18 + $0x6c] sm:$0xf] }
 0x232   : > { %v2206_v14 = vmax.f32 %v2062_v36, 0.0  ;;  %v2293_v15 = vmul.f32 %v6766_v35, %v2203_v39  ;;  %v5458_v39 = vld [vmem:[#allocation18 + $0x16c] sm:$0xf] }
 0x233   : > { %v2110_v25 = vpop.f32.mrf.mxu2 }
 0x234   : > { %v2111_v18 = vadd.f32 %v2110_v25, %v6753_v2  ;;  %v2159_v30 = vpop.f32.mrf.mxu3  ;;  %v2358_v6 = vadd.f32 %v2357_v17, %v2293_v15  ;;  %v2296_v50 = vmul.f32 %v6760_v16, %v2206_v14  ;;  %v4989_v14 = vor.u32 %v5426_v4, %v4986_v8  ;;  %v5114_v15 = vld [vmem:[#allocation18 + $0x178] sm:$0xf0] }
 0x235   : > { %v2015_v49 = vpop.f32.mrf.mxu0  ;;  %v5117_v28 = vor.u32 %v5458_v39, %v5114_v15 }
 0x236   : > { %v2160_v19 = vadd.f32 %v2159_v30, %v2111_v18  ;;  %v2016_v52 = vadd.f32 %v2015_v49, %v6744_v46  ;;  %v2064_v53 = vpop.f32.mrf.mxu1  ;;  %2359 = vadd.xlane.f32.xlu1 %v2358_v6  ;;  %v2362_v61 = vadd.f32 %v6658_v34, %v2296_v50  ;;  %3151 = vmatpush.bf16.msra.mxu2 %v4989_v14  ;;  %v5428_v49 = vld [vmem:[#allocation18 + $0x74] sm:$0xf0] }
 0x237   : > { %3200 = vmatpush.bf16.msra.mxu3 %v5117_v28  ;;  %v4985_v50 = vor.u32 %v5428_v49, %v4984_v40 }
 0x238   : > { %v2207_v0 = vmax.f32 %v2160_v19, 0.0  ;;  %v2065_v54 = vadd.f32 %v2064_v53, %v2016_v52  ;;  %2871 = vmatmul.bf16.gmra.mxu0 %v6512_v10  ;;  %2969 = vmatmul.bf16.gmra.mxu2 %v6512_v10 }
 0x239   : > { %2920 = vmatmul.bf16.gmra.mxu1 %v6514_v11  ;;  %3018 = vmatmul.bf16.gmra.mxu3 %v6514_v11 }
 0x23a   : > { %v2210_v58 = vmax.f32 %v2065_v54, 0.0  ;;  %v2297_v60 = vmul.f32 %v6766_v35, %v2207_v0  ;;  %v5112_v0 = vld [vmem:[#allocation18 + $0x168] sm:$0xf]  ;;  %v5460_v54 = vld [vmem:[#allocation18 + $0x174] sm:$0xf0]  ;;  %3053 = vmatpush.bf16.msra.mxu0 %v4985_v50 }
 0x23b   : > { %v2113_v62 = vpop.f32.mrf.mxu2 }
 0x23c   : > { %v2114_v37 = vadd.f32 %v2113_v62, %v6753_v2  ;;  %v2162_v5 = vpop.f32.mrf.mxu3  ;;  %v2363_v3 = vadd.f32 %v2362_v61, %v2297_v60  ;;  %v2300_v17 = vmul.f32 %v6760_v16, %v2210_v58  ;;  %v5113_v60 = vor.u32 %v5460_v54, %v5112_v0  ;;  %v5424_v0 = vld [vmem:[#allocation18 + $0x54] sm:$0xf0] }
 0x23d   : > { %v2017_v36 = vpop.f32.mrf.mxu0 }
 0x23e   : > { %v2163_v20 = vadd.f32 %v2162_v5, %v2114_v37  ;;  %v2018_v21 = vadd.f32 %v2017_v36, %v6744_v46  ;;  %v2066_v25 = vpop.f32.mrf.mxu1  ;;  %2364 = vadd.xlane.f32.xlu1 %v2363_v3  ;;  %v2367_v48 = vadd.f32 %v6664_v63, %v2300_v17  ;;  %3102 = vmatpush.bf16.msra.mxu1 %v5113_v60 }
 0x240   : > { %v2211_v34 = vmax.f32 %v2163_v20, 0.0  ;;  %v2067_v18 = vadd.f32 %v2066_v25, %v2018_v21  ;;  %v5422_v20 = vld [vmem:[#allocation18 + $0x4c] sm:$0xf]  ;;  %v4970_v21 = vld [vmem:[#allocation18 + $0x58] sm:$0xf0] }
 0x241   : > { %v5454_v25 = vld [vmem:[#allocation18 + $0x14c] sm:$0xf] }
 0x242   : > { %v2214_v30 = vmax.f32 %v2067_v18, 0.0  ;;  %v2301_v6 = vmul.f32 %v6766_v35, %v2211_v34  ;;  %v4973_v34 = vor.u32 %v5422_v20, %v4970_v21  ;;  %v5098_v18 = vld [vmem:[#allocation18 + $0x158] sm:$0xf0] }
 0x243   : > { %v2115_v41 = vpop.f32.mrf.mxu2  ;;  %v5101_v49 = vor.u32 %v5454_v25, %v5098_v18  ;;  %v5418_v18 = vld [vmem:[#allocation18 + $0x2c] sm:$0xf] }
 0x244   : > { %v2116_v19 = vadd.f32 %v2115_v41, %v6753_v2  ;;  %v2164_v52 = vpop.f32.mrf.mxu3  ;;  %v2368_v53 = vadd.f32 %v2367_v48, %v2301_v6  ;;  %v2304_v61 = vmul.f32 %v6760_v16, %v2214_v30  ;;  %3152 = vmatpush.bf16.msra.mxu2 %v4973_v34 }
 0x245   : > { %v2020_v58 = vpop.f32.mrf.mxu0  ;;  %3201 = vmatpush.bf16.msra.mxu3 %v5101_v49  ;;  %v5082_v49 = vld [vmem:[#allocation18 + $0x138] sm:$0xf0] }
 0x246   : > { %v2165_v62 = vadd.f32 %v2164_v52, %v2116_v19  ;;  %v2021_v37 = vadd.f32 %v2020_v58, %v6744_v46  ;;  %v2069_v5 = vpop.f32.mrf.mxu1  ;;  %2369 = vadd.xlane.f32.xlu2 %v2368_v53  ;;  %v2372_v39 = vadd.f32 %v6674_v31, %v2304_v61  ;;  %v4968_v53 = vld [vmem:[#allocation18 + $0x48] sm:$0xf] }
 0x247   : > { %v4969_v58 = vor.u32 %v5424_v0, %v4968_v53 }
 0x248   : > { %v2215_v63 = vmax.f32 %v2165_v62, 0.0  ;;  %v2070_v3 = vadd.f32 %v2069_v5, %v2021_v37  ;;  %2876 = vmatmul.bf16.gmra.mxu0 %v6528_v56  ;;  %2974 = vmatmul.bf16.gmra.mxu2 %v6528_v56  ;;  %v5096_v37 = vld [vmem:[#allocation18 + $0x148] sm:$0xf]  ;;  %v5456_v5 = vld [vmem:[#allocation18 + $0x154] sm:$0xf0] }
 0x249   : > { %2925 = vmatmul.bf16.gmra.mxu1 %v6530_v57  ;;  %3023 = vmatmul.bf16.gmra.mxu3 %v6530_v57 }
 0x24a   : > { %v2218_v4 = vmax.f32 %v2070_v3, 0.0  ;;  %v2305_v8 = vmul.f32 %v6766_v35, %v2215_v63  ;;  %3054 = vmatpush.bf16.msra.mxu0 %v4969_v58  ;;  %v5097_v3 = vor.u32 %v5456_v5, %v5096_v37 }
 0x24b   : > { %v2118_v36 = vpop.f32.mrf.mxu2 }
 0x24c   : > { %v2119_v14 = vadd.f32 %v2118_v36, %v6753_v2  ;;  %v2167_v15 = vpop.f32.mrf.mxu3  ;;  %v2373_v17 = vadd.f32 %v2372_v39, %v2305_v8  ;;  %v2308_v30 = vmul.f32 %v6760_v16, %v2218_v4  ;;  %3103 = vmatpush.bf16.msra.mxu1 %v5097_v3 }
 0x24d   : > { %v2022_v28 = vpop.f32.mrf.mxu0 }
 0x24e   : > { %v2168_v6 = vadd.f32 %v2167_v15, %v2119_v14  ;;  %v2023_v48 = vadd.f32 %v2022_v28, %v6744_v46  ;;  %v2071_v40 = vpop.f32.mrf.mxu1  ;;  %2374 = vadd.xlane.f32.xlu2 %v2373_v17  ;;  %v2377_v52 = vadd.f32 %v6679_v59, %v2308_v30  ;;  %v4954_v30 = vld [vmem:[#allocation18 + $0x38] sm:$0xf0] }
 0x250   : > { %v2219_v31 = vmax.f32 %v2168_v6, 0.0  ;;  %v2072_v41 = vadd.f32 %v2071_v40, %v2023_v48  ;;  %v5450_v6 = vld [vmem:[#allocation18 + $0x12c] sm:$0xf]  ;;  %v4957_v40 = vor.u32 %v5418_v18, %v4954_v30 }
 0x252   : > { %v2309_v50 = vmul.f32 %v6766_v35, %v2219_v31  ;;  %v2222_v19 = vmax.f32 %v2072_v41, 0.0  ;;  %3153 = vmatpush.bf16.msra.mxu2 %v4957_v40  ;;  %v4938_v40 = vld [vmem:[#allocation18 + $0x18] sm:$0xf0] }
 0x253   : > { %v2120_v54 = vpop.f32.mrf.mxu2 }
 0x254   : > { %v2121_v60 = vadd.f32 %v2120_v54, %v6753_v2  ;;  %v2169_v61 = vpop.f32.mrf.mxu3  ;;  %v2378_v62 = vadd.f32 %v2377_v52, %v2309_v50  ;;  %v2312_v4 = vmul.f32 %v6760_v16, %v2222_v19  ;;  %v5085_v52 = vor.u32 %v5450_v6, %v5082_v49  ;;  %v5446_v49 = vld [vmem:[#allocation18 + $0x10c] sm:$0xf] }
 0x255   : > { %v2025_v63 = vpop.f32.mrf.mxu0 }
 0x256   : > { %v2170_v8 = vadd.f32 %v2169_v61, %v2121_v60  ;;  %v2026_v39 = vadd.f32 %v2025_v63, %v6744_v46  ;;  %v2074_v36 = vpop.f32.mrf.mxu1  ;;  %2379 = vadd.xlane.f32.xlu0 %v2378_v62  ;;  %v2382_v20 = vadd.f32 %v6690_v38, %v2312_v4  ;;  %3202 = vmatpush.bf16.msra.mxu3 %v5085_v52  ;;  %v4952_v60 = vld [vmem:[#allocation18 + $0x28] sm:$0xf]  ;;  %v5420_v61 = vld [vmem:[#allocation18 + $0x34] sm:$0xf0] }
 0x257   : > { %v4953_v37 = vor.u32 %v5420_v61, %v4952_v60  ;;  %v5080_v4 = vld [vmem:[#allocation18 + $0x128] sm:$0xf] }
 0x258   : > { %v2223_v59 = vmax.f32 %v2170_v8, 0.0  ;;  %v2075_v14 = vadd.f32 %v2074_v36, %v2026_v39  ;;  %2881 = vmatmul.bf16.gmra.mxu0 %v6544_v42  ;;  %2979 = vmatmul.bf16.gmra.mxu2 %v6544_v42  ;;  %v5452_v8 = vld [vmem:[#allocation18 + $0x134] sm:$0xf0] }
 0x259   : > { %2930 = vmatmul.bf16.gmra.mxu1 %v6546_v43  ;;  %3028 = vmatmul.bf16.gmra.mxu3 %v6546_v43  ;;  %v5081_v36 = vor.u32 %v5452_v8, %v5080_v4  ;;  %v5448_v4 = vld [vmem:[#allocation18 + $0x114] sm:$0xf0] }
 0x25a   : > { %v2226_v15 = vmax.f32 %v2075_v14, 0.0  ;;  %v2313_v17 = vmul.f32 %v6766_v35, %v2223_v59  ;;  %3055 = vmatpush.bf16.msra.mxu0 %v4953_v37  ;;  %v5416_v37 = vld [vmem:[#allocation18 + $0x14] sm:$0xf0] }
 0x25b   : > { %v2123_v21 = vpop.f32.mrf.mxu2  ;;  %3104 = vmatpush.bf16.msra.mxu1 %v5081_v36 }
 0x25c   : > { %v2124_v25 = vadd.f32 %v2123_v21, %v6753_v2  ;;  %v2172_v28 = vpop.f32.mrf.mxu3  ;;  %v2383_v34 = vadd.f32 %v2382_v20, %v2313_v17  ;;  %v2316_v31 = vmul.f32 %v6760_v16, %v2226_v15 }
 0x25d   : > { %v2027_v48 = vpop.f32.mrf.mxu0 }
 0x25e   : > { %v2173_v41 = vadd.f32 %v2172_v28, %v2124_v25  ;;  %v2028_v50 = vadd.f32 %v2027_v48, %v6744_v46  ;;  %v2076_v19 = vpop.f32.mrf.mxu1  ;;  %2384 = vadd.xlane.f32.xlu1 %v2383_v34  ;;  %v2387_v58 = vadd.f32 %v6695_v1, %v2316_v31  ;;  %v5414_v48 = vld [vmem:[#allocation18 + $0xc] sm:$0xf] }
 0x260   : > { %v2227_v38 = vmax.f32 %v2173_v41, 0.0  ;;  %v2077_v53 = vadd.f32 %v2076_v19, %v2028_v50  ;;  %v4941_v41 = vor.u32 %v5414_v48, %v4938_v40  ;;  %v5066_v50 = vld [vmem:[#allocation18 + $0x118] sm:$0xf0] }
 0x262   : > { %v2317_v0 = vmul.f32 %v6766_v35, %v2227_v38  ;;  %v2230_v54 = vmax.f32 %v2077_v53, 0.0  ;;  %3154 = vmatpush.bf16.msra.mxu2 %v4941_v41 }
 0x263   : > { %v2125_v62 = vpop.f32.mrf.mxu2 }
 0x264   : > { %v2126_v5 = vadd.f32 %v2125_v62, %v6753_v2  ;;  %v2174_v63 = vpop.f32.mrf.mxu3  ;;  %v2388_v3 = vadd.f32 %v2387_v58, %v2317_v0  ;;  %v2320_v59 = vmul.f32 %v6760_v16, %v2230_v54  ;;  %v5069_v0 = vor.u32 %v5446_v49, %v5066_v50  ;;  %v4936_v62 = vld [vmem:[#allocation18 + $0x8] sm:$0xf] }
 0x265   : > { %v2030_v39 = vpop.f32.mrf.mxu0 }
 0x266   : > { %v2175_v14 = vadd.f32 %v2174_v63, %v2126_v5  ;;  %v2031_v15 = vadd.f32 %v2030_v39, %v6744_v46  ;;  %v2079_v17 = vpop.f32.mrf.mxu1  ;;  %2389 = vadd.xlane.f32.xlu2 %v2388_v3  ;;  %v2392_v28 = vadd.f32 %v6706_v47, %v2320_v59  ;;  %3203 = vmatpush.bf16.msra.mxu3 %v5069_v0  ;;  %v5064_v3 = vld [vmem:[#allocation18 + $0x108] sm:$0xf] }
 0x267   : > { %v4937_v63 = vor.u32 %v5416_v37, %v4936_v62  ;;  %v5065_v59 = vor.u32 %v5448_v4, %v5064_v3 }
 0x268   : > { %v2231_v1 = vmax.f32 %v2175_v14, 0.0  ;;  %v2080_v20 = vadd.f32 %v2079_v17, %v2031_v15  ;;  %2886 = vmatmul.bf16.gmra.mxu0 %v6560_v32  ;;  %2984 = vmatmul.bf16.gmra.mxu2 %v6560_v32  ;;  %v6159_v14 = vmov 0.0  }
 0x269   : > { %2935 = vmatmul.bf16.gmra.mxu1 %v6562_v33  ;;  %3033 = vmatmul.bf16.gmra.mxu3 %v6562_v33  ;;  %1326 = vst.msk [vmem:[#allocation3] sm:$0xff] %vm1325_vm0, %v6159_v14 }
 0x26a   : > { %v2234_v21 = vmax.f32 %v2080_v20, 0.0  ;;  %v2321_v25 = vmul.f32 %v6766_v35, %v2231_v1  ;;  %3056 = vmatpush.bf16.msra.mxu0 %v4937_v63  ;;  %1327 = vst.msk [vmem:[#allocation3 + $0x8] sm:$0xff] %vm1325_vm0, %v6159_v14  ;;  %3105 = vmatpush.bf16.msra.mxu1 %v5065_v59 }
 0x26b   : > { %v2128_v34 = vpop.f32.mrf.mxu2  ;;  %1328 = vst.msk [vmem:[#allocation3 + $0x10] sm:$0xff] %vm1325_vm0, %v6159_v14 }
 0x26c   : > { %v2129_v18 = vadd.f32 %v2128_v34, %v6753_v2  ;;  %v2177_v30 = vpop.f32.mrf.mxu3  ;;  %v2393_v6 = vadd.f32 %v2392_v28, %v2321_v25  ;;  %v2324_v19 = vmul.f32 %v6760_v16, %v2234_v21  ;;  %1329 = vst.msk [vmem:[#allocation3 + $0x18] sm:$0xff] %vm1325_vm0, %v6159_v14 }
 0x26d   : > { %v2032_v31 = vpop.f32.mrf.mxu0  ;;  %1330 = vst.msk [vmem:[#allocation3 + $0x20] sm:$0xff] %vm1325_vm0, %v6159_v14 }
 0x26e   : > { %v2178_v52 = vadd.f32 %v2177_v30, %v2129_v18  ;;  %v2033_v38 = vadd.f32 %v2032_v31, %v6744_v46  ;;  %v2081_v53 = vpop.f32.mrf.mxu1  ;;  %2394 = vadd.xlane.f32.xlu0 %v2393_v6  ;;  %v2397_v61 = vadd.f32 %v6711_v13, %v2324_v19  ;;  %1331 = vst.msk [vmem:[#allocation3 + $0x28] sm:$0xff] %vm1325_vm0, %v6159_v14 }
 0x26f   : > { %1332 = vst.msk [vmem:[#allocation3 + $0x30] sm:$0xff] %vm1325_vm0, %v6159_v14 }
 0x270   : > { %v2235_v47 = vmax.f32 %v2178_v52, 0.0  ;;  %v2082_v54 = vadd.f32 %v2081_v53, %v2033_v38  ;;  %1333 = vst.msk [vmem:[#allocation3 + $0x38] sm:$0xff] %vm1325_vm0, %v6159_v14 }
 0x271   : > { %1334 = vst.msk [vmem:[#allocation3 + $0x40] sm:$0xff] %vm1325_vm0, %v6159_v14 }
 0x272   : > { %v2325_v58 = vmul.f32 %v6766_v35, %v2235_v47  ;;  %v2238_v60 = vmax.f32 %v2082_v54, 0.0  ;;  %1335 = vst.msk [vmem:[#allocation3 + $0x48] sm:$0xff] %vm1325_vm0, %v6159_v14 }
 0x273   : > { %v2130_v5 = vpop.f32.mrf.mxu2  ;;  %1336 = vst.msk [vmem:[#allocation3 + $0x50] sm:$0xff] %vm1325_vm0, %v6159_v14 }
 0x274   : > { %v2131_v8 = vadd.f32 %v2130_v5, %v6753_v2  ;;  %v2179_v39 = vpop.f32.mrf.mxu3  ;;  %v2398_v36 = vadd.f32 %v2397_v61, %v2325_v58  ;;  %v2328_v13 = vmul.f32 %v6760_v16, %v2238_v60  ;;  %1337 = vst.msk [vmem:[#allocation3 + $0x58] sm:$0xff] %vm1325_vm0, %v6159_v14 }
 0x275   : > { %v2035_v15 = vpop.f32.mrf.mxu0  ;;  %1338 = vst.msk [vmem:[#allocation3 + $0x60] sm:$0xff] %vm1325_vm0, %v6159_v14 }
 0x276   : > { %v2180_v17 = vadd.f32 %v2179_v39, %v2131_v8  ;;  %v2036_v1 = vadd.f32 %v2035_v15, %v6744_v46  ;;  %v2084_v20 = vpop.f32.mrf.mxu1  ;;  %2399 = vadd.xlane.f32.xlu1 %v2398_v36  ;;  %v2402_v18 = vadd.f32 %v6722_v55, %v2328_v13  ;;  %1339 = vst.msk [vmem:[#allocation3 + $0x68] sm:$0xff] %vm1325_vm0, %v6159_v14  ;;  %v5500_v13 = vld [vmem:[#allocation21 + $0xb8] sm:$0xff] }
 0x277   : > { %1340 = vst.msk [vmem:[#allocation3 + $0x70] sm:$0xff] %vm1325_vm0, %v6159_v14  ;;  %3711 = vmatpush.bf16.msrb.mxu2 %v5500_v13 }
 0x278   : > { %v2239_v21 = vmax.f32 %v2180_v17, 0.0  ;;  %v2085_v25 = vadd.f32 %v2084_v20, %v2036_v1  ;;  %2891 = vmatmul.bf16.gmra.mxu0 %v6576_v22  ;;  %2989 = vmatmul.bf16.gmra.mxu2 %v6576_v22  ;;  %1341 = vst.msk [vmem:[#allocation3 + $0x78] sm:$0xff] %vm1325_vm0, %v6159_v14 }
 0x279   : > { %2940 = vmatmul.bf16.gmra.mxu1 %v6578_v23  ;;  %3038 = vmatmul.bf16.gmra.mxu3 %v6578_v23 }
 0x27a   : > { %v2242_v28 = vmax.f32 %v2085_v25, 0.0  ;;  %v2329_v34 = vmul.f32 %v6766_v35, %v2239_v21 }
 0x27b   : > { %v2133_v30 = vpop.f32.mrf.mxu2 }
 0x27c   : > { %v2134_v6 = vadd.f32 %v2133_v30, %v6753_v2  ;;  %v2182_v48 = vpop.f32.mrf.mxu3  ;;  %v2403_v40 = vadd.f32 %v2402_v18, %v2329_v34  ;;  %v2332_v31 = vmul.f32 %v6760_v16, %v2242_v28  ;;  %v6884_v28 = vld [vmem:[#allocation20] sm:$0xf] }
 0x27d   : > { %v2037_v49 = vpop.f32.mrf.mxu0 }
 0x27e   : > { %v2183_v41 = vadd.f32 %v2182_v48, %v2134_v6  ;;  %v2038_v50 = vadd.f32 %v2037_v49, %v6744_v46  ;;  %v2086_v55 = vpop.f32.mrf.mxu1  ;;  %2404 = vadd.xlane.f32.xlu2 %v2403_v40  ;;  %v2407_v0 = vadd.f32 %v6727_v24, %v2332_v31  ;;  %v6888_v48 = vperm.slane %v6884_v28, 0  ;;  %v5484_v49 = vld [vmem:[#allocation21 + $0x38] sm:$0xff] }
 0x27f   : > { %v5492_v31 = vld [vmem:[#allocation21 + $0x78] sm:$0xff]  ;;  %3613 = vmatpush.bf16.msrb.mxu0 %v5484_v49 }
 0x280   : > { %v2243_v19 = vmax.f32 %v2183_v41, 0.0  ;;  %v2087_v52 = vadd.f32 %v2086_v55, %v2038_v50  ;;  %3662 = vmatpush.bf16.msrb.mxu1 %v5492_v31 }
 0x282   : > { %v2333_v38 = vmul.f32 %v6766_v35, %v2243_v19  ;;  %v2246_v53 = vmax.f32 %v2087_v52, 0.0 }
 0x283   : > { %v2135_v47 = vpop.f32.mrf.mxu2 }
 0x284   : > { %v2136_v54 = vadd.f32 %v2135_v47, %v6753_v2  ;;  %v2184_v58 = vpop.f32.mrf.mxu3  ;;  %v2408_v60 = vadd.f32 %v2407_v0, %v2333_v38  ;;  %v2336_v62 = vmul.f32 %v6760_v16, %v2246_v53  ;;  %v2256_v47 = vld [vmem:[#allocation3] sm:$0xff] }
 0x285   : > { %v2040_v61 = vpop.f32.mrf.mxu0 }
 0x286   : > { %v2185_v37 = vadd.f32 %v2184_v58, %v2136_v54  ;;  %v2041_v5 = vadd.f32 %v2040_v61, %v6744_v46  ;;  %v2089_v63 = vpop.f32.mrf.mxu1  ;;  %2409 = vadd.xlane.f32.xlu0 %v2408_v60  ;;  %v2412_v39 = vadd.f32 %v6738_v7, %v2336_v62  ;;  %v5508_v7 = vld [vmem:[#allocation21 + $0xf8] sm:$0xff]  ;;  %v6160_v62 = vmov 0  }
 0x287   : > { %3760 = vmatpush.bf16.msrb.mxu3 %v5508_v7  ;;  %5668 = vset.pattern.permute.xlu2 %v6160_v62 }
 0x288   : > { %v2247_v3 = vmax.f32 %v2185_v37, 0.0  ;;  %v2090_v4 = vadd.f32 %v2089_v63, %v2041_v5  ;;  %2896 = vmatmul.bf16.gmra.mxu0 %v6592_v9  ;;  %2994 = vmatmul.bf16.gmra.mxu2 %v6592_v9 }
 0x289   : > { %2945 = vmatmul.bf16.gmra.mxu1 %v6594_v12  ;;  %3043 = vmatmul.bf16.gmra.mxu3 %v6594_v12 }
 0x28a   : > { %v2250_v24 = vmax.f32 %v2090_v4, 0.0  ;;  %v2337_v8 = vmul.f32 %v6766_v35, %v2247_v3  ;;  %5669 = vset.pattern.permute.xlu1 %v6160_v62  ;;  %5670 = vset.pattern.permute.xlu0 %v6160_v62  ;;  %v5499_v3 = vld [vmem:[#allocation21 + $0xb0] sm:$0xff] }
 0x28b   : > { %v2138_v36 = vpop.f32.mrf.mxu2  ;;  %3712 = vmatpush.bf16.msrb.mxu2 %v5499_v3  ;;  %v5506_v3 = vld [vmem:[#allocation21 + $0xe8] sm:$0xff] }
 0x28c   : > { %v2139_v59 = vadd.f32 %v2138_v36, %v6753_v2  ;;  %v2187_v14 = vpop.f32.mrf.mxu3  ;;  %v2413_v15 = vadd.f32 %v2412_v39, %v2337_v8  ;;  %v2340_v1 = vmul.f32 %v6760_v16, %v2250_v24  ;;  %v5507_v39 = vld [vmem:[#allocation21 + $0xf0] sm:$0xff] }
 0x28d   : > { %v2042_v17 = vpop.f32.mrf.mxu0  ;;  %3761 = vmatpush.bf16.msrb.mxu3 %v5507_v39  ;;  %v5490_v39 = vld [vmem:[#allocation21 + $0x68] sm:$0xff] }
 0x28e   : > { %v2188_v20 = vadd.f32 %v2187_v14, %v2139_v59  ;;  %v2043_v21 = vadd.f32 %v2042_v17, %v6744_v46  ;;  %v2091_v25 = vpop.f32.mrf.mxu1  ;;  %2414 = vadd.xlane.f32.xlu1 %v2413_v15  ;;  %v2417_v40 = vadd.f32 %v6746_v51, %v2340_v1  ;;  %v6906_v59 = vstv %s3860_s3  ;;  %v5483_v17 = vld [vmem:[#allocation21 + $0x30] sm:$0xff] }
 0x28f   : > { %v5491_v1 = vld [vmem:[#allocation21 + $0x70] sm:$0xff]  ;;  %3614 = vmatpush.bf16.msrb.mxu0 %v5483_v17 }
 0x290   : > { %v2251_v34 = vmax.f32 %v2188_v20, 0.0  ;;  %v2092_v18 = vadd.f32 %v2091_v25, %v2043_v21  ;;  %3663 = vmatpush.bf16.msrb.mxu1 %v5491_v1 }
 0x291   : > { %3762 = vmatpush.bf16.msrb.mxu3 %v5506_v3 }
 0x292   : > { %v2341_v30 = vmul.f32 %v6766_v35, %v2251_v34  ;;  %v2254_v6 = vmax.f32 %v2092_v18, 0.0 }
 0x293   : > { %v2140_v46 = vpop.f32.mrf.mxu2 }
 0x294   : > { %v2141_v41 = vadd.f32 %v2140_v46, %v6753_v2  ;;  %v2189_v50 = vpop.f32.mrf.mxu3  ;;  %v2418_v55 = vadd.f32 %v2417_v40, %v2341_v30  ;;  %v2344_v52 = vmul.f32 %v6760_v16, %v2254_v6  ;;  %v6897_v2 = vperm.slane %v6884_v28, 1  ;;  %v2258_v46 = vld [vmem:[#allocation3 + $0x10] sm:$0xff]  ;;  %3664 = vmatpush.bf16.msrb.mxu1 %v5490_v39  ;;  %v5489_v39 = vld [vmem:[#allocation21 + $0x60] sm:$0xff] }
 0x295   : > { %v2862_v19 = vpop.f32.mrf.mxu0 }
 0x296   : > { %v2190_v38 = vadd.f32 %v2189_v50, %v2141_v41  ;;  %v2863_v53 = vadd.f32 %v2862_v19, %v6888_v48  ;;  %v2911_v0 = vpop.f32.mrf.mxu1  ;;  %2419 = vadd.xlane.f32.xlu2 %v2418_v55  ;;  %v2422_v61 = vadd.f32 %v6763_v29, %v2344_v52  ;;  %v2257_v29 = vld [vmem:[#allocation3 + $0x8] sm:$0xff] }
 0x298   : > { %v2255_v51 = vmax.f32 %v2190_v38, 0.0  ;;  %v2912_v54 = vadd.f32 %v2911_v0, %v2863_v53  ;;  %3057 = vmatmul.bf16.vlgmr.msra.gmra.mxu0 %v6480_v44  ;;  %3155 = vmatmul.bf16.vlgmr.msra.gmra.mxu2 %v6480_v44 }
 0x299   : > { %3106 = vmatmul.bf16.vlgmr.msra.gmra.mxu1 %v6482_v45  ;;  %3204 = vmatmul.bf16.vlgmr.msra.gmra.mxu3 %v6482_v45  ;;  %v2350_v16 = vpop.xlane.xlu0 %2349 }
 0x29a   : > { %v2426_v58 = vadd.f32 %v2350_v16, %v2256_v47  ;;  %v2345_v60 = vmul.f32 %v6766_v35, %v2255_v51  ;;  %v3245_v14 = vmax.f32 %v2912_v54, 0.0  ;;  %3665 = vmatpush.bf16.msrb.mxu1 %v5489_v39 }
 0x29b   : > { %v2960_v37 = vpop.f32.mrf.mxu2 }
 0x29c   : > { %2443 = vst.msk [vmem:[#allocation3] sm:$0xff] %vm1325_vm0, %v2426_v58  ;;  %v2961_v44 = vadd.f32 %v2960_v37, %v6897_v2  ;;  %v3009_v5 = vpop.f32.mrf.mxu3  ;;  %v2423_v63 = vadd.f32 %v2422_v61, %v2345_v60  ;;  %v2259_v37 = vld [vmem:[#allocation3 + $0x18] sm:$0xff] }
 0x29d   : > { %v2864_v45 = vpop.f32.mrf.mxu0 }
 0x29e   : > { %v3010_v4 = vadd.f32 %v3009_v5, %v2961_v44  ;;  %v2865_v24 = vadd.f32 %v2864_v45, %v6888_v48  ;;  %v2913_v8 = vpop.f32.mrf.mxu1  ;;  %2424 = vadd.xlane.f32.xlu0 %v2423_v63 }
 0x2a0   : > { %v2914_v35 = vadd.f32 %v2913_v8, %v2865_v24  ;;  %v3246_v41 = vmax.f32 %v3010_v4, 0.0 }
 0x2a1   : > { %v2355_v36 = vpop.xlane.xlu0 %2354 }
 0x2a2   : > { %v3249_v15 = vmax.f32 %v2914_v35, 0.0  ;;  %v2427_v13 = vadd.f32 %v2355_v36, %v2257_v29  ;;  %v5482_v35 = vld [vmem:[#allocation21 + $0x28] sm:$0xff] }
 0x2a3   : > { %v2962_v20 = vpop.f32.mrf.mxu2  ;;  %v3844_v21 = vld [vmem:[#allocation3] sm:$0xff]  ;;  %3615 = vmatpush.bf16.msrb.mxu0 %v5482_v35  ;;  %v5481_v35 = vld [vmem:[#allocation21 + $0x20] sm:$0xff] }
 0x2a4   : > { %v6908_v25 = vpack.c.bf16 %v3249_v15, %v3245_v14  ;;  %2444 = vst.msk [vmem:[#allocation3 + $0x8] sm:$0xff] %vm1325_vm0, %v2427_v13  ;;  %v2963_v34 = vadd.f32 %v2962_v20, %v6897_v2  ;;  %v3011_v18 = vpop.f32.mrf.mxu3  ;;  %v3862_v7 = vadd.f32 %v6906_v59, %v3844_v21 }
 0x2a5   : > { %v2867_v30 = vpop.f32.mrf.mxu0 }
 0x2a6   : > { %v3012_v6 = vadd.f32 %v3011_v18, %v2963_v34  ;;  %v2868_v40 = vadd.f32 %v2867_v30, %v6888_v48  ;;  %v2916_v49 = vpop.f32.mrf.mxu1  ;;  %v3878_v31 = vsub.f32 0.0, %v3862_v7  ;;  %v2260_v30 = vld [vmem:[#allocation3 + $0x20] sm:$0xff] }
 0x2a7   : > { %3616 = vmatpush.bf16.msrb.mxu0 %v5481_v35  ;;  %v5488_v35 = vld [vmem:[#allocation21 + $0x58] sm:$0xff] }
 0x2a8   : > { %v3250_v50 = vmax.f32 %v3012_v6, 0.0  ;;  %v2917_v55 = vadd.f32 %v2916_v49, %v2868_v40  ;;  %3062 = vmatmul.bf16.gmra.mxu0 %v6496_v26  ;;  %3160 = vmatmul.bf16.gmra.mxu2 %v6496_v26  ;;  %v3894_v19 = vmul.f32 1.442695, %v3878_v31  ;;  %v5498_v26 = vld [vmem:[#allocation21 + $0xa8] sm:$0xff] }
 0x2a9   : > { %3111 = vmatmul.bf16.gmra.mxu1 %v6498_v27  ;;  %3209 = vmatmul.bf16.gmra.mxu3 %v6498_v27  ;;  %v2360_v52 = vpop.xlane.xlu1 %2359 }
 0x2aa   : > { %v6918_v38 = vpack.c.bf16 %v3250_v50, %v3246_v41  ;;  %v2428_v53 = vadd.f32 %v2360_v52, %v2258_v46  ;;  %5672 = vpow2.f32 %v3894_v19  ;;  %3713 = vmatpush.bf16.msrb.mxu2 %v5498_v26  ;;  %v3253_v24 = vmax.f32 %v2917_v55, 0.0  ;;  %3666 = vmatpush.bf16.msrb.mxu1 %v5488_v35  ;;  %v5479_v35 = vld [vmem:[#allocation21 + $0x10] sm:$0xff] }
 0x2ab   : > { %v2965_v0 = vpop.f32.mrf.mxu2  ;;  %v3845_v47 = vld [vmem:[#allocation3 + $0x8] sm:$0xff] }
 0x2ac   : > { %2445 = vst.msk [vmem:[#allocation3 + $0x10] sm:$0xff] %vm1325_vm0, %v2428_v53  ;;  %v2966_v51 = vadd.f32 %v2965_v0, %v6897_v2  ;;  %v3014_v54 = vpop.f32.mrf.mxu3  ;;  %v3863_v16 = vadd.f32 %v6906_v59, %v3845_v47 }
 0x2ad   : > { %v2869_v58 = vpop.f32.mrf.mxu0 }
 0x2ae   : > { %v3015_v60 = vadd.f32 %v3014_v54, %v2966_v51  ;;  %v2870_v61 = vadd.f32 %v2869_v58, %v6888_v48  ;;  %v2918_v27 = vpop.f32.mrf.mxu1  ;;  %v3879_v62 = vsub.f32 0.0, %v3863_v16 }
 0x2b0   : > { %v5673_v44 = vpop.eup %5672  ;;  %v2919_v5 = vadd.f32 %v2918_v27, %v2870_v61  ;;  %v3896_v63 = vmul.f32 1.442695, %v3879_v62  ;;  %v3254_v41 = vmax.f32 %v3015_v60, 0.0  ;;  %v2261_v27 = vld [vmem:[#allocation3 + $0x28] sm:$0xff] }
 0x2b1   : > { %v2365_v45 = vpop.xlane.xlu1 %2364  ;;  %v3926_v4 = vadd.f32 1.0, %v5673_v44 }
 0x2b2   : > { %v3257_v8 = vmax.f32 %v2919_v5, 0.0  ;;  %v2429_v29 = vadd.f32 %v2365_v45, %v2259_v37  ;;  %5674 = vpow2.f32 %v3896_v63  ;;  %v5505_v5 = vld [vmem:[#allocation21 + $0xe0] sm:$0xff] }
 0x2b3   : > { %v2967_v36 = vpop.f32.mrf.mxu2  ;;  %5676 = vrcp.f32 %v3926_v4  ;;  %v3846_v14 = vld [vmem:[#allocation3 + $0x10] sm:$0xff]  ;;  %3763 = vmatpush.bf16.msrb.mxu3 %v5505_v5  ;;  %v5504_v5 = vld [vmem:[#allocation21 + $0xd8] sm:$0xff] }
 0x2b4   : > { %2446 = vst.msk [vmem:[#allocation3 + $0x18] sm:$0xff] %vm1325_vm0, %v2429_v29  ;;  %v2968_v15 = vadd.f32 %v2967_v36, %v6897_v2  ;;  %v3016_v13 = vpop.f32.mrf.mxu3  ;;  %v3864_v17 = vadd.f32 %v6906_v59, %v3846_v14  ;;  %v6927_v1 = vpack.c.bf16 %v3257_v8, %v3253_v24 }
 0x2b5   : > { %v2872_v20 = vpop.f32.mrf.mxu0 }
 0x2b6   : > { %v3017_v21 = vadd.f32 %v3016_v13, %v2968_v15  ;;  %v2873_v34 = vadd.f32 %v2872_v20, %v6888_v48  ;;  %v2921_v18 = vpop.f32.mrf.mxu1  ;;  %v3880_v7 = vsub.f32 0.0, %v3864_v17 }
 0x2b7   : > { %3764 = vmatpush.bf16.msrb.mxu3 %v5504_v5  ;;  %v5503_v5 = vld [vmem:[#allocation21 + $0xd0] sm:$0xff] }
 0x2b8   : > { %v5675_v6 = vpop.eup %5674  ;;  %v3258_v40 = vmax.f32 %v3017_v21, 0.0  ;;  %v2922_v49 = vadd.f32 %v2921_v18, %v2873_v34  ;;  %3067 = vmatmul.bf16.gmra.mxu0 %v6512_v10  ;;  %3165 = vmatmul.bf16.gmra.mxu2 %v6512_v10  ;;  %v3898_v31 = vmul.f32 1.442695, %v3880_v7 }
 0x2b9   : > { %v5677_v46 = vpop.eup %5676  ;;  %3116 = vmatmul.bf16.gmra.mxu1 %v6514_v11  ;;  %3214 = vmatmul.bf16.gmra.mxu3 %v6514_v11  ;;  %v2370_v50 = vpop.xlane.xlu2 %2369  ;;  %v3927_v55 = vadd.f32 1.0, %v5675_v6  ;;  %v5497_v11 = vld [vmem:[#allocation21 + $0xa0] sm:$0xff]  ;;  %v2262_v6 = vld [vmem:[#allocation3 + $0x30] sm:$0xff] }
 0x2ba   : > { %v2430_v19 = vadd.f32 %v2370_v50, %v2260_v30  ;;  %4156 = vperm.xlu2 %5668, %v5677_v46   ;;  %v3994_v52 = vsub.f32 1.0, %v5677_v46  ;;  %5678 = vpow2.f32 %v3898_v31  ;;  %v6934_v47 = vpack.c.bf16 %v3258_v40, %v3254_v41  ;;  %3714 = vmatpush.bf16.msrb.mxu2 %v5497_v11  ;;  %v5496_v11 = vld [vmem:[#allocation21 + $0x98] sm:$0xff] }
 0x2bb   : > { %v2970_v53 = vpop.f32.mrf.mxu2  ;;  %5680 = vrcp.f32 %v3927_v55  ;;  %v3847_v0 = vld [vmem:[#allocation3 + $0x18] sm:$0xff]  ;;  %v3261_v3 = vmax.f32 %v2922_v49, 0.0  ;;  %3765 = vmatpush.bf16.msrb.mxu3 %v5503_v5 }
 0x2bc   : > { %2447 = vst.msk [vmem:[#allocation3 + $0x20] sm:$0xff] %vm1325_vm0, %v2430_v19  ;;  %v2971_v10 = vadd.f32 %v2970_v53, %v6897_v2  ;;  %v3019_v51 = vpop.f32.mrf.mxu3  ;;  %4028 = vperm.xlu1 %5669, %v3994_v52   ;;  %v3865_v54 = vadd.f32 %v6906_v59, %v3847_v0 }
 0x2bd   : > { %v2874_v16 = vpop.f32.mrf.mxu0 }
 0x2be   : > { %v3020_v26 = vadd.f32 %v3019_v51, %v2971_v10  ;;  %v2875_v58 = vadd.f32 %v2874_v16, %v6888_v48  ;;  %v2923_v60 = vpop.f32.mrf.mxu1  ;;  %v3881_v61 = vsub.f32 0.0, %v3865_v54  ;;  %3715 = vmatpush.bf16.msrb.mxu2 %v5496_v11 }
 0x2c0   : > { %v5679_v62 = vpop.eup %5678  ;;  %v2924_v37 = vadd.f32 %v2923_v60, %v2875_v58  ;;  %v3900_v44 = vmul.f32 1.442695, %v3881_v61  ;;  %v3262_v50 = vmax.f32 %v3020_v26, 0.0  ;;  %v2263_v61 = vld [vmem:[#allocation3 + $0x38] sm:$0xff] }
 0x2c1   : > { %v5681_v63 = vpop.eup %5680  ;;  %v2375_v45 = vpop.xlane.xlu2 %2374  ;;  %v3928_v4 = vadd.f32 1.0, %v5679_v62 }
 0x2c2   : > { %v3265_v24 = vmax.f32 %v2924_v37, 0.0  ;;  %v2431_v8 = vadd.f32 %v2375_v45, %v2261_v27  ;;  %v3995_v29 = vsub.f32 1.0, %v5681_v63  ;;  %5682 = vpow2.f32 %v3900_v44 }
 0x2c3   : > { %v2972_v36 = vpop.f32.mrf.mxu2  ;;  %5684 = vrcp.f32 %v3928_v4  ;;  %v3848_v14 = vld [vmem:[#allocation3 + $0x20] sm:$0xff] }
 0x2c4   : > { %2448 = vst.msk [vmem:[#allocation3 + $0x28] sm:$0xff] %vm1325_vm0, %v2431_v8  ;;  %v2973_v15 = vadd.f32 %v2972_v36, %v6897_v2  ;;  %v3021_v13 = vpop.f32.mrf.mxu3  ;;  %4161 = vperm.xlu1 %5669, %v5681_v63   ;;  %4033 = vperm.xlu2 %5668, %v3995_v29   ;;  %v3866_v17 = vadd.f32 %v6906_v59, %v3848_v14  ;;  %v5480_v29 = vld [vmem:[#allocation21 + $0x18] sm:$0xff] }
 0x2c5   : > { %v6943_v20 = vpack.c.bf16 %v3265_v24, %v3261_v3  ;;  %v2877_v21 = vpop.f32.mrf.mxu0  ;;  %3617 = vmatpush.bf16.msrb.mxu0 %v5480_v29 }
 0x2c6   : > { %v3022_v34 = vadd.f32 %v3021_v13, %v2973_v15  ;;  %v2878_v18 = vadd.f32 %v2877_v21, %v6888_v48  ;;  %v2926_v7 = vpop.f32.mrf.mxu1  ;;  %v3882_v30 = vsub.f32 0.0, %v3866_v17 }
 0x2c8   : > { %v5683_v40 = vpop.eup %5682  ;;  %v3266_v49 = vmax.f32 %v3022_v34, 0.0  ;;  %v2927_v31 = vadd.f32 %v2926_v7, %v2878_v18  ;;  %3072 = vmatmul.bf16.gmra.mxu0 %v6528_v56  ;;  %3170 = vmatmul.bf16.gmra.mxu2 %v6528_v56  ;;  %v3902_v46 = vmul.f32 1.442695, %v3882_v30 }
 0x2c9   : > { %v5685_v41 = vpop.eup %5684  ;;  %3121 = vmatmul.bf16.gmra.mxu1 %v6530_v57  ;;  %3219 = vmatmul.bf16.gmra.mxu3 %v6530_v57  ;;  %v2380_v55 = vpop.xlane.xlu0 %2379  ;;  %v3929_v19 = vadd.f32 1.0, %v5683_v40 }
 0x2ca   : > { %v2432_v52 = vadd.f32 %v2380_v55, %v2262_v6  ;;  %4166 = vperm.xlu0 %5670, %v5685_v41   ;;  %5686 = vpow2.f32 %v3902_v46  ;;  %v6950_v10 = vpack.c.bf16 %v3266_v49, %v3262_v50  ;;  %v3996_v37 = vsub.f32 1.0, %v5685_v41  ;;  %v2264_v6 = vld [vmem:[#allocation3 + $0x40] sm:$0xff]  ;;  %3618 = vmatpush.bf16.msrb.mxu0 %v5479_v35 }
 0x2cb   : > { %v2975_v53 = vpop.f32.mrf.mxu2  ;;  %5688 = vrcp.f32 %v3929_v19  ;;  %v3849_v0 = vld [vmem:[#allocation3 + $0x28] sm:$0xff]  ;;  %v3269_v4 = vmax.f32 %v2927_v31, 0.0 }
 0x2cc   : > { %2449 = vst.msk [vmem:[#allocation3 + $0x30] sm:$0xff] %vm1325_vm0, %v2432_v52  ;;  %v2976_v56 = vadd.f32 %v2975_v53, %v6897_v2  ;;  %v3024_v51 = vpop.f32.mrf.mxu3  ;;  %v3867_v54 = vadd.f32 %v6906_v59, %v3849_v0 }
 0x2cd   : > { %v2879_v16 = vpop.f32.mrf.mxu0 }
 0x2ce   : > { %v3025_v57 = vadd.f32 %v3024_v51, %v2976_v56  ;;  %v2880_v26 = vadd.f32 %v2879_v16, %v6888_v48  ;;  %v2928_v58 = vpop.f32.mrf.mxu1  ;;  %v3883_v60 = vsub.f32 0.0, %v3867_v54  ;;  %v5495_v16 = vld [vmem:[#allocation21 + $0x90] sm:$0xff] }
 0x2cf   : > { %3716 = vmatpush.bf16.msrb.mxu2 %v5495_v16 }
 0x2d0   : > { %v5687_v27 = vpop.eup %5686  ;;  %v2929_v62 = vadd.f32 %v2928_v58, %v2880_v26  ;;  %v3904_v44 = vmul.f32 1.442695, %v3883_v60  ;;  %v3270_v55 = vmax.f32 %v3025_v57, 0.0 }
 0x2d1   : > { %v5689_v63 = vpop.eup %5688  ;;  %v2385_v3 = vpop.xlane.xlu1 %2384  ;;  %v3930_v45 = vadd.f32 1.0, %v5687_v27 }
 0x2d2   : > { %v3273_v24 = vmax.f32 %v2929_v62, 0.0  ;;  %v2433_v8 = vadd.f32 %v2385_v3, %v2263_v61  ;;  %4038 = vperm.xlu0 %5670, %v3996_v37   ;;  %4171 = vperm.xlu2 %5668, %v5689_v63   ;;  %5690 = vpow2.f32 %v3904_v44  ;;  %v3997_v46 = vsub.f32 1.0, %v5689_v63  ;;  %v2265_v61 = vld [vmem:[#allocation3 + $0x48] sm:$0xff] }
 0x2d3   : > { %v2977_v39 = vpop.f32.mrf.mxu2  ;;  %5692 = vrcp.f32 %v3930_v45  ;;  %v3850_v36 = vld [vmem:[#allocation3 + $0x30] sm:$0xff] }
 0x2d4   : > { %2450 = vst.msk [vmem:[#allocation3 + $0x38] sm:$0xff] %vm1325_vm0, %v2433_v8  ;;  %v2978_v14 = vadd.f32 %v2977_v39, %v6897_v2  ;;  %v3026_v15 = vpop.f32.mrf.mxu3  ;;  %v3868_v13 = vadd.f32 %v6906_v59, %v3850_v36  ;;  %v6959_v17 = vpack.c.bf16 %v3273_v24, %v3269_v4  ;;  %v5487_v39 = vld [vmem:[#allocation21 + $0x50] sm:$0xff] }
 0x2d5   : > { %v2882_v21 = vpop.f32.mrf.mxu0  ;;  %3667 = vmatpush.bf16.msrb.mxu1 %v5487_v39 }
 0x2d6   : > { %v3027_v34 = vadd.f32 %v3026_v15, %v2978_v14  ;;  %v2883_v18 = vadd.f32 %v2882_v21, %v6888_v48  ;;  %v2931_v7 = vpop.f32.mrf.mxu1  ;;  %v3884_v30 = vsub.f32 0.0, %v3868_v13 }
 0x2d8   : > { %v5691_v40 = vpop.eup %5690  ;;  %v3274_v49 = vmax.f32 %v3027_v34, 0.0  ;;  %v2932_v31 = vadd.f32 %v2931_v7, %v2883_v18  ;;  %3077 = vmatmul.bf16.gmra.mxu0 %v6544_v42  ;;  %3175 = vmatmul.bf16.gmra.mxu2 %v6544_v42  ;;  %v3906_v41 = vmul.f32 1.442695, %v3884_v30 }
 0x2d9   : > { %v5693_v50 = vpop.eup %5692  ;;  %3126 = vmatmul.bf16.gmra.mxu1 %v6546_v43  ;;  %3224 = vmatmul.bf16.gmra.mxu3 %v6546_v43  ;;  %v2390_v19 = vpop.xlane.xlu2 %2389  ;;  %v3931_v52 = vadd.f32 1.0, %v5691_v40 }
 0x2da   : > { %v2434_v53 = vadd.f32 %v2390_v19, %v2264_v6  ;;  %4176 = vperm.xlu1 %5669, %v5693_v50   ;;  %4043 = vperm.xlu2 %5668, %v3997_v46   ;;  %5694 = vpow2.f32 %v3906_v41  ;;  %v6966_v51 = vpack.c.bf16 %v3274_v49, %v3270_v55  ;;  %v3998_v37 = vsub.f32 1.0, %v5693_v50  ;;  %v2266_v6 = vld [vmem:[#allocation3 + $0x50] sm:$0xff] }
 0x2db   : > { %v2980_v0 = vpop.f32.mrf.mxu2  ;;  %5696 = vrcp.f32 %v3931_v52  ;;  %v3851_v56 = vld [vmem:[#allocation3 + $0x38] sm:$0xff]  ;;  %v3277_v3 = vmax.f32 %v2932_v31, 0.0 }
 0x2dc   : > { %2451 = vst.msk [vmem:[#allocation3 + $0x40] sm:$0xff] %vm1325_vm0, %v2434_v53  ;;  %v2981_v42 = vadd.f32 %v2980_v0, %v6897_v2  ;;  %v3029_v54 = vpop.f32.mrf.mxu3  ;;  %v3869_v11 = vadd.f32 %v6906_v59, %v3851_v56 }
 0x2dd   : > { %v2884_v43 = vpop.f32.mrf.mxu0 }
 0x2de   : > { %v6971_v57 = vadd.f32 %v3029_v54, %v2981_v42  ;;  %v2885_v26 = vadd.f32 %v2884_v43, %v6888_v48  ;;  %v2933_v58 = vpop.f32.mrf.mxu1  ;;  %v3885_v60 = vsub.f32 0.0, %v3869_v11  ;;  %v5494_v42 = vld [vmem:[#allocation21 + $0x88] sm:$0xff] }
 0x2df   : > { %3717 = vmatpush.bf16.msrb.mxu2 %v5494_v42 }
 0x2e0   : > { %v5695_v27 = vpop.eup %5694  ;;  %v2934_v62 = vadd.f32 %v2933_v58, %v2885_v26  ;;  %v3908_v44 = vmul.f32 1.442695, %v3885_v60  ;;  %v2267_v26 = vld [vmem:[#allocation3 + $0x58] sm:$0xff] }
 0x2e1   : > { %v5697_v63 = vpop.eup %5696  ;;  %v2395_v45 = vpop.xlane.xlu0 %2394  ;;  %v3932_v4 = vadd.f32 1.0, %v5695_v27  ;;  %v5502_v27 = vld [vmem:[#allocation21 + $0xc8] sm:$0xff] }
 0x2e2   : > { %v3281_v24 = vmax.f32 %v2934_v62, 0.0  ;;  %v2435_v8 = vadd.f32 %v2395_v45, %v2265_v61  ;;  %4181 = vperm.xlu0 %5670, %v5697_v63   ;;  %4048 = vperm.xlu1 %5669, %v3998_v37   ;;  %v3999_v29 = vsub.f32 1.0, %v5697_v63  ;;  %5698 = vpow2.f32 %v3908_v44  ;;  %v5478_v62 = vld [vmem:[#allocation21 + $0x8] sm:$0xff] }
 0x2e3   : > { %v6974_v36 = vpop.f32.mrf.mxu2  ;;  %5700 = vrcp.f32 %v3932_v4  ;;  %v3852_v14 = vld [vmem:[#allocation3 + $0x40] sm:$0xff]  ;;  %v5486_v37 = vld [vmem:[#allocation21 + $0x48] sm:$0xff]  ;;  %3766 = vmatpush.bf16.msrb.mxu3 %v5502_v27  ;;  %3619 = vmatpush.bf16.msrb.mxu0 %v5478_v62  ;;  %v5501_v27 = vld [vmem:[#allocation21 + $0xc0] sm:$0xff] }
 0x2e4   : > { %2452 = vst.msk [vmem:[#allocation3 + $0x48] sm:$0xff] %vm1325_vm0, %v2435_v8  ;;  %v6977_v15 = vpop.f32.mrf.mxu3  ;;  %4053 = vperm.xlu2 %5668, %v3999_v29   ;;  %v3870_v13 = vadd.f32 %v6906_v59, %v3852_v14  ;;  %v6980_v21 = vpack.c.bf16 %v3281_v24, %v3277_v3  ;;  %3668 = vmatpush.bf16.msrb.mxu1 %v5486_v37  ;;  %v5477_v14 = vld [vmem:[#allocation21] sm:$0xff] }
 0x2e5   : > { %v2887_v34 = vpop.f32.mrf.mxu0 }
 0x2e6   : > { %v2888_v18 = vadd.f32 %v2887_v34, %v6888_v48  ;;  %v2936_v7 = vpop.f32.mrf.mxu1  ;;  %v3886_v30 = vsub.f32 0.0, %v3870_v13  ;;  %v5485_v13 = vld [vmem:[#allocation21 + $0x40] sm:$0xff] }
 0x2e7   : > { %3620 = vmatpush.bf16.msrb.mxu0 %v5477_v14  ;;  %3767 = vmatpush.bf16.msrb.mxu3 %v5501_v27 }
 0x2e8   : > { %v5699_v40 = vpop.eup %5698  ;;  %v2937_v49 = vadd.f32 %v2936_v7, %v2888_v18  ;;  %3082 = vmatmul.bf16.gmra.mxu0 %v6560_v32  ;;  %3180 = vmatmul.bf16.gmra.mxu2 %v6560_v32  ;;  %v3910_v31 = vmul.f32 1.442695, %v3886_v30 }
 0x2e9   : > { %v5701_v46 = vpop.eup %5700  ;;  %3131 = vmatmul.bf16.gmra.mxu1 %v6562_v33  ;;  %3229 = vmatmul.bf16.gmra.mxu3 %v6562_v33  ;;  %v2400_v41 = vpop.xlane.xlu1 %2399  ;;  %v3933_v50 = vadd.f32 1.0, %v5699_v40  ;;  %v2268_v40 = vld [vmem:[#allocation3 + $0x60] sm:$0xff] }
 0x2ea   : > { %v2436_v55 = vadd.f32 %v2400_v41, %v2266_v6  ;;  %v4000_v19 = vsub.f32 1.0, %v5701_v46  ;;  %5702 = vpow2.f32 %v3910_v31  ;;  %v3285_v5 = vmax.f32 %v2937_v49, 0.0  ;;  %3669 = vmatpush.bf16.msrb.mxu1 %v5485_v13 }
 0x2eb   : > { %v2985_v52 = vpop.f32.mrf.mxu2  ;;  %5704 = vrcp.f32 %v3933_v50  ;;  %v3853_v53 = vld [vmem:[#allocation3 + $0x48] sm:$0xff] }
 0x2ec   : > { %2453 = vst.msk [vmem:[#allocation3 + $0x50] sm:$0xff] %vm1325_vm0, %v2436_v55  ;;  %v2986_v0 = vadd.f32 %v2985_v52, %v6897_v2  ;;  %v3034_v56 = vpop.f32.mrf.mxu3  ;;  %4186 = vperm.xlu2 %5668, %v5701_v46   ;;  %4058 = vperm.xlu1 %5669, %v4000_v19   ;;  %v3871_v32 = vadd.f32 %v6906_v59, %v3853_v53  ;;  %v5493_v53 = vld [vmem:[#allocation21 + $0x80] sm:$0xff] }
 0x2ed   : > { %v2889_v54 = vpop.f32.mrf.mxu0  ;;  %3718 = vmatpush.bf16.msrb.mxu2 %v5493_v53 }
 0x2ee   : > { %v6990_v33 = vadd.f32 %v3034_v56, %v2986_v0  ;;  %v2890_v11 = vadd.f32 %v2889_v54, %v6888_v48  ;;  %v2938_v16 = vpop.f32.mrf.mxu1  ;;  %v3887_v43 = vsub.f32 0.0, %v3871_v32 }
 0x2f0   : > { %v5703_v58 = vpop.eup %5702  ;;  %v2939_v60 = vadd.f32 %v2938_v16, %v2890_v11  ;;  %v3912_v61 = vmul.f32 1.442695, %v3887_v43 }
 0x2f1   : > { %v5705_v44 = vpop.eup %5704  ;;  %v2405_v63 = vpop.xlane.xlu2 %2404  ;;  %v3934_v3 = vadd.f32 1.0, %v5703_v58 }
 0x2f2   : > { %v3289_v45 = vmax.f32 %v2939_v60, 0.0  ;;  %v2437_v4 = vadd.f32 %v2405_v63, %v2267_v26  ;;  %v4001_v24 = vsub.f32 1.0, %v5705_v44  ;;  %5706 = vpow2.f32 %v3912_v61  ;;  %v2269_v26 = vld [vmem:[#allocation3 + $0x68] sm:$0xff] }
 0x2f3   : > { %v6993_v8 = vpop.f32.mrf.mxu2  ;;  %5708 = vrcp.f32 %v3934_v3  ;;  %v3854_v29 = vld [vmem:[#allocation3 + $0x50] sm:$0xff] }
 0x2f4   : > { %2454 = vst.msk [vmem:[#allocation3 + $0x58] sm:$0xff] %vm1325_vm0, %v2437_v4  ;;  %v6996_v35 = vpop.f32.mrf.mxu3  ;;  %4063 = vperm.xlu2 %5668, %v4001_v24   ;;  %4191 = vperm.xlu1 %5669, %v5705_v44   ;;  %v3872_v39 = vadd.f32 %v6906_v59, %v3854_v29  ;;  %v6999_v34 = vpack.c.bf16 %v3289_v45, %v3285_v5 }
 0x2f5   : > { %v2892_v18 = vpop.f32.mrf.mxu0 }
 0x2f6   : > { %v2893_v7 = vadd.f32 %v2892_v18, %v6888_v48  ;;  %v2941_v30 = vpop.f32.mrf.mxu1  ;;  %v3888_v6 = vsub.f32 0.0, %v3872_v39 }
 0x2f8   : > { %v5707_v49 = vpop.eup %5706  ;;  %v2942_v31 = vadd.f32 %v2941_v30, %v2893_v7  ;;  %3087 = vmatmul.bf16.gmra.mxu0 %v6576_v22  ;;  %3185 = vmatmul.bf16.gmra.mxu2 %v6576_v22  ;;  %v3914_v46 = vmul.f32 1.442695, %v3888_v6  ;;  %v2270_v6 = vld [vmem:[#allocation3 + $0x70] sm:$0xff] }
 0x2f9   : > { %v5709_v41 = vpop.eup %5708  ;;  %3136 = vmatmul.bf16.gmra.mxu1 %v6578_v23  ;;  %3234 = vmatmul.bf16.gmra.mxu3 %v6578_v23  ;;  %v2410_v50 = vpop.xlane.xlu0 %2409  ;;  %v3935_v55 = vadd.f32 1.0, %v5707_v49 }
 0x2fa   : > { %v2438_v19 = vadd.f32 %v2410_v50, %v2268_v40  ;;  %4196 = vperm.xlu0 %5670, %v5709_v41   ;;  %v4002_v52 = vsub.f32 1.0, %v5709_v41  ;;  %5710 = vpow2.f32 %v3914_v46  ;;  %v3293_v37 = vmax.f32 %v2942_v31, 0.0 }
 0x2fb   : > { %v2990_v0 = vpop.f32.mrf.mxu2  ;;  %5712 = vrcp.f32 %v3935_v55  ;;  %v3855_v56 = vld [vmem:[#allocation3 + $0x58] sm:$0xff] }
 0x2fc   : > { %2455 = vst.msk [vmem:[#allocation3 + $0x60] sm:$0xff] %vm1325_vm0, %v2438_v19  ;;  %v2991_v22 = vadd.f32 %v2990_v0, %v6897_v2  ;;  %v3039_v32 = vpop.f32.mrf.mxu3  ;;  %4068 = vperm.xlu1 %5669, %v4002_v52   ;;  %v3873_v42 = vadd.f32 %v6906_v59, %v3855_v56 }
 0x2fd   : > { %v2894_v23 = vpop.f32.mrf.mxu0 }
 0x2fe   : > { %v7009_v54 = vadd.f32 %v3039_v32, %v2991_v22  ;;  %v2895_v11 = vadd.f32 %v2894_v23, %v6888_v48  ;;  %v2943_v16 = vpop.f32.mrf.mxu1  ;;  %v3889_v43 = vsub.f32 0.0, %v3873_v42 }
 0x300   : > { %v5711_v58 = vpop.eup %5710  ;;  %v2944_v60 = vadd.f32 %v2943_v16, %v2895_v11  ;;  %v3916_v61 = vmul.f32 1.442695, %v3889_v43  ;;  %v2271_v11 = vld [vmem:[#allocation3 + $0x78] sm:$0xff] }
 0x301   : > { %v5713_v62 = vpop.eup %5712  ;;  %v2415_v44 = vpop.xlane.xlu1 %2414  ;;  %v3936_v5 = vadd.f32 1.0, %v5711_v58 }
 0x302   : > { %v3297_v63 = vmax.f32 %v2944_v60, 0.0  ;;  %v2439_v3 = vadd.f32 %v2415_v44, %v2269_v26  ;;  %4201 = vperm.xlu2 %5668, %v5713_v62   ;;  %v4003_v45 = vsub.f32 1.0, %v5713_v62  ;;  %5714 = vpow2.f32 %v3916_v61 }
 0x303   : > { %v7012_v4 = vpop.f32.mrf.mxu2  ;;  %5716 = vrcp.f32 %v3936_v5  ;;  %v3856_v24 = vld [vmem:[#allocation3 + $0x60] sm:$0xff] }
 0x304   : > { %2456 = vst.msk [vmem:[#allocation3 + $0x68] sm:$0xff] %vm1325_vm0, %v2439_v3  ;;  %v7015_v29 = vpop.f32.mrf.mxu3  ;;  %4073 = vperm.xlu0 %5670, %v4003_v45   ;;  %v3874_v39 = vadd.f32 %v6906_v59, %v3856_v24  ;;  %v7018_v14 = vpack.c.bf16 %v3297_v63, %v3293_v37 }
 0x305   : > { %v2897_v13 = vpop.f32.mrf.mxu0 }
 0x306   : > { %v2898_v18 = vadd.f32 %v2897_v13, %v6888_v48  ;;  %v2946_v7 = vpop.f32.mrf.mxu1  ;;  %v3890_v30 = vsub.f32 0.0, %v3874_v39  ;;  %v7040_v39 = vperm.slane %v6884_v28, 2  ;;  %v5736_v28 = vld [vmem:[#allocation20] sm:$0xf] }
 0x308   : > { %v5715_v40 = vpop.eup %5714  ;;  %v2947_v49 = vadd.f32 %v2946_v7, %v2898_v18  ;;  %3092 = vmatmul.bf16.gmra.mxu0 %v6592_v9  ;;  %3190 = vmatmul.bf16.gmra.mxu2 %v6592_v9  ;;  %v3918_v31 = vmul.f32 1.442695, %v3890_v30 }
 0x309   : > { %v5717_v46 = vpop.eup %5716  ;;  %3141 = vmatmul.bf16.gmra.mxu1 %v6594_v12  ;;  %3239 = vmatmul.bf16.gmra.mxu3 %v6594_v12  ;;  %v2420_v41 = vpop.xlane.xlu2 %2419  ;;  %v3937_v50 = vadd.f32 1.0, %v5715_v40 }
 0x30a   : > { %v2440_v55 = vadd.f32 %v2420_v41, %v2270_v6  ;;  %4206 = vperm.xlu1 %5669, %v5717_v46   ;;  %v4004_v19 = vsub.f32 1.0, %v5717_v46  ;;  %5718 = vpow2.f32 %v3918_v31  ;;  %v3301_v60 = vmax.f32 %v2947_v49, 0.0 }
 0x30b   : > { %v2995_v52 = vpop.f32.mrf.mxu2  ;;  %5720 = vrcp.f32 %v3937_v50  ;;  %v3857_v53 = vld [vmem:[#allocation3 + $0x68] sm:$0xff]  ;;  %v7045_v50 = vperm.slane %v5736_v28, 3 }
 0x30c   : > { %2457 = vst.msk [vmem:[#allocation3 + $0x70] sm:$0xff] %vm1325_vm0, %v2440_v55  ;;  %v2996_v0 = vadd.f32 %v2995_v52, %v6897_v2  ;;  %v3044_v9 = vpop.f32.mrf.mxu3  ;;  %4078 = vperm.xlu2 %5668, %v4004_v19   ;;  %v3875_v56 = vadd.f32 %v6906_v59, %v3857_v53 }
 0x30d   : > { %v2899_v22 = vpop.f32.mrf.mxu0 }
 0x30e   : > { %v7028_v32 = vadd.f32 %v3044_v9, %v2996_v0  ;;  %v2900_v12 = vadd.f32 %v2899_v22, %v6888_v48  ;;  %v2948_v42 = vpop.f32.mrf.mxu1  ;;  %v3891_v23 = vsub.f32 0.0, %v3875_v56 }
 0x310   : > { %v5719_v16 = vpop.eup %5718  ;;  %v2949_v43 = vadd.f32 %v2948_v42, %v2900_v12  ;;  %v3920_v26 = vmul.f32 1.442695, %v3891_v23 }
 0x311   : > { %v5721_v58 = vpop.eup %5720  ;;  %v2425_v61 = vpop.xlane.xlu0 %2424  ;;  %v3938_v27 = vadd.f32 1.0, %v5719_v16 }
 0x312   : > { %v3305_v62 = vmax.f32 %v2949_v43, 0.0  ;;  %v2441_v37 = vadd.f32 %v2425_v61, %v2271_v11  ;;  %4211 = vperm.xlu0 %5670, %v5721_v58   ;;  %v4005_v44 = vsub.f32 1.0, %v5721_v58  ;;  %5722 = vpow2.f32 %v3920_v26 }
 0x313   : > { %v7031_v5 = vpop.f32.mrf.mxu2  ;;  %5724 = vrcp.f32 %v3938_v27  ;;  %v3858_v63 = vld [vmem:[#allocation3 + $0x70] sm:$0xff] }
 0x314   : > { %2458 = vst.msk [vmem:[#allocation3 + $0x78] sm:$0xff] %vm1325_vm0, %v2441_v37  ;;  %v7034_v48 = vpop.f32.mrf.mxu3  ;;  %4083 = vperm.xlu1 %5669, %v4005_v44   ;;  %v3876_v3 = vadd.f32 %v6906_v59, %v3858_v63  ;;  %v7037_v45 = vpack.c.bf16 %v3305_v62, %v3301_v60 }
 0x315   : > { %v3058_v24 = vpop.f32.mrf.mxu0 }
 0x316   : > { %v3107_v13 = vpop.f32.mrf.mxu1  ;;  %v3892_v18 = vsub.f32 0.0, %v3876_v3  ;;  %v3059_v49 = vadd.f32 %v3058_v24, %v7040_v39 }
 0x318   : > { %v5723_v7 = vpop.eup %5722  ;;  %3621 = vmatmul.bf16.vlgmr.msrb.gmra.mxu0 %v6908_v25  ;;  %v3922_v30 = vmul.f32 1.442695, %v3892_v18  ;;  %v3108_v52 = vadd.f32 %v3107_v13, %v3059_v49 }
 0x319   : > { %v5725_v6 = vpop.eup %5724  ;;  %3670 = vmatmul.bf16.vlgmr.msrb.gmra.mxu1 %v6918_v38  ;;  %v3939_v40 = vadd.f32 1.0, %v5723_v7 }
 0x31a   : > { %4216 = vperm.xlu2 %5668, %v5725_v6   ;;  %v4006_v31 = vsub.f32 1.0, %v5725_v6  ;;  %5726 = vpow2.f32 %v3922_v30  ;;  %v3247_v11 = vmax.f32 %v3108_v52, 0.0 }
 0x31b   : > { %v3156_v46 = vpop.f32.mrf.mxu2  ;;  %5728 = vrcp.f32 %v3939_v40  ;;  %v3859_v41 = vld [vmem:[#allocation3 + $0x78] sm:$0xff] }
 0x31c   : > { %v3205_v55 = vpop.f32.mrf.mxu3  ;;  %4088 = vperm.xlu0 %5670, %v4006_v31   ;;  %v3877_v25 = vadd.f32 %v6906_v59, %v3859_v41  ;;  %v3157_v56 = vadd.f32 %v3156_v46, %v7045_v50 }
 0x31d   : > { %v3060_v19 = vpop.f32.mrf.mxu0 }
 0x31e   : > { %v3061_v38 = vadd.f32 %v3060_v19, %v7040_v39  ;;  %v3109_v53 = vpop.f32.mrf.mxu1  ;;  %v3893_v0 = vsub.f32 0.0, %v3877_v25  ;;  %v3206_v59 = vadd.f32 %v3205_v55, %v3157_v56 }
 0x320   : > { %v5727_v9 = vpop.eup %5726  ;;  %v3110_v22 = vadd.f32 %v3109_v53, %v3061_v38  ;;  %v3924_v12 = vmul.f32 1.442695, %v3893_v0  ;;  %v3248_v63 = vmax.f32 %v3206_v59, 0.0 }
 0x321   : > { %v5729_v42 = vpop.eup %5728  ;;  %v3940_v23 = vadd.f32 1.0, %v5727_v9 }
 0x322   : > { %v3251_v16 = vmax.f32 %v3110_v22, 0.0  ;;  %v4007_v43 = vsub.f32 1.0, %v5729_v42  ;;  %5730 = vpow2.f32 %v3924_v12 }
 0x323   : > { %v3158_v26 = vpop.f32.mrf.mxu2  ;;  %5732 = vrcp.f32 %v3940_v23 }
 0x324   : > { %v3327_v58 = vpack.c.bf16 %v3251_v16, %v3247_v11  ;;  %v3159_v60 = vadd.f32 %v3158_v26, %v7045_v50  ;;  %v3207_v61 = vpop.f32.mrf.mxu3  ;;  %4093 = vperm.xlu2 %5668, %v4007_v43  }
 0x325   : > { %v3063_v27 = vpop.f32.mrf.mxu0 }
 0x326   : > { %v3208_v62 = vadd.f32 %v3207_v61, %v3159_v60  ;;  %v3112_v37 = vpop.f32.mrf.mxu1  ;;  %3719 = vmatmul.bf16.vlgmr.msrb.gmra.mxu2 %v3327_v58  ;;  %v3064_v7 = vadd.f32 %v3063_v27, %v7040_v39 }
 0x328   : > { %v5731_v44 = vpop.eup %5730  ;;  %v3252_v3 = vmax.f32 %v3208_v62, 0.0  ;;  %3626 = vmatmul.bf16.gmra.mxu0 %v6927_v1  ;;  %v3113_v31 = vadd.f32 %v3112_v37, %v3064_v7 }
 0x329   : > { %v5733_v24 = vpop.eup %5732  ;;  %3675 = vmatmul.bf16.gmra.mxu1 %v6934_v47  ;;  %v3941_v13 = vadd.f32 1.0, %v5731_v44 }
 0x32a   : > { %v3328_v18 = vpack.c.bf16 %v3252_v3, %v3248_v63  ;;  %v4008_v30 = vsub.f32 1.0, %v5733_v24  ;;  %v3255_v47 = vmax.f32 %v3113_v31, 0.0  ;;  %v2983_v31 = vadd.f32 %v6974_v36, %v6897_v2 }
 0x32b   : > { %v3161_v6 = vpop.f32.mrf.mxu2  ;;  %5734 = vrcp.f32 %v3941_v13 }
 0x32c   : > { %v3210_v40 = vpop.f32.mrf.mxu3  ;;  %3768 = vmatmul.bf16.vlgmr.msrb.gmra.mxu3 %v3328_v18  ;;  %4098 = vperm.xlu1 %5669, %v4008_v30   ;;  %v3162_v1 = vadd.f32 %v3161_v6, %v7045_v50 }
 0x32d   : > { %v3065_v49 = vpop.f32.mrf.mxu0 }
 0x32e   : > { %v3066_v46 = vadd.f32 %v3065_v49, %v7040_v39  ;;  %v3114_v41 = vpop.f32.mrf.mxu1  ;;  %v3211_v38 = vadd.f32 %v3210_v40, %v3162_v1 }
 0x330   : > { %v3115_v28 = vadd.f32 %v3114_v41, %v3066_v46  ;;  %v3256_v23 = vmax.f32 %v3211_v38, 0.0 }
 0x331   : > { %v5735_v55 = vpop.eup %5734 }
 0x332   : > { %v3259_v25 = vmax.f32 %v3115_v28, 0.0  ;;  %4231 = vperm.xlu2 %5668, %v5735_v55   ;;  %v4009_v19 = vsub.f32 1.0, %v5735_v55 }
 0x333   : > { %v3163_v52 = vpop.f32.mrf.mxu2 }
 0x334   : > { %v3164_v53 = vadd.f32 %v3163_v52, %v7045_v50  ;;  %v3212_v0 = vpop.f32.mrf.mxu3  ;;  %4221 = vperm.xlu1 %5669, %v5729_v42   ;;  %4103 = vperm.xlu0 %5670, %v4009_v19   ;;  %v3331_v9 = vpack.c.bf16 %v3259_v25, %v3255_v47  ;;  %v3032_v25 = vadd.f32 %v6977_v15, %v2983_v31 }
 0x335   : > { %v3068_v56 = vpop.f32.mrf.mxu0 }
 0x336   : > { %v3213_v22 = vadd.f32 %v3212_v0, %v3164_v53  ;;  %v3117_v12 = vpop.f32.mrf.mxu1  ;;  %3724 = vmatmul.bf16.gmra.mxu2 %v3331_v9  ;;  %v3069_v16 = vadd.f32 %v3068_v56, %v7040_v39  ;;  %v3282_v38 = vmax.f32 %v3032_v25, 0.0 }
 0x338   : > { %v3260_v11 = vmax.f32 %v3213_v22, 0.0  ;;  %3631 = vmatmul.bf16.gmra.mxu0 %v6943_v20  ;;  %v3118_v58 = vadd.f32 %v3117_v12, %v3069_v16  ;;  %v3278_v22 = vmax.f32 %v6971_v57, 0.0 }
 0x339   : > { %3680 = vmatmul.bf16.gmra.mxu1 %v6950_v10 }
 0x33a   : > { %v3332_v43 = vpack.c.bf16 %v3260_v11, %v3256_v23  ;;  %v3263_v37 = vmax.f32 %v3118_v58, 0.0  ;;  %v3342_v16 = vpack.c.bf16 %v3282_v38, %v3278_v22  ;;  %v3294_v22 = vmax.f32 %v7009_v54, 0.0 }
 0x33b   : > { %v3166_v26 = vpop.f32.mrf.mxu2 }
 0x33c   : > { %v3215_v59 = vpop.f32.mrf.mxu3  ;;  %3773 = vmatmul.bf16.gmra.mxu3 %v3332_v43  ;;  %4226 = vperm.xlu0 %5670, %v5733_v24   ;;  %v3167_v27 = vadd.f32 %v3166_v26, %v7045_v50 }
 0x33d   : > { %v3070_v42 = vpop.f32.mrf.mxu0 }
 0x33e   : > { %v3071_v60 = vadd.f32 %v3070_v42, %v7040_v39  ;;  %v3119_v61 = vpop.f32.mrf.mxu1  ;;  %v3216_v63 = vadd.f32 %v3215_v59, %v3167_v27  ;;  %v2988_v42 = vadd.f32 %v6993_v8, %v6897_v2 }
 0x340   : > { %v3120_v62 = vadd.f32 %v3119_v61, %v3071_v60  ;;  %v3264_v24 = vmax.f32 %v3216_v63, 0.0 }
 0x342   : > { %v3267_v44 = vmax.f32 %v3120_v62, 0.0 }
 0x343   : > { %v3168_v20 = vpop.f32.mrf.mxu2 }
 0x344   : > { %v3169_v10 = vadd.f32 %v3168_v20, %v7045_v50  ;;  %v3217_v3 = vpop.f32.mrf.mxu3  ;;  %v3335_v13 = vpack.c.bf16 %v3267_v44, %v3263_v37  ;;  %v3037_v37 = vadd.f32 %v6996_v35, %v2988_v42 }
 0x345   : > { %v3073_v18 = vpop.f32.mrf.mxu0 }
 0x346   : > { %v3218_v7 = vadd.f32 %v3217_v3, %v3169_v10  ;;  %v3122_v30 = vpop.f32.mrf.mxu1  ;;  %3729 = vmatmul.bf16.gmra.mxu2 %v3335_v13  ;;  %v3074_v40 = vadd.f32 %v3073_v18, %v7040_v39  ;;  %v3290_v10 = vmax.f32 %v3037_v37, 0.0 }
 0x348   : > { %v3268_v6 = vmax.f32 %v3218_v7, 0.0  ;;  %3636 = vmatmul.bf16.gmra.mxu0 %v6959_v17  ;;  %v3123_v28 = vadd.f32 %v3122_v30, %v3074_v40  ;;  %v3286_v30 = vmax.f32 %v6990_v33, 0.0 }
 0x349   : > { %3685 = vmatmul.bf16.gmra.mxu1 %v6966_v51 }
 0x34a   : > { %v3336_v49 = vpack.c.bf16 %v3268_v6, %v3264_v24  ;;  %v3271_v51 = vmax.f32 %v3123_v28, 0.0 }
 0x34b   : > { %v3171_v46 = vpop.f32.mrf.mxu2 }
 0x34c   : > { %v3220_v41 = vpop.f32.mrf.mxu3  ;;  %3778 = vmatmul.bf16.gmra.mxu3 %v3336_v49  ;;  %v3172_v17 = vadd.f32 %v3171_v46, %v7045_v50  ;;  %v3346_v49 = vpack.c.bf16 %v3290_v10, %v3286_v30 }
 0x34d   : > { %v3075_v1 = vpop.f32.mrf.mxu0 }
 0x34e   : > { %v3076_v55 = vadd.f32 %v3075_v1, %v7040_v39  ;;  %v3124_v47 = vpop.f32.mrf.mxu1  ;;  %v3221_v0 = vadd.f32 %v3220_v41, %v3172_v17  ;;  %v2993_v1 = vadd.f32 %v7012_v4, %v6897_v2 }
 0x350   : > { %v3125_v19 = vadd.f32 %v3124_v47, %v3076_v55  ;;  %v3272_v15 = vmax.f32 %v3221_v0, 0.0 }
 0x352   : > { %v3275_v52 = vmax.f32 %v3125_v19, 0.0  ;;  %v3042_v19 = vadd.f32 %v7015_v29, %v2993_v1 }
 0x353   : > { %v3173_v53 = vpop.f32.mrf.mxu2 }
 0x354   : > { %v3174_v36 = vadd.f32 %v3173_v53, %v7045_v50  ;;  %v3222_v9 = vpop.f32.mrf.mxu3  ;;  %v3339_v56 = vpack.c.bf16 %v3275_v52, %v3271_v51  ;;  %v3298_v53 = vmax.f32 %v3042_v19, 0.0 }
 0x355   : > { %v3078_v12 = vpop.f32.mrf.mxu0 }
 0x356   : > { %v3223_v23 = vadd.f32 %v3222_v9, %v3174_v36  ;;  %v3127_v11 = vpop.f32.mrf.mxu1  ;;  %3734 = vmatmul.bf16.gmra.mxu2 %v3339_v56  ;;  %v3079_v26 = vadd.f32 %v3078_v12, %v7040_v39 }
 0x358   : > { %v3276_v43 = vmax.f32 %v3223_v23, 0.0  ;;  %3641 = vmatmul.bf16.gmra.mxu0 %v6980_v21  ;;  %v3128_v61 = vadd.f32 %v3127_v11, %v3079_v26 }
 0x359   : > { %3690 = vmatmul.bf16.gmra.mxu1 %v3342_v16  ;;  %v3350_v16 = vpack.c.bf16 %v3298_v53, %v3294_v22 }
 0x35a   : > { %v3340_v59 = vpack.c.bf16 %v3276_v43, %v3272_v15  ;;  %v3279_v20 = vmax.f32 %v3128_v61, 0.0 }
 0x35b   : > { %v3176_v58 = vpop.f32.mrf.mxu2 }
 0x35c   : > { %v3225_v60 = vpop.f32.mrf.mxu3  ;;  %3783 = vmatmul.bf16.gmra.mxu3 %v3340_v59  ;;  %v3177_v44 = vadd.f32 %v3176_v58, %v7045_v50  ;;  %v2998_v59 = vadd.f32 %v7031_v5, %v6897_v2 }
 0x35d   : > { %v3080_v57 = vpop.f32.mrf.mxu0 }
 0x35e   : > { %v3081_v27 = vadd.f32 %v3080_v57, %v7040_v39  ;;  %v3129_v62 = vpop.f32.mrf.mxu1  ;;  %v3226_v13 = vadd.f32 %v3225_v60, %v3177_v44 }
 0x360   : > { %v3130_v21 = vadd.f32 %v3129_v62, %v3081_v27  ;;  %v3280_v35 = vmax.f32 %v3226_v13, 0.0  ;;  %v3047_v27 = vadd.f32 %v7034_v48, %v2998_v59 }
 0x362   : > { %v3283_v63 = vmax.f32 %v3130_v21, 0.0  ;;  %v3306_v21 = vmax.f32 %v3047_v27, 0.0  ;;  %v4167_v27 = vpop.permute.xlu0 %4166 }
 0x363   : > { %v3178_v3 = vpop.f32.mrf.mxu2 }
 0x364   : > { %v3343_v18 = vpack.c.bf16 %v3283_v63, %v3279_v20  ;;  %v3179_v8 = vadd.f32 %v3178_v3, %v7045_v50  ;;  %v3227_v7 = vpop.f32.mrf.mxu3  ;;  %v3302_v3 = vmax.f32 %v7028_v32, 0.0 }
 0x365   : > { %v3083_v24 = vpop.f32.mrf.mxu0 }
 0x366   : > { %v3228_v6 = vadd.f32 %v3227_v7, %v3179_v8  ;;  %v3132_v40 = vpop.f32.mrf.mxu1  ;;  %3739 = vmatmul.bf16.gmra.mxu2 %v3343_v18  ;;  %v3084_v41 = vadd.f32 %v3083_v24, %v7040_v39  ;;  %v3354_v7 = vpack.c.bf16 %v3306_v21, %v3302_v3  ;;  %v4011_v21 = vld [vmem:[%s6398_s23 + $0x8] sm:$0xff] }
 0x368   : > { %v3284_v31 = vmax.f32 %v3228_v6, 0.0  ;;  %3646 = vmatmul.bf16.gmra.mxu0 %v6999_v34  ;;  %v3133_v47 = vadd.f32 %v3132_v40, %v3084_v41 }
 0x369   : > { %3695 = vmatmul.bf16.gmra.mxu1 %v3346_v49 }
 0x36a   : > { %v3344_v46 = vpack.c.bf16 %v3284_v31, %v3280_v35  ;;  %v3287_v52 = vmax.f32 %v3133_v47, 0.0 }
 0x36b   : > { %v3181_v28 = vpop.f32.mrf.mxu2 }
 0x36c   : > { %v3230_v55 = vpop.f32.mrf.mxu3  ;;  %3788 = vmatmul.bf16.gmra.mxu3 %v3344_v46  ;;  %v3182_v51 = vadd.f32 %v3181_v28, %v7045_v50 }
 0x36d   : > { %v3085_v33 = vpop.f32.mrf.mxu0 }
 0x36e   : > { %v3086_v25 = vadd.f32 %v3085_v33, %v7040_v39  ;;  %v3134_v17 = vpop.f32.mrf.mxu1  ;;  %v3231_v36 = vadd.f32 %v3230_v55, %v3182_v51 }
 0x370   : > { %v3135_v34 = vadd.f32 %v3134_v17, %v3086_v25  ;;  %v3288_v29 = vmax.f32 %v3231_v36, 0.0 }
 0x372   : > { %v3291_v38 = vmax.f32 %v3135_v34, 0.0 }
 0x373   : > { %v3183_v0 = vpop.f32.mrf.mxu2 }
 0x374   : > { %v3347_v9 = vpack.c.bf16 %v3291_v38, %v3287_v52  ;;  %v3184_v4 = vadd.f32 %v3183_v0, %v7045_v50  ;;  %v3232_v56 = vpop.f32.mrf.mxu3 }
 0x375   : > { %v3088_v12 = vpop.f32.mrf.mxu0 }
 0x376   : > { %v3233_v23 = vadd.f32 %v3232_v56, %v3184_v4  ;;  %v3137_v11 = vpop.f32.mrf.mxu1  ;;  %3744 = vmatmul.bf16.gmra.mxu2 %v3347_v9  ;;  %v3089_v26 = vadd.f32 %v3088_v12, %v7040_v39  ;;  %v4157_v56 = vpop.permute.xlu2 %4156 }
 0x378   : > { %v3292_v15 = vmax.f32 %v3233_v23, 0.0  ;;  %3651 = vmatmul.bf16.gmra.mxu0 %v7018_v14  ;;  %v3138_v60 = vadd.f32 %v3137_v11, %v3089_v26  ;;  %v7108_v11 = vld [vmem:[%s7271_s8] ss:$0 sm:$0xff] }
 0x379   : > { %3700 = vmatmul.bf16.gmra.mxu1 %v3350_v16  ;;  %v4010_v16 = vld [vmem:[%s6398_s23] sm:$0xff] }
 0x37a   : > { %v3348_v43 = vpack.c.bf16 %v3292_v15, %v3288_v29  ;;  %v3295_v37 = vmax.f32 %v3138_v60, 0.0  ;;  %v4029_v29 = vpop.permute.xlu1 %4028  ;;  %v4138_v26 = vld [vmem:[%s6406_s19] sm:$0xff] }
 0x37b   : > { %v3186_v42 = vpop.f32.mrf.mxu2 }
 0x37c   : > { %v3235_v58 = vpop.f32.mrf.mxu3  ;;  %3793 = vmatmul.bf16.gmra.mxu3 %v3348_v43  ;;  %v3187_v62 = vadd.f32 %v3186_v42, %v7045_v50  ;;  %v4106_v42 = vmul.f32 %v4029_v29, %v4010_v16 }
 0x37d   : > { %v3090_v54 = vpop.f32.mrf.mxu0 }
 0x37e   : > { %v3091_v57 = vadd.f32 %v3090_v54, %v7040_v39  ;;  %v3139_v61 = vpop.f32.mrf.mxu1  ;;  %v3236_v63 = vadd.f32 %v3235_v58, %v3187_v62  ;;  %v4234_v54 = vmul.f32 %v4157_v56, %v4138_v26  ;;  %v4034_v60 = vpop.permute.xlu2 %4033  ;;  %v4142_v26 = vld [vmem:[%s6406_s19 + $0x20] sm:$0xff] }
 0x37f   : > { %v4107_v3 = vmul.f32 %v4034_v60, %v4011_v21 }
 0x380   : > { %v3140_v14 = vadd.f32 %v3139_v61, %v3091_v57  ;;  %v3296_v48 = vmax.f32 %v3236_v63, 0.0 }
 0x382   : > { %v3299_v44 = vmax.f32 %v3140_v14, 0.0 }
 0x383   : > { %v3188_v20 = vpop.f32.mrf.mxu2 }
 0x384   : > { %v3351_v10 = vpack.c.bf16 %v3299_v44, %v3295_v37  ;;  %v3189_v2 = vadd.f32 %v3188_v20, %v7045_v50  ;;  %v3237_v5 = vpop.f32.mrf.mxu3 }
 0x385   : > { %v3093_v13 = vpop.f32.mrf.mxu0 }
 0x386   : > { %v3238_v18 = vadd.f32 %v3237_v5, %v3189_v2  ;;  %v3142_v8 = vpop.f32.mrf.mxu1  ;;  %3749 = vmatmul.bf16.gmra.mxu2 %v3351_v10  ;;  %v3094_v6 = vadd.f32 %v3093_v13, %v7040_v39  ;;  %v4139_v10 = vld [vmem:[%s6406_s19 + $0x8] sm:$0xff]  ;;  %v4162_v2 = vpop.permute.xlu1 %4161 }
 0x388   : > { %v3300_v30 = vmax.f32 %v3238_v18, 0.0  ;;  %3656 = vmatmul.bf16.gmra.mxu0 %v7037_v45  ;;  %v3143_v31 = vadd.f32 %v3142_v8, %v3094_v6  ;;  %v4172_v18 = vpop.permute.xlu2 %4171  ;;  %v4235_v8 = vmul.f32 %v4162_v2, %v4139_v10 }
 0x389   : > { %3705 = vmatmul.bf16.gmra.mxu1 %v3354_v7 }
 0x38a   : > { %v3352_v24 = vpack.c.bf16 %v3300_v30, %v3296_v48  ;;  %v3303_v28 = vmax.f32 %v3143_v31, 0.0 }
 0x38b   : > { %v3191_v40 = vpop.f32.mrf.mxu2 }
 0x38c   : > { %v3240_v49 = vpop.f32.mrf.mxu3  ;;  %3798 = vmatmul.bf16.gmra.mxu3 %v3352_v24  ;;  %v3192_v41 = vadd.f32 %v3191_v40, %v7045_v50 }
 0x38d   : > { %v3095_v35 = vpop.f32.mrf.mxu0 }
 0x38e   : > { %v3096_v32 = vadd.f32 %v3095_v35, %v7040_v39  ;;  %v3144_v46 = vpop.f32.mrf.mxu1  ;;  %v3241_v47 = vadd.f32 %v3240_v49, %v3192_v41  ;;  %v4012_v49 = vld [vmem:[%s6398_s23 + $0x10] sm:$0xff]  ;;  %v4039_v35 = vpop.permute.xlu0 %4038 }
 0x390   : > { %v3145_v1 = vadd.f32 %v3144_v46, %v3096_v32  ;;  %v3304_v52 = vmax.f32 %v3241_v47, 0.0  ;;  %v4140_v46 = vld [vmem:[%s6406_s19 + $0x10] sm:$0xff] }
 0x392   : > { %v3307_v55 = vmax.f32 %v3145_v1, 0.0  ;;  %v4108_v1 = vmul.f32 %v4039_v35, %v4012_v49 }
 0x393   : > { %v3193_v33 = vpop.f32.mrf.mxu2 }
 0x394   : > { %v3355_v45 = vpack.c.bf16 %v3307_v55, %v3303_v28  ;;  %v3194_v25 = vadd.f32 %v3193_v33, %v7045_v50  ;;  %v3242_v17 = vpop.f32.mrf.mxu3  ;;  %v4236_v55 = vmul.f32 %v4167_v27, %v4140_v46 }
 0x395   : > { %v3622_v19 = vpop.f32.mrf.mxu0 }
 0x396   : > { %v3243_v51 = vadd.f32 %v3242_v17, %v3194_v25  ;;  %v3671_v34 = vpop.f32.mrf.mxu1  ;;  %3754 = vmatmul.bf16.gmra.mxu2 %v3355_v45  ;;  %v4177_v45 = vpop.permute.xlu1 %4176 }
 0x397   : > { %v3672_v22 = vadd.f32 %v3671_v34, %v3622_v19  ;;  %v4044_v25 = vpop.permute.xlu2 %4043  ;;  %v4013_v34 = vld [vmem:[%s6398_s23 + $0x18] sm:$0xff] }
 0x398   : > { %v3308_v38 = vmax.f32 %v3243_v51, 0.0 }
 0x39a   : > { %v3356_v39 = vpack.c.bf16 %v3308_v38, %v3304_v52 }
 0x39c   : > { %3803 = vmatmul.bf16.gmra.mxu3 %v3356_v39 }
 0x39d   : > { %v3624_v53 = vpop.f32.mrf.mxu0 }
 0x39e   : > { %v3673_v0 = vpop.f32.mrf.mxu1  ;;  %v4049_v16 = vpop.permute.xlu1 %4048 }
 0x39f   : > { %v3674_v57 = vadd.f32 %v3673_v0, %v3624_v53  ;;  %v4141_v53 = vld [vmem:[%s6406_s19 + $0x18] sm:$0xff]  ;;  %v4054_v60 = vpop.permute.xlu2 %4053 }
 0x3a5   : > { %v3627_v36 = vpop.f32.mrf.mxu0 }
 0x3a6   : > { %v3676_v9 = vpop.f32.mrf.mxu1 }
 0x3a7   : > { %v3677_v7 = vadd.f32 %v3676_v9, %v3627_v36  ;;  %v4109_v36 = vmul.f32 %v4044_v25, %v4013_v34 }
 0x3a9   : > { %v3720_v4 = vpop.f32.mrf.mxu2 }
 0x3aa   : > { %v3721_v50 = vadd.f32 %v3720_v4, %v3672_v22  ;;  %v4237_v4 = vmul.f32 %v4172_v18, %v4141_v53 }
 0x3ad   : > { %v3629_v12 = vpop.f32.mrf.mxu0 }
 0x3ae   : > { %v3678_v23 = vpop.f32.mrf.mxu1 }
 0x3af   : > { %v3769_v15 = vpop.f32.mrf.mxu3  ;;  %v3679_v33 = vadd.f32 %v3678_v23, %v3629_v12  ;;  %v4014_v23 = vld [vmem:[%s6398_s23 + $0x20] sm:$0xff] }
 0x3b0   : > { %v3770_v43 = vadd.f32 %v3769_v15, %v3721_v50 }
 0x3b1   : > { %v3722_v59 = vpop.f32.mrf.mxu2 }
 0x3b2   : > { %v3978_v58 = vadd.f32 %v7108_v11, %v3770_v43  ;;  %v3723_v37 = vadd.f32 %v3722_v59, %v3674_v57  ;;  %v4238_v57 = vmul.f32 %v4177_v45, %v4142_v26  ;;  %v4146_v26 = vld [vmem:[%s6406_s19 + $0x40] sm:$0xff] }
 0x3b4   : > { %v4122_v61 = vadd.f32 %v4106_v42, %v3978_v58  ;;  %v4110_v58 = vmul.f32 %v4049_v16, %v4014_v23  ;;  %v4018_v16 = vld [vmem:[%s6398_s23 + $0x40] sm:$0xff] }
 0x3b5   : > { %v3632_v62 = vpop.f32.mrf.mxu0 }
 0x3b6   : > { %v4250_v14 = vadd.f32 %v4234_v54, %v4122_v61  ;;  %v3681_v44 = vpop.f32.mrf.mxu1 }
 0x3b7   : > { %v3771_v20 = vpop.f32.mrf.mxu3  ;;  %v3682_v56 = vadd.f32 %v3681_v44, %v3632_v62 }
 0x3b8   : > { %4266 = vst [vmem:[%s7115_s27] sm:$0xff] %v4250_v14  ;;  %v3772_v63 = vadd.f32 %v3771_v20, %v3723_v37  ;;  %v4015_v37 = vld [vmem:[%s6398_s23 + $0x28] sm:$0xff] }
 0x3b9   : > { %v3725_v5 = vpop.f32.mrf.mxu2  ;;  %v4143_v20 = vld [vmem:[%s6406_s19 + $0x28] sm:$0xff]  ;;  %v4111_v2 = vmul.f32 %v4054_v60, %v4015_v37 }
 0x3ba   : > { %v3979_v13 = vadd.f32 %v7108_v11, %v3772_v63  ;;  %v3726_v6 = vadd.f32 %v3725_v5, %v3677_v7  ;;  %v4182_v63 = vpop.permute.xlu0 %4181  ;;  %v4059_v5 = vpop.permute.xlu1 %4058 }
 0x3bc   : > { %v4123_v48 = vadd.f32 %v4107_v3, %v3979_v13 }
 0x3bd   : > { %v3634_v30 = vpop.f32.mrf.mxu0 }
 0x3be   : > { %v4251_v24 = vadd.f32 %v4235_v8, %v4123_v48  ;;  %v3683_v40 = vpop.f32.mrf.mxu1  ;;  %v4239_v8 = vmul.f32 %v4182_v63, %v4143_v20  ;;  %v4147_v63 = vld [vmem:[%s6406_s19 + $0x48] sm:$0xff] }
 0x3bf   : > { %v3774_v31 = vpop.f32.mrf.mxu3  ;;  %v3684_v61 = vadd.f32 %v3683_v40, %v3634_v30  ;;  %v4187_v30 = vpop.permute.xlu2 %4186  ;;  %v4016_v40 = vld [vmem:[%s6398_s23 + $0x30] sm:$0xff] }
 0x3c0   : > { %4267 = vst [vmem:[%s7115_s27 + $0x8] sm:$0xff] %v4251_v24  ;;  %v3775_v32 = vadd.f32 %v3774_v31, %v3726_v6  ;;  %v4144_v31 = vld [vmem:[%s6406_s19 + $0x30] sm:$0xff]  ;;  %v4112_v46 = vmul.f32 %v4059_v5, %v4016_v40 }
 0x3c1   : > { %v3727_v41 = vpop.f32.mrf.mxu2 }
 0x3c2   : > { %v3980_v28 = vadd.f32 %v7108_v11, %v3775_v32  ;;  %v3728_v19 = vadd.f32 %v3727_v41, %v3679_v33 }
 0x3c4   : > { %v4124_v47 = vadd.f32 %v4108_v1, %v3980_v28  ;;  %v4240_v1 = vmul.f32 %v4187_v30, %v4144_v31  ;;  %v4192_v28 = vpop.permute.xlu1 %4191 }
 0x3c5   : > { %v3637_v51 = vpop.f32.mrf.mxu0 }
 0x3c6   : > { %v4252_v17 = vadd.f32 %v4236_v55, %v4124_v47  ;;  %v3686_v52 = vpop.f32.mrf.mxu1 }
 0x3c7   : > { %v3776_v38 = vpop.f32.mrf.mxu3  ;;  %v3687_v7 = vadd.f32 %v3686_v52, %v3637_v51  ;;  %v4064_v51 = vpop.permute.xlu2 %4063 }
 0x3c8   : > { %4268 = vst [vmem:[%s7115_s27 + $0x10] sm:$0xff] %v4252_v17  ;;  %v3777_v39 = vadd.f32 %v3776_v38, %v3728_v19  ;;  %v4017_v19 = vld [vmem:[%s6398_s23 + $0x38] sm:$0xff] }
 0x3c9   : > { %v3730_v0 = vpop.f32.mrf.mxu2  ;;  %v4145_v38 = vld [vmem:[%s6406_s19 + $0x38] sm:$0xff]  ;;  %v4113_v53 = vmul.f32 %v4064_v51, %v4017_v19 }
 0x3ca   : > { %v3981_v9 = vadd.f32 %v7108_v11, %v3777_v39  ;;  %v3731_v50 = vadd.f32 %v3730_v0, %v3682_v56  ;;  %v4197_v56 = vpop.permute.xlu0 %4196 }
 0x3cc   : > { %v4125_v22 = vadd.f32 %v4109_v36, %v3981_v9  ;;  %v4241_v36 = vmul.f32 %v4192_v28, %v4145_v38 }
 0x3cd   : > { %v3639_v15 = vpop.f32.mrf.mxu0 }
 0x3ce   : > { %v4253_v12 = vadd.f32 %v4237_v4, %v4125_v22  ;;  %v3688_v59 = vpop.f32.mrf.mxu1  ;;  %v4069_v22 = vpop.permute.xlu1 %4068 }
 0x3cf   : > { %v3779_v29 = vpop.f32.mrf.mxu3  ;;  %v3689_v55 = vadd.f32 %v3688_v59, %v3639_v15 }
 0x3d0   : > { %4269 = vst [vmem:[%s7115_s27 + $0x18] sm:$0xff] %v4253_v12  ;;  %v3780_v43 = vadd.f32 %v3779_v29, %v3731_v50 }
 0x3d1   : > { %v3732_v42 = vpop.f32.mrf.mxu2 }
 0x3d2   : > { %v3982_v54 = vadd.f32 %v7108_v11, %v3780_v43  ;;  %v3733_v14 = vadd.f32 %v3732_v42, %v3684_v61  ;;  %v4114_v42 = vmul.f32 %v4069_v22, %v4018_v16  ;;  %v4202_v61 = vpop.permute.xlu2 %4201  ;;  %v4074_v37 = vpop.permute.xlu0 %4073  ;;  %v4022_v16 = vld [vmem:[%s6398_s23 + $0x60] sm:$0xff] }
 0x3d4   : > { %v4126_v27 = vadd.f32 %v4110_v58, %v3982_v54  ;;  %v4242_v54 = vmul.f32 %v4197_v56, %v4146_v26  ;;  %v4150_v26 = vld [vmem:[%s6406_s19 + $0x60] sm:$0xff] }
 0x3d5   : > { %v3642_v3 = vpop.f32.mrf.mxu0 }
 0x3d6   : > { %v4254_v62 = vadd.f32 %v4238_v57, %v4126_v27  ;;  %v3691_v18 = vpop.f32.mrf.mxu1 }
 0x3d7   : > { %v3781_v44 = vpop.f32.mrf.mxu3  ;;  %v3692_v9 = vadd.f32 %v3691_v18, %v3642_v3 }
 0x3d8   : > { %4270 = vst [vmem:[%s7115_s27 + $0x20] sm:$0xff] %v4254_v62  ;;  %v3782_v21 = vadd.f32 %v3781_v44, %v3733_v14  ;;  %v4019_v14 = vld [vmem:[%s6398_s23 + $0x48] sm:$0xff] }
 0x3d9   : > { %v3735_v10 = vpop.f32.mrf.mxu2  ;;  %v4115_v5 = vmul.f32 %v4074_v37, %v4019_v14 }
 0x3da   : > { %v3983_v13 = vadd.f32 %v7108_v11, %v3782_v21  ;;  %v3736_v6 = vadd.f32 %v3735_v10, %v3687_v7  ;;  %v4079_v7 = vpop.permute.xlu2 %4078 }
 0x3dc   : > { %v4127_v48 = vadd.f32 %v4111_v2, %v3983_v13  ;;  %v4243_v13 = vmul.f32 %v4202_v61, %v4147_v63 }
 0x3dd   : > { %v3644_v33 = vpop.f32.mrf.mxu0 }
 0x3de   : > { %v4255_v24 = vadd.f32 %v4239_v8, %v4127_v48  ;;  %v3693_v45 = vpop.f32.mrf.mxu1 }
 0x3df   : > { %v3784_v49 = vpop.f32.mrf.mxu3  ;;  %v3694_v60 = vadd.f32 %v3693_v45, %v3644_v33 }
 0x3e0   : > { %4271 = vst [vmem:[%s7115_s27 + $0x28] sm:$0xff] %v4255_v24  ;;  %v3785_v35 = vadd.f32 %v3784_v49, %v3736_v6  ;;  %v4020_v24 = vld [vmem:[%s6398_s23 + $0x50] sm:$0xff]  ;;  %v4207_v6 = vpop.permute.xlu1 %4206 }
 0x3e1   : > { %v3737_v32 = vpop.f32.mrf.mxu2 }
 0x3e2   : > { %v3984_v41 = vadd.f32 %v7108_v11, %v3785_v35  ;;  %v3738_v17 = vadd.f32 %v3737_v32, %v3689_v55  ;;  %v4148_v35 = vld [vmem:[%s6406_s19 + $0x50] sm:$0xff]  ;;  %v4116_v32 = vmul.f32 %v4079_v7, %v4020_v24  ;;  %v4217_v56 = vpop.permute.xlu2 %4216 }
 0x3e3   : > { %v4244_v28 = vmul.f32 %v4207_v6, %v4148_v35  ;;  %v4024_v24 = vld [vmem:[%s6398_s23 + $0x70] sm:$0xff] }
 0x3e4   : > { %v4128_v47 = vadd.f32 %v4112_v46, %v3984_v41  ;;  %v4152_v35 = vld [vmem:[%s6406_s19 + $0x70] sm:$0xff] }
 0x3e5   : > { %v3647_v12 = vpop.f32.mrf.mxu0 }
 0x3e6   : > { %v4256_v25 = vadd.f32 %v4240_v1, %v4128_v47  ;;  %v3696_v29 = vpop.f32.mrf.mxu1  ;;  %v4212_v47 = vpop.permute.xlu0 %4211 }
 0x3e7   : > { %v3786_v34 = vpop.f32.mrf.mxu3  ;;  %v3697_v18 = vadd.f32 %v3696_v29, %v3647_v12 }
 0x3e8   : > { %4272 = vst [vmem:[%s7115_s27 + $0x30] sm:$0xff] %v4256_v25  ;;  %v3787_v52 = vadd.f32 %v3786_v34, %v3738_v17  ;;  %v4021_v17 = vld [vmem:[%s6398_s23 + $0x58] sm:$0xff]  ;;  %v4084_v19 = vpop.permute.xlu1 %4083 }
 0x3e9   : > { %v3740_v39 = vpop.f32.mrf.mxu2 }
 0x3ea   : > { %v3985_v0 = vadd.f32 %v7108_v11, %v3787_v52  ;;  %v3741_v23 = vadd.f32 %v3740_v39, %v3692_v9  ;;  %v4149_v52 = vld [vmem:[%s6406_s19 + $0x58] sm:$0xff]  ;;  %v4117_v39 = vmul.f32 %v4084_v19, %v4021_v17  ;;  %v4094_v61 = vpop.permute.xlu2 %4093 }
 0x3ec   : > { %v4129_v4 = vadd.f32 %v4113_v53, %v3985_v0  ;;  %v4245_v0 = vmul.f32 %v4212_v47, %v4149_v52 }
 0x3ed   : > { %v3649_v21 = vpop.f32.mrf.mxu0 }
 0x3ee   : > { %v4257_v50 = vadd.f32 %v4241_v36, %v4129_v4  ;;  %v3698_v10 = vpop.f32.mrf.mxu1  ;;  %v4089_v12 = vpop.permute.xlu0 %4088 }
 0x3ef   : > { %v3789_v15 = vpop.f32.mrf.mxu3  ;;  %v3699_v55 = vadd.f32 %v3698_v10, %v3649_v21  ;;  %v4151_v10 = vld [vmem:[%s6406_s19 + $0x68] sm:$0xff] }
 0x3f0   : > { %4273 = vst [vmem:[%s7115_s27 + $0x38] sm:$0xff] %v4257_v50  ;;  %v3790_v43 = vadd.f32 %v3789_v15, %v3741_v23  ;;  %v4099_v29 = vpop.permute.xlu1 %4098 }
 0x3f1   : > { %v3742_v59 = vpop.f32.mrf.mxu2 }
 0x3f2   : > { %v3986_v58 = vadd.f32 %v7108_v11, %v3790_v43  ;;  %v3743_v62 = vadd.f32 %v3742_v59, %v3694_v60 }
 0x3f4   : > { %v4130_v57 = vadd.f32 %v4114_v42, %v3986_v58  ;;  %v4118_v42 = vmul.f32 %v4089_v12, %v4022_v16 }
 0x3f5   : > { %v3652_v46 = vpop.f32.mrf.mxu0 }
 0x3f6   : > { %v4258_v27 = vadd.f32 %v4242_v54, %v4130_v57  ;;  %v3701_v1 = vpop.f32.mrf.mxu1  ;;  %v4246_v54 = vmul.f32 %v4217_v56, %v4150_v26 }
 0x3f7   : > { %v3791_v44 = vpop.f32.mrf.mxu3  ;;  %v3702_v36 = vadd.f32 %v3701_v1, %v3652_v46  ;;  %v4120_v46 = vmul.f32 %v4099_v29, %v4024_v24 }
 0x3f8   : > { %4274 = vst [vmem:[%s7115_s27 + $0x40] sm:$0xff] %v4258_v27  ;;  %v3792_v20 = vadd.f32 %v3791_v44, %v3743_v62  ;;  %v4104_v27 = vpop.permute.xlu0 %4103  ;;  %v4023_v44 = vld [vmem:[%s6398_s23 + $0x68] sm:$0xff] }
 0x3f9   : > { %v3745_v2 = vpop.f32.mrf.mxu2 }
 0x3fa   : > { %v3987_v3 = vadd.f32 %v7108_v11, %v3792_v20  ;;  %v3746_v30 = vadd.f32 %v3745_v2, %v3697_v18  ;;  %v4222_v2 = vpop.permute.xlu1 %4221 }
 0x3fb   : > { %v4247_v18 = vmul.f32 %v4222_v2, %v4151_v10 }
 0x3fc   : > { %v4131_v8 = vadd.f32 %v4115_v5, %v3987_v3  ;;  %v4119_v3 = vmul.f32 %v4094_v61, %v4023_v44 }
 0x3fd   : > { %v3654_v9 = vpop.f32.mrf.mxu0 }
 0x3fe   : > { %v4259_v48 = vadd.f32 %v4243_v13, %v4131_v8  ;;  %v3703_v22 = vpop.f32.mrf.mxu1 }
 0x3ff   : > { %v3794_v40 = vpop.f32.mrf.mxu3  ;;  %v3704_v60 = vadd.f32 %v3703_v22, %v3654_v9 }
 0x400   : > { %4275 = vst [vmem:[%s7115_s27 + $0x48] sm:$0xff] %v4259_v48  ;;  %v3795_v49 = vadd.f32 %v3794_v40, %v3746_v30  ;;  %v4227_v40 = vpop.permute.xlu0 %4226 }
 0x401   : > { %v3747_v31 = vpop.f32.mrf.mxu2 }
 0x402   : > { %v3988_v41 = vadd.f32 %v7108_v11, %v3795_v49  ;;  %v3748_v25 = vadd.f32 %v3747_v31, %v3699_v55 }
 0x404   : > { %v4132_v33 = vadd.f32 %v4116_v32, %v3988_v41 }
 0x405   : > { %v3657_v62 = vpop.f32.mrf.mxu0 }
 0x406   : > { %v4260_v45 = vadd.f32 %v4244_v28, %v4132_v33  ;;  %v3706_v21 = vpop.f32.mrf.mxu1  ;;  %v4248_v28 = vmul.f32 %v4227_v40, %v4152_v35 }
 0x407   : > { %v3796_v51 = vpop.f32.mrf.mxu3  ;;  %v3707_v8 = vadd.f32 %v3706_v21, %v3657_v62 }
 0x408   : > { %4276 = vst [vmem:[%s7115_s27 + $0x50] sm:$0xff] %v4260_v45  ;;  %v3797_v34 = vadd.f32 %v3796_v51, %v3748_v25  ;;  %v4025_v25 = vld [vmem:[%s6398_s23 + $0x78] sm:$0xff]  ;;  %s4283_s23 = scalar_lea.sflag [#allocation8], %s6391_s9 }
 0x409   : > { %v3750_v38 = vpop.f32.mrf.mxu2  ;;  %v4153_v51 = vld [vmem:[%s6406_s19 + $0x78] sm:$0xff]  ;;  %v4121_v52 = vmul.f32 %v4104_v27, %v4025_v25 }
 0x40a   : > { %v3989_v53 = vadd.f32 %v7108_v11, %v3797_v34  ;;  %v3751_v23 = vadd.f32 %v3750_v38, %v3702_v36  ;;  %v4232_v34 = vpop.permute.xlu2 %4231 }
 0x40c   : > { %v4133_v4 = vadd.f32 %v4117_v39, %v3989_v53  ;;  %v4249_v39 = vmul.f32 %v4232_v34, %v4153_v51 }
 0x40d   : > { %v3659_v31 = vpop.f32.mrf.mxu0 }
 0x40e   : > { %v4261_v50 = vadd.f32 %v4245_v0, %v4133_v4  ;;  %v3708_v32 = vpop.f32.mrf.mxu1 }
 0x40f   : > { %v3799_v15 = vpop.f32.mrf.mxu3  ;;  %v3709_v55 = vadd.f32 %v3708_v32, %v3659_v31 }
 0x410   : > { %4277 = vst [vmem:[%s7115_s27 + $0x58] sm:$0xff] %v4261_v50  ;;  %v3800_v43 = vadd.f32 %v3799_v15, %v3751_v23 }
 0x411   : > { %v3752_v59 = vpop.f32.mrf.mxu2 }
 0x412   : > { %v3990_v58 = vadd.f32 %v7108_v11, %v3800_v43  ;;  %v3753_v37 = vadd.f32 %v3752_v59, %v3704_v60 }
 0x414   : > { %v4134_v57 = vadd.f32 %v4118_v42, %v3990_v58 }
 0x416   : > { %v4262_v14 = vadd.f32 %v4246_v54, %v4134_v57 }
 0x417   : > { %v3801_v20 = vpop.f32.mrf.mxu3 }
 0x418   : > { %4278 = vst [vmem:[%s7115_s27 + $0x60] sm:$0xff] %v4262_v14  ;;  %v3802_v63 = vadd.f32 %v3801_v20, %v3753_v37 }
 0x419   : > { %v3755_v5 = vpop.f32.mrf.mxu2 }
 0x41a   : > { %v3991_v13 = vadd.f32 %v7108_v11, %v3802_v63  ;;  %v3756_v30 = vadd.f32 %v3755_v5, %v3707_v8 }
 0x41c   : > { %v4135_v7 = vadd.f32 %v4119_v3, %v3991_v13 }
 0x41e   : > { %v4263_v48 = vadd.f32 %v4247_v18, %v4135_v7 }
 0x41f   : > { %v3804_v6 = vpop.f32.mrf.mxu3 }
 0x420   : > { %4279 = vst [vmem:[%s7115_s27 + $0x68] sm:$0xff] %v4263_v48  ;;  %v3805_v49 = vadd.f32 %v3804_v6, %v3756_v30 }
 0x421   : > { %v3757_v1 = vpop.f32.mrf.mxu2 }
 0x422   : > { %v3992_v41 = vadd.f32 %v7108_v11, %v3805_v49  ;;  %v3758_v45 = vadd.f32 %v3757_v1, %v3709_v55 }
 0x424   : > { %v4136_v33 = vadd.f32 %v4120_v46, %v3992_v41 }
 0x426   : > { %v4264_v47 = vadd.f32 %v4248_v28, %v4136_v33 }
 0x427   : > { %v3806_v17 = vpop.f32.mrf.mxu3 }
 0x428   : > { %4280 = vst [vmem:[%s7115_s27 + $0x70] sm:$0xff] %v4264_v47  ;;  %v3807_v19 = vadd.f32 %v3806_v17, %v3758_v45 }
 0x42a   : > { %v3993_v38 = vadd.f32 %v7108_v11, %v3807_v19 }
 0x42c   : > { %v4137_v53 = vadd.f32 %v4121_v52, %v3993_v38 }
 0x42e   : > { %v4265_v0 = vadd.f32 %v4249_v39, %v4137_v53 }
 0x430   : > { %4281 = vst [vmem:[%s7115_s27 + $0x78] sm:$0xff] %v4265_v0 }
 0x431   : > { %6064 = shalt.err (!%p6061_p13)
}
 0x432   : > { %s6161_s9 = smov 128   ;;  %s6162_s3 = smov 8  }
 0x433   : > { %5546 = dma.vmem_to_hbm [thread:$0]  (%p6359_p2), %s4296_s10, 2048, %s4298_s11, %s4283_s23, %s6161_s9, %s6161_s9, %s6162_s3  }
 0x434 PF: > { %s4312_s4 = sand.u32 1, %s6123_s15   ;;  %p5581_p0 = pnand %p4523_p6, %p6366_p5 }
 0x435   : > { %s4313_s30 = scalar_lea.sflag [#allocation8], %s4312_s4 }
 0x436   : > { %p5582_p4 = pneg %p5581_p0 }
 0x438   : > { %6118 = dma.done.wait (%p5582_p4), %s4313_s30, 2048  }
 0x439   : > { %6120 = vsyncadd (%p5582_p4), %s4313_s30, 4294965248  ;;  %s38_s13 = sadd.s32 1, %s6143_s13   ;;  %s7274_s18 = sld [smem:[#allocation33_spill]] }
 0x43a   : > { %p35_p7 = scmp.ge.s32.totalorder %s38_s13, 4   ;;  %s7275_s19 = sld [smem:[#allocation34_spill]] }
 0x43b   : > { %s7276_s15 = smov %s6127_s16  ;;  %s7277_s16 = smov %s6131_s17 }
 0x43c   : > { %s7278_s17 = smov %s6364_s26  ;;  %37 = sbr.rel (!%p35_p7) target bundleno = 26 (0x1a), region = 184 }
 0x441   :  { %4319 = vsyncpa [#allocation7], 1 }
 0x442   :  { %4321 = vsyncpa [#allocation7 + $0x1], 1 }
 0x443   :  { %4322 = vsyncpa [#allocation10], 1 }
 0x444   :  { %4324 = vsyncpa [#allocation10 + $0x1], 1 }
 0x445   :  { %4325 = vsyncpa [#allocation13], 1 }
 0x446   :  { %4326 = vsyncpa [#allocation16], 1 }
 0x447   :  { %4327 = vsyncpa [#allocation19], 1 }
 0x448   :  { %4328 = vsyncpa [#allocation22], 1 }
 0x449   :  { %4329 = vsyncpa [#allocation8], 1 }
 0x44a   :  { %4331 = vsyncpa [#allocation8 + $0x1], 1 }

</bundles_post_ra>
